<compile_context>
chip_gen: v7x
topology: tpu7x:2x2x1
jax: 0.10.0
libtpu: 0.0.40
codegen_flags: <defaults>
</compile_context>

<pallas_src>
import functools

import jax
import jax.numpy as jnp
from jax.experimental import pallas as pl
from jax.experimental.pallas import tpu as pltpu

BN_EPS = 1e-5
LANE = 128


# ----------------------------------------------------------------------------
# small helpers
# ----------------------------------------------------------------------------
def _round_up(x, m):
    return (x + m - 1) // m * m


def _pad_channels(x, cp):
    c = x.shape[-1]
    if c == cp:
        return x
    return jnp.pad(x, ((0, 0),) * (x.ndim - 1) + ((0, cp - c),))


def _spatial_pad(x, p):
    if p == 0:
        return x
    return jnp.pad(x, ((0, 0), (p, p), (p, p), (0, 0)))


def _choose_row_tile(H, W, cp):
    """Largest divisor of H whose f32 output tile (th*W*cp) stays <= ~2 MiB."""
    budget = 2 * 1024 * 1024
    best = 1
    for t in range(1, H + 1):
        if H % t == 0 and t * W * cp * 4 <= budget:
            best = t
    return best


# ----------------------------------------------------------------------------
# Pallas kernels
# ----------------------------------------------------------------------------
def _conv_stats_kernel(*refs, n_inputs, ksize, dil, th, W, cout):
    """3x3 conv (shifted-view matmuls) + per-tile BN partial stats.

    refs = (x_0..x_{n-1}, w_0..w_{n-1}, out, stats)
      x_j:   (1, Hp, Wp, Cj)      spatially padded input, bf16 (full image / batch)
      w_j:   (ntaps, Cj, cout)    tap weights, bf16
      out:   (1, th, W, cout)     raw conv output tile, f32
      stats: (1, 1, 8, cout)      row0 = sum, row1 = sum of squares (rest 0)
    """
    x_refs = refs[:n_inputs]
    w_refs = refs[n_inputs:2 * n_inputs]
    out_ref, stats_ref = refs[2 * n_inputs:]

    i = pl.program_id(1)
    row0 = i * th                      # output row offset within H
    Mt = th * W

    acc = jnp.zeros((Mt, cout), jnp.float32)
    for j in range(n_inputs):          # split-K over the (optionally) two inputs
        xr, wr = x_refs[j], w_refs[j]
        cj = xr.shape[-1]
        for ky in range(ksize):        # static unroll over conv taps -> MXU matmuls
            for kx in range(ksize):
                tap = ky * ksize + kx
                win = xr[0, pl.ds(row0 + ky * dil, th), pl.ds(kx * dil, W), :]
                acc = acc + jnp.dot(win.reshape(Mt, cj), wr[tap],
                                    preferred_element_type=jnp.float32)

    out_ref[...] = acc.reshape(1, th, W, cout).astype(out_ref.dtype)

    # BN partial stats (E[x] / E[x^2] form -> single pass over acc).
    s = jnp.sum(acc, axis=0, keepdims=True)          # (1, cout)
    sq = jnp.sum(acc * acc, axis=0, keepdims=True)   # (1, cout)
    rows = jax.lax.broadcasted_iota(jnp.int32, (8, cout), 0)
    stats = jnp.where(rows == 0, s, jnp.where(rows == 1, sq, 0.0))
    stats_ref[...] = stats.reshape(1, 1, 8, cout)


def _bn_relu_kernel(x_ref, scale_ref, shift_ref, out_ref):
    """Pass-2: y = relu(x*scale + shift), written as bf16 for the next conv."""
    y = x_ref[...] * scale_ref[...] + shift_ref[...]
    out_ref[...] = jnp.maximum(y, 0.0).astype(out_ref.dtype)


def _bn_relu_classifier_kernel(x_ref, scale_ref, shift_ref, w_ref, b_ref, out_ref,
                               *, apply_act):
    """Pass-2 of the last ConvModule fused with the 1x1 classifier (+bias)."""
    _, th, W, C = x_ref.shape
    x = x_ref[...].astype(jnp.float32)
    if apply_act:
        x = jnp.maximum(x * scale_ref[...] + shift_ref[...], 0.0)
    y = x.reshape(th * W, C).astype(w_ref.dtype)
    o = jnp.dot(y, w_ref[...], preferred_element_type=jnp.float32) + b_ref[...]
    Lp = w_ref.shape[-1]
    out_ref[...] = o.reshape(1, th, W, Lp).astype(out_ref.dtype)


# ----------------------------------------------------------------------------
# pallas_call wrappers
# ----------------------------------------------------------------------------
def conv_pass1(inputs, weights, ksize, dil, th):
    """Conv (no bias) over 1 or 2 padded NHWC inputs; also returns BN sums."""
    n_inputs = len(inputs)
    N, Hp, Wp, _ = inputs[0].shape
    pad = (ksize // 2) * dil
    H, W = Hp - 2 * pad, Wp - 2 * pad
    cout = weights[0].shape[-1]
    cins = tuple(w.shape[1] for w in weights)
    ntaps = ksize * ksize
    Hb = H // th

    in_specs = [pl.BlockSpec((1, Hp, Wp, ci), lambda n, i: (n, 0, 0, 0)) for ci in cins]
    in_specs += [pl.BlockSpec(w.shape, lambda n, i: (0, 0, 0)) for w in weights]

    out_shapes = (
        jax.ShapeDtypeStruct((N, H, W, cout), jnp.float32),
        jax.ShapeDtypeStruct((N, Hb, 8, cout), jnp.float32),
    )
    out_specs = (
        pl.BlockSpec((1, th, W, cout), lambda n, i: (n, i, 0, 0)),
        pl.BlockSpec((1, 1, 8, cout), lambda n, i: (n, i, 0, 0)),
    )

    # VMEM budgeting (explicit, sized for v7x's 64 MiB physical VMEM).
    block_bytes = (
        2 * sum(Hp * Wp * ci * 2 for ci in cins)          # input blocks (bf16) x2
        + 2 * sum(ntaps * ci * cout * 2 for ci in cins)   # weight blocks x2
        + 2 * (th * W * cout * 4 + 8 * cout * 4)          # output + stats x2
        + 4 * th * W * cout * 4                           # accumulator / temps
    )
    vmem_limit = int(min(max(block_bytes + (8 << 20), 32 << 20), 64 << 20))

    flops = 2 * N * H * W * sum(ntaps * ci for ci in cins) * cout
    bytes_accessed = (
        sum(int(x.size) * x.dtype.itemsize for x in inputs)
        + sum(int(w.size) * w.dtype.itemsize for w in weights)
        + N * H * W * cout * 4 + N * Hb * 8 * cout * 4
    )

    kernel = functools.partial(_conv_stats_kernel, n_inputs=n_inputs, ksize=ksize,
                               dil=dil, th=th, W=W, cout=cout)
    raw, stats = pl.pallas_call(
        kernel,
        out_shape=out_shapes,
        grid=(N, Hb),
        in_specs=in_specs,
        out_specs=out_specs,
        compiler_params=pltpu.CompilerParams(
            dimension_semantics=("parallel", "parallel"),
            vmem_limit_bytes=vmem_limit,
        ),
        cost_estimate=pl.CostEstimate(flops=flops, transcendentals=0,
                                      bytes_accessed=bytes_accessed),
    )(*inputs, *weights)

    sum_c = jnp.sum(stats[:, :, 0, :], axis=(0, 1))
    ssq_c = jnp.sum(stats[:, :, 1, :], axis=(0, 1))
    return raw, sum_c, ssq_c


def _run_conv_module(inputs, weights, gamma_p, beta_p, ksize, dil, th, m_total):
    """ConvModule pass-1 + BN scale/shift from global batch statistics."""
    raw, sum_c, ssq_c = conv_pass1(inputs, weights, ksize, dil, th)
    mean = sum_c / m_total
    var = jnp.maximum(ssq_c / m_total - mean * mean, 0.0)   # biased variance
    inv = jax.lax.rsqrt(var + BN_EPS)
    scale = (gamma_p * inv).reshape(1, -1)
    shift = (beta_p - mean * gamma_p * inv).reshape(1, -1)
    return raw, scale, shift


def bn_relu_apply(raw, scale, shift, th):
    N, H, W, C = raw.shape
    Hb = H // th
    return pl.pallas_call(
        _bn_relu_kernel,
        out_shape=jax.ShapeDtypeStruct((N, H, W, C), jnp.bfloat16),
        grid=(N, Hb),
        in_specs=[
            pl.BlockSpec((1, th, W, C), lambda n, i: (n, i, 0, 0)),
            pl.BlockSpec((1, C), lambda n, i: (0, 0)),
            pl.BlockSpec((1, C), lambda n, i: (0, 0)),
        ],
        out_specs=pl.BlockSpec((1, th, W, C), lambda n, i: (n, i, 0, 0)),
        compiler_params=pltpu.CompilerParams(
            dimension_semantics=("parallel", "parallel")),
        cost_estimate=pl.CostEstimate(flops=2 * N * H * W * C, transcendentals=0,
                                      bytes_accessed=N * H * W * C * 6),
    )(raw, scale, shift)


def bn_relu_classifier(x, scale, shift, wc_p, bc_p, th, apply_act=True):
    N, H, W, C = x.shape
    Lp = wc_p.shape[-1]
    Hb = H // th
    return pl.pallas_call(
        functools.partial(_bn_relu_classifier_kernel, apply_act=apply_act),
        out_shape=jax.ShapeDtypeStruct((N, H, W, Lp), jnp.float32),
        grid=(N, Hb),
        in_specs=[
            pl.BlockSpec((1, th, W, C), lambda n, i: (n, i, 0, 0)),
            pl.BlockSpec((1, C), lambda n, i: (0, 0)),
            pl.BlockSpec((1, C), lambda n, i: (0, 0)),
            pl.BlockSpec((C, Lp), lambda n, i: (0, 0)),
            pl.BlockSpec((1, Lp), lambda n, i: (0, 0)),
        ],
        out_specs=pl.BlockSpec((1, th, W, Lp), lambda n, i: (n, i, 0, 0)),
        compiler_params=pltpu.CompilerParams(
            dimension_semantics=("parallel", "parallel")),
        cost_estimate=pl.CostEstimate(
            flops=2 * N * H * W * C * Lp, transcendentals=0,
            bytes_accessed=int(x.size) * x.dtype.itemsize
            + int(wc_p.size) * 2 + N * H * W * Lp * 4),
    )(x, scale, shift, wc_p, bc_p)


# ----------------------------------------------------------------------------
# Parameter construction (mirrors module __init__ / init_weights), pre-padded
# to lane-aligned channel counts and reshaped to per-tap weights.
# ----------------------------------------------------------------------------
def init_params(key, cfg, kernel_size=3):
    Cin = cfg["auxiliary_in_channels"]
    Ch = cfg["auxiliary_channels"]
    L = cfg["num_labels"]
    std = cfg["initializer_range"]
    num_convs = cfg["auxiliary_num_convs"]
    k = kernel_size
    ntaps = k * k

    Cin_p = _round_up(Cin, LANE)
    Ch_p = _round_up(Ch, LANE)
    L_p = _round_up(L, LANE)

    keys = jax.random.split(key, num_convs + 2)
    params = {"dims": dict(Cin=Cin, Ch=Ch, L=L, Cin_p=Cin_p, Ch_p=Ch_p, L_p=L_p)}

    def pack_conv_w(w):  # (k,k,ci,co) -> (ntaps, ci_p, co_p) bf16, zero padded
        ci, co = w.shape[2], w.shape[3]
        ci_p, co_p = _round_up(ci, LANE), _round_up(co, LANE)
        wp = jnp.zeros((ntaps, ci_p, co_p), jnp.float32)
        wp = wp.at[:, :ci, :co].set(w.reshape(ntaps, ci, co))
        return wp.astype(jnp.bfloat16)

    def bn_affine():
        gamma = jnp.zeros((Ch_p,), jnp.float32).at[:Ch].set(1.0)  # BN default affine
        beta = jnp.zeros((Ch_p,), jnp.float32)
        return gamma, beta

    convs = []
    c_in = Cin
    for i in range(num_convs):
        w = jax.random.normal(keys[i], (k, k, c_in, Ch), jnp.float32) * std
        g, b = bn_affine()
        convs.append((pack_conv_w(w), g, b))
        c_in = Ch
    params["convs"] = convs

    if cfg["auxiliary_concat_input"]:
        w = jax.random.normal(keys[-2], (k, k, Cin + Ch, Ch), jnp.float32) * std
        g, b = bn_affine()
        # split K so the concat never has to be materialized in HBM
        params["conv_cat"] = (pack_conv_w(w[:, :, :Cin, :]),
                              pack_conv_w(w[:, :, Cin:, :]), g, b)

    wc = jax.random.normal(keys[-1], (Ch, L), jnp.float32) * std
    wc_p = jnp.zeros((Ch_p, L_p), jnp.float32).at[:Ch, :L].set(wc).astype(jnp.bfloat16)
    bc_p = jnp.zeros((1, L_p), jnp.float32)          # init_weights zeroes conv bias
    params["classifier"] = (wc_p, bc_p)
    return params


# ----------------------------------------------------------------------------
# UperNetFCNHead.forward
# ----------------------------------------------------------------------------
def upernet_fcn_head_forward(encoder_hidden_states, params, cfg,
                             in_index=2, kernel_size=3, dilation=1):
    x_nchw = encoder_hidden_states[in_index]
    x = jnp.transpose(x_nchw, (0, 2, 3, 1))          # NCHW -> NHWC
    N, H, W, _ = x.shape
    M = N * H * W
    dims = params["dims"]
    Cin_p, Ch_p, L_p, L = dims["Cin_p"], dims["Ch_p"], dims["L_p"], dims["L"]

    num_convs = cfg["auxiliary_num_convs"]
    concat = cfg["auxiliary_concat_input"]
    k = kernel_size
    pad_main = (k // 2) * dilation

    x_p = _pad_channels(x, Cin_p).astype(jnp.bfloat16)
    th = _choose_row_tile(H, W, max(Ch_p, L_p, Cin_p))

    act = x_p                  # bf16 activation (lane-padded channels)
    pending = None             # (raw conv f32, scale, shift) awaiting BN+ReLU

    # self.convs (nn.Identity() when num_convs == 0)
    for idx in range(num_convs):
        w_t, g_p, b_p = params["convs"][idx]
        raw, scale, shift = _run_conv_module(
            [_spatial_pad(act, pad_main)], [w_t], g_p, b_p, k, dilation, th, M)
        if idx == num_convs - 1 and not concat:
            pending = (raw, scale, shift)            # fuse its BN+ReLU with classifier
        else:
            act = bn_relu_apply(raw, scale, shift, th)

    # self.conv_cat(cat([hidden, out], dim=C)) — concat avoided via split-K
    if concat:
        # TODO(synk): num_convs == 0 with concat_input needs Cin == channels (as in torch)
        w1_t, w2_t, g_p, b_p = params["conv_cat"]
        pad_cat = k // 2
        raw, scale, shift = _run_conv_module(
            [_spatial_pad(x_p, pad_cat), _spatial_pad(act, pad_cat)],
            [w1_t, w2_t], g_p, b_p, k, 1, th, M)
        pending = (raw, scale, shift)

    # classifier (1x1 conv with bias), fused with the last BN+ReLU when present
    wc_p, bc_p = params["classifier"]
    if pending is not None:
        out_p = bn_relu_classifier(pending[0], pending[1], pending[2],
                                   wc_p, bc_p, th, apply_act=True)
    else:
        ones = jnp.ones((1, act.shape[-1]), jnp.float32)
        zeros = jnp.zeros((1, act.shape[-1]), jnp.float32)
        out_p = bn_relu_classifier(act, ones, zeros, wc_p, bc_p, th, apply_act=False)

    out = out_p[..., :L]                             # drop lane padding of num_labels
    return jnp.transpose(out, (0, 3, 1, 2))          # NHWC -> NCHW


# ----------------------------------------------------------------------------
if __name__ == "__main__":
    cfg = dict(
        auxiliary_in_channels=4,
        auxiliary_channels=8,
        auxiliary_num_convs=2,
        auxiliary_concat_input=True,
        num_labels=3,
        initializer_range=0.02,
    )
    N, H, W = 2, 16, 16
    in_index = 2

    key = jax.random.PRNGKey(0)
    k_feat, k_params = jax.random.split(key)

    # encoder_hidden_states: pyramid of feature maps (NCHW); only in_index=2 is consumed.
    encoder_hidden_states = [
        jax.random.normal(jax.random.fold_in(k_feat, i),
                          (N, cfg["auxiliary_in_channels"], H, W), jnp.float32)
        for i in range(4)
    ]

    params = init_params(k_params, cfg)
    out = upernet_fcn_head_forward(encoder_hidden_states, params, cfg, in_index=in_index)
    out = jax.block_until_ready(out)

    assert out.shape == (N, cfg["num_labels"], H, W), out.shape
    assert bool(jnp.all(jnp.isfinite(out)))
    print("KERNEL_OK")
</pallas_src>

<mosaic_0001>
module attributes {stable_mosaic.version = 11 : i64} {
  func.func @_conv_stats_kernel(%arg0: i32, %arg1: i32, %arg2: memref<1x18x18x128xbf16, #tpu.memory_space<vmem>>, %arg3: memref<9x128x128xbf16, #tpu.memory_space<vmem>>, %arg4: memref<1x16x16x128xf32, #tpu.memory_space<vmem>>, %arg5: memref<1x1x8x128xf32, #tpu.memory_space<vmem>>) attributes {dimension_semantics = [#tpu.dimension_semantics<parallel>, #tpu.dimension_semantics<parallel>], iteration_bounds = array<i64: 2, 1>, scalar_prefetch = 0 : i64, scratch_operands = 0 : i64, tpu.core_type = #tpu.core_type<tc>, window_params = [{transform_indices = @transform_0, window_bounds = array<i64: 1, 18, 18, 128>}, {pipeline_mode = #tpu.pipeline_mode<synchronous>, transform_indices = @transform_1, window_bounds = array<i64: 9, 128, 128>}, {transform_indices = @transform_2, window_bounds = array<i64: 1, 16, 16, 128>}, {transform_indices = @transform_3, window_bounds = array<i64: 1, 1, 8, 128>}]} {
    %c16_i32 = arith.constant 16 : i32
    %0 = arith.muli %arg1, %c16_i32 : i32
    %cst = arith.constant 0.000000e+00 : f32
    %1 = vector.broadcast %cst : f32 to vector<256x128xf32>
    %c0_i32 = arith.constant 0 : i32
    %2 = arith.addi %0, %c0_i32 : i32
    %c0 = arith.constant 0 : index
    %3 = arith.index_cast %2 : i32 to index
    %c0_0 = arith.constant 0 : index
    %c0_1 = arith.constant 0 : index
    %4 = vector.load %arg2[%c0, %3, %c0_0, %c0_1] : memref<1x18x18x128xbf16, #tpu.memory_space<vmem>>, vector<1x16x16x128xbf16>
    %5 = vector.shape_cast %4 : vector<1x16x16x128xbf16> to vector<16x16x128xbf16>
    %6 = vector.shape_cast %5 : vector<16x16x128xbf16> to vector<256x128xbf16>
    %c0_2 = arith.constant 0 : index
    %c0_3 = arith.constant 0 : index
    %c0_4 = arith.constant 0 : index
    %7 = vector.load %arg3[%c0_2, %c0_3, %c0_4] : memref<9x128x128xbf16, #tpu.memory_space<vmem>>, vector<1x128x128xbf16>
    %8 = vector.shape_cast %7 : vector<1x128x128xbf16> to vector<128x128xbf16>
    %cst_5 = arith.constant dense<0.000000e+00> : vector<256x128xf32>
    %9 = tpu.matmul %6, %8, %cst_5 {dimension_numbers = #tpu.dot_dimension_numbers<[1], [0], [0], [1], [0, 0, 1, 1], [], []>} : vector<256x128xbf16>, vector<128x128xbf16>, vector<256x128xf32> -> vector<256x128xf32>
    %10 = arith.addf %1, %9 : vector<256x128xf32>
    %c0_i32_6 = arith.constant 0 : i32
    %11 = arith.addi %0, %c0_i32_6 : i32
    %c0_7 = arith.constant 0 : index
    %12 = arith.index_cast %11 : i32 to index
    %c1 = arith.constant 1 : index
    %c0_8 = arith.constant 0 : index
    %13 = vector.load %arg2[%c0_7, %12, %c1, %c0_8] : memref<1x18x18x128xbf16, #tpu.memory_space<vmem>>, vector<1x16x16x128xbf16>
    %14 = vector.shape_cast %13 : vector<1x16x16x128xbf16> to vector<16x16x128xbf16>
    %15 = vector.shape_cast %14 : vector<16x16x128xbf16> to vector<256x128xbf16>
    %c1_9 = arith.constant 1 : index
    %c0_10 = arith.constant 0 : index
    %c0_11 = arith.constant 0 : index
    %16 = vector.load %arg3[%c1_9, %c0_10, %c0_11] : memref<9x128x128xbf16, #tpu.memory_space<vmem>>, vector<1x128x128xbf16>
    %17 = vector.shape_cast %16 : vector<1x128x128xbf16> to vector<128x128xbf16>
    %cst_12 = arith.constant dense<0.000000e+00> : vector<256x128xf32>
    %18 = tpu.matmul %15, %17, %cst_12 {dimension_numbers = #tpu.dot_dimension_numbers<[1], [0], [0], [1], [0, 0, 1, 1], [], []>} : vector<256x128xbf16>, vector<128x128xbf16>, vector<256x128xf32> -> vector<256x128xf32>
    %19 = arith.addf %10, %18 : vector<256x128xf32>
    %c0_i32_13 = arith.constant 0 : i32
    %20 = arith.addi %0, %c0_i32_13 : i32
    %c0_14 = arith.constant 0 : index
    %21 = arith.index_cast %20 : i32 to index
    %c2 = arith.constant 2 : index
    %c0_15 = arith.constant 0 : index
    %22 = vector.load %arg2[%c0_14, %21, %c2, %c0_15] : memref<1x18x18x128xbf16, #tpu.memory_space<vmem>>, vector<1x16x16x128xbf16>
    %23 = vector.shape_cast %22 : vector<1x16x16x128xbf16> to vector<16x16x128xbf16>
    %24 = vector.shape_cast %23 : vector<16x16x128xbf16> to vector<256x128xbf16>
    %c2_16 = arith.constant 2 : index
    %c0_17 = arith.constant 0 : index
    %c0_18 = arith.constant 0 : index
    %25 = vector.load %arg3[%c2_16, %c0_17, %c0_18] : memref<9x128x128xbf16, #tpu.memory_space<vmem>>, vector<1x128x128xbf16>
    %26 = vector.shape_cast %25 : vector<1x128x128xbf16> to vector<128x128xbf16>
    %cst_19 = arith.constant dense<0.000000e+00> : vector<256x128xf32>
    %27 = tpu.matmul %24, %26, %cst_19 {dimension_numbers = #tpu.dot_dimension_numbers<[1], [0], [0], [1], [0, 0, 1, 1], [], []>} : vector<256x128xbf16>, vector<128x128xbf16>, vector<256x128xf32> -> vector<256x128xf32>
    %28 = arith.addf %19, %27 : vector<256x128xf32>
    %c1_i32 = arith.constant 1 : i32
    %29 = arith.addi %0, %c1_i32 : i32
    %c0_20 = arith.constant 0 : index
    %30 = arith.index_cast %29 : i32 to index
    %c0_21 = arith.constant 0 : index
    %c0_22 = arith.constant 0 : index
    %31 = vector.load %arg2[%c0_20, %30, %c0_21, %c0_22] : memref<1x18x18x128xbf16, #tpu.memory_space<vmem>>, vector<1x16x16x128xbf16>
    %32 = vector.shape_cast %31 : vector<1x16x16x128xbf16> to vector<16x16x128xbf16>
    %33 = vector.shape_cast %32 : vector<16x16x128xbf16> to vector<256x128xbf16>
    %c3 = arith.constant 3 : index
    %c0_23 = arith.constant 0 : index
    %c0_24 = arith.constant 0 : index
    %34 = vector.load %arg3[%c3, %c0_23, %c0_24] : memref<9x128x128xbf16, #tpu.memory_space<vmem>>, vector<1x128x128xbf16>
    %35 = vector.shape_cast %34 : vector<1x128x128xbf16> to vector<128x128xbf16>
    %cst_25 = arith.constant dense<0.000000e+00> : vector<256x128xf32>
    %36 = tpu.matmul %33, %35, %cst_25 {dimension_numbers = #tpu.dot_dimension_numbers<[1], [0], [0], [1], [0, 0, 1, 1], [], []>} : vector<256x128xbf16>, vector<128x128xbf16>, vector<256x128xf32> -> vector<256x128xf32>
    %37 = arith.addf %28, %36 : vector<256x128xf32>
    %c1_i32_26 = arith.constant 1 : i32
    %38 = arith.addi %0, %c1_i32_26 : i32
    %c0_27 = arith.constant 0 : index
    %39 = arith.index_cast %38 : i32 to index
    %c1_28 = arith.constant 1 : index
    %c0_29 = arith.constant 0 : index
    %40 = vector.load %arg2[%c0_27, %39, %c1_28, %c0_29] : memref<1x18x18x128xbf16, #tpu.memory_space<vmem>>, vector<1x16x16x128xbf16>
    %41 = vector.shape_cast %40 : vector<1x16x16x128xbf16> to vector<16x16x128xbf16>
    %42 = vector.shape_cast %41 : vector<16x16x128xbf16> to vector<256x128xbf16>
    %c4 = arith.constant 4 : index
    %c0_30 = arith.constant 0 : index
    %c0_31 = arith.constant 0 : index
    %43 = vector.load %arg3[%c4, %c0_30, %c0_31] : memref<9x128x128xbf16, #tpu.memory_space<vmem>>, vector<1x128x128xbf16>
    %44 = vector.shape_cast %43 : vector<1x128x128xbf16> to vector<128x128xbf16>
    %cst_32 = arith.constant dense<0.000000e+00> : vector<256x128xf32>
    %45 = tpu.matmul %42, %44, %cst_32 {dimension_numbers = #tpu.dot_dimension_numbers<[1], [0], [0], [1], [0, 0, 1, 1], [], []>} : vector<256x128xbf16>, vector<128x128xbf16>, vector<256x128xf32> -> vector<256x128xf32>
    %46 = arith.addf %37, %45 : vector<256x128xf32>
    %c1_i32_33 = arith.constant 1 : i32
    %47 = arith.addi %0, %c1_i32_33 : i32
    %c0_34 = arith.constant 0 : index
    %48 = arith.index_cast %47 : i32 to index
    %c2_35 = arith.constant 2 : index
    %c0_36 = arith.constant 0 : index
    %49 = vector.load %arg2[%c0_34, %48, %c2_35, %c0_36] : memref<1x18x18x128xbf16, #tpu.memory_space<vmem>>, vector<1x16x16x128xbf16>
    %50 = vector.shape_cast %49 : vector<1x16x16x128xbf16> to vector<16x16x128xbf16>
    %51 = vector.shape_cast %50 : vector<16x16x128xbf16> to vector<256x128xbf16>
    %c5 = arith.constant 5 : index
    %c0_37 = arith.constant 0 : index
    %c0_38 = arith.constant 0 : index
    %52 = vector.load %arg3[%c5, %c0_37, %c0_38] : memref<9x128x128xbf16, #tpu.memory_space<vmem>>, vector<1x128x128xbf16>
    %53 = vector.shape_cast %52 : vector<1x128x128xbf16> to vector<128x128xbf16>
    %cst_39 = arith.constant dense<0.000000e+00> : vector<256x128xf32>
    %54 = tpu.matmul %51, %53, %cst_39 {dimension_numbers = #tpu.dot_dimension_numbers<[1], [0], [0], [1], [0, 0, 1, 1], [], []>} : vector<256x128xbf16>, vector<128x128xbf16>, vector<256x128xf32> -> vector<256x128xf32>
    %55 = arith.addf %46, %54 : vector<256x128xf32>
    %c2_i32 = arith.constant 2 : i32
    %56 = arith.addi %0, %c2_i32 : i32
    %c0_40 = arith.constant 0 : index
    %57 = arith.index_cast %56 : i32 to index
    %c0_41 = arith.constant 0 : index
    %c0_42 = arith.constant 0 : index
    %58 = vector.load %arg2[%c0_40, %57, %c0_41, %c0_42] : memref<1x18x18x128xbf16, #tpu.memory_space<vmem>>, vector<1x16x16x128xbf16>
    %59 = vector.shape_cast %58 : vector<1x16x16x128xbf16> to vector<16x16x128xbf16>
    %60 = vector.shape_cast %59 : vector<16x16x128xbf16> to vector<256x128xbf16>
    %c6 = arith.constant 6 : index
    %c0_43 = arith.constant 0 : index
    %c0_44 = arith.constant 0 : index
    %61 = vector.load %arg3[%c6, %c0_43, %c0_44] : memref<9x128x128xbf16, #tpu.memory_space<vmem>>, vector<1x128x128xbf16>
    %62 = vector.shape_cast %61 : vector<1x128x128xbf16> to vector<128x128xbf16>
    %cst_45 = arith.constant dense<0.000000e+00> : vector<256x128xf32>
    %63 = tpu.matmul %60, %62, %cst_45 {dimension_numbers = #tpu.dot_dimension_numbers<[1], [0], [0], [1], [0, 0, 1, 1], [], []>} : vector<256x128xbf16>, vector<128x128xbf16>, vector<256x128xf32> -> vector<256x128xf32>
    %64 = arith.addf %55, %63 : vector<256x128xf32>
    %c2_i32_46 = arith.constant 2 : i32
    %65 = arith.addi %0, %c2_i32_46 : i32
    %c0_47 = arith.constant 0 : index
    %66 = arith.index_cast %65 : i32 to index
    %c1_48 = arith.constant 1 : index
    %c0_49 = arith.constant 0 : index
    %67 = vector.load %arg2[%c0_47, %66, %c1_48, %c0_49] : memref<1x18x18x128xbf16, #tpu.memory_space<vmem>>, vector<1x16x16x128xbf16>
    %68 = vector.shape_cast %67 : vector<1x16x16x128xbf16> to vector<16x16x128xbf16>
    %69 = vector.shape_cast %68 : vector<16x16x128xbf16> to vector<256x128xbf16>
    %c7 = arith.constant 7 : index
    %c0_50 = arith.constant 0 : index
    %c0_51 = arith.constant 0 : index
    %70 = vector.load %arg3[%c7, %c0_50, %c0_51] : memref<9x128x128xbf16, #tpu.memory_space<vmem>>, vector<1x128x128xbf16>
    %71 = vector.shape_cast %70 : vector<1x128x128xbf16> to vector<128x128xbf16>
    %cst_52 = arith.constant dense<0.000000e+00> : vector<256x128xf32>
    %72 = tpu.matmul %69, %71, %cst_52 {dimension_numbers = #tpu.dot_dimension_numbers<[1], [0], [0], [1], [0, 0, 1, 1], [], []>} : vector<256x128xbf16>, vector<128x128xbf16>, vector<256x128xf32> -> vector<256x128xf32>
    %73 = arith.addf %64, %72 : vector<256x128xf32>
    %c2_i32_53 = arith.constant 2 : i32
    %74 = arith.addi %0, %c2_i32_53 : i32
    %c0_54 = arith.constant 0 : index
    %75 = arith.index_cast %74 : i32 to index
    %c2_55 = arith.constant 2 : index
    %c0_56 = arith.constant 0 : index
    %76 = vector.load %arg2[%c0_54, %75, %c2_55, %c0_56] : memref<1x18x18x128xbf16, #tpu.memory_space<vmem>>, vector<1x16x16x128xbf16>
    %77 = vector.shape_cast %76 : vector<1x16x16x128xbf16> to vector<16x16x128xbf16>
    %78 = vector.shape_cast %77 : vector<16x16x128xbf16> to vector<256x128xbf16>
    %c8 = arith.constant 8 : index
    %c0_57 = arith.constant 0 : index
    %c0_58 = arith.constant 0 : index
    %79 = vector.load %arg3[%c8, %c0_57, %c0_58] : memref<9x128x128xbf16, #tpu.memory_space<vmem>>, vector<1x128x128xbf16>
    %80 = vector.shape_cast %79 : vector<1x128x128xbf16> to vector<128x128xbf16>
    %cst_59 = arith.constant dense<0.000000e+00> : vector<256x128xf32>
    %81 = tpu.matmul %78, %80, %cst_59 {dimension_numbers = #tpu.dot_dimension_numbers<[1], [0], [0], [1], [0, 0, 1, 1], [], []>} : vector<256x128xbf16>, vector<128x128xbf16>, vector<256x128xf32> -> vector<256x128xf32>
    %82 = arith.addf %73, %81 : vector<256x128xf32>
    %83 = vector.shape_cast %82 : vector<256x128xf32> to vector<1x16x16x128xf32>
    %c0_60 = arith.constant 0 : index
    %c0_61 = arith.constant 0 : index
    %c0_62 = arith.constant 0 : index
    %c0_63 = arith.constant 0 : index
    %84 = vector.load %arg4[%c0_60, %c0_61, %c0_62, %c0_63] : memref<1x16x16x128xf32, #tpu.memory_space<vmem>>, vector<1x16x16x128xf32>
    tpu.vector_store %arg4[%c0_60, %c0_61, %c0_62, %c0_63], %83 {strides = array<i32>} : memref<1x16x16x128xf32, #tpu.memory_space<vmem>>, vector<1x16x16x128xf32>,
    %cst_64 = arith.constant dense<0.000000e+00> : vector<128xf32>
    %85 = vector.multi_reduction <add>, %82, %cst_64 [0] : vector<256x128xf32> to vector<128xf32>
    %86 = vector.shape_cast %85 : vector<128xf32> to vector<1x128xf32>
    %87 = arith.mulf %82, %82 : vector<256x128xf32>
    %cst_65 = arith.constant dense<0.000000e+00> : vector<128xf32>
    %88 = vector.multi_reduction <add>, %87, %cst_65 [0] : vector<256x128xf32> to vector<128xf32>
    %89 = vector.shape_cast %88 : vector<128xf32> to vector<1x128xf32>
    %90 = tpu.iota {dimensions = array<i32: 0>} : vector<8x128xi32>
    %c0_i32_66 = arith.constant 0 : i32
    %91 = vector.broadcast %c0_i32_66 : i32 to vector<8x128xi32>
    %92 = arith.cmpi eq, %90, %91 : vector<8x128xi32>
    %c1_i32_67 = arith.constant 1 : i32
    %93 = vector.broadcast %c1_i32_67 : i32 to vector<8x128xi32>
    %94 = arith.cmpi eq, %90, %93 : vector<8x128xi32>
    %cst_68 = arith.constant 0.000000e+00 : f32
    %95 = vector.shape_cast %89 : vector<1x128xf32> to vector<1x128xf32>
    %96 = vector.broadcast %95 : vector<1x128xf32> to vector<8x128xf32>
    %97 = vector.broadcast %cst_68 : f32 to vector<8x128xf32>
    %98 = arith.select %94, %96, %97 : vector<8x128xi1>, vector<8x128xf32>
    %99 = vector.shape_cast %86 : vector<1x128xf32> to vector<1x128xf32>
    %100 = vector.broadcast %99 : vector<1x128xf32> to vector<8x128xf32>
    %101 = arith.select %92, %100, %98 : vector<8x128xi1>, vector<8x128xf32>
    %102 = vector.shape_cast %101 : vector<8x128xf32> to vector<1x1x8x128xf32>
    %c0_69 = arith.constant 0 : index
    %c0_70 = arith.constant 0 : index
    %c0_71 = arith.constant 0 : index
    %c0_72 = arith.constant 0 : index
    %103 = vector.load %arg5[%c0_69, %c0_70, %c0_71, %c0_72] : memref<1x1x8x128xf32, #tpu.memory_space<vmem>>, vector<1x1x8x128xf32>
    tpu.vector_store %arg5[%c0_69, %c0_70, %c0_71, %c0_72], %102 {strides = array<i32>} : memref<1x1x8x128xf32, #tpu.memory_space<vmem>>, vector<1x1x8x128xf32>,
    return
  }
  func.func @transform_0(%arg0: i32, %arg1: i32) -> (i32, i32, i32, i32) {
    %c0_i32 = arith.constant 0 : i32
    %c0_i32_0 = arith.constant 0 : i32
    %c0_i32_1 = arith.constant 0 : i32
    %c0_i32_2 = arith.constant 0 : i32
    return %arg0, %c0_i32, %c0_i32_0, %c0_i32_1 : i32, i32, i32, i32
  }
  func.func @transform_1(%arg0: i32, %arg1: i32) -> (i32, i32, i32) {
    %c0_i32 = arith.constant 0 : i32
    %c0_i32_0 = arith.constant 0 : i32
    %c0_i32_1 = arith.constant 0 : i32
    %c0_i32_2 = arith.constant 0 : i32
    return %c0_i32, %c0_i32_0, %c0_i32_1 : i32, i32, i32
  }
  func.func @transform_2(%arg0: i32, %arg1: i32) -> (i32, i32, i32, i32) {
    %c0_i32 = arith.constant 0 : i32
    %c0_i32_0 = arith.constant 0 : i32
    %c0_i32_1 = arith.constant 0 : i32
    return %arg0, %arg1, %c0_i32, %c0_i32_0 : i32, i32, i32, i32
  }
  func.func @transform_3(%arg0: i32, %arg1: i32) -> (i32, i32, i32, i32) {
    %c0_i32 = arith.constant 0 : i32
    %c0_i32_0 = arith.constant 0 : i32
    %c0_i32_1 = arith.constant 0 : i32
    return %arg0, %arg1, %c0_i32, %c0_i32_0 : i32, i32, i32, i32
  }
}

</mosaic_0001>

<bundles_post_ra>
// kernel: tpu_custom_call.1
= control target key start
LH: loop header
LB: loop body
LE: loop exit
PB: predicated region body
PF: predicated region fallthrough
CT: control target
= control target key end

     0   :  { %9 = vsyncpa [#allocation3], 0  ;;  %s9180_s0 = inlined_call_operand.vmem [shape: bf16[2,18,18,128], index: 0, kind: input, shape index: {}]   ;;  %s9181_s1 = inlined_call_operand.vmem [shape: bf16[9,128,128], index: 1, kind: input, shape index: {}]   ;;  %s9182_s2 = inlined_call_operand.hbm [shape: f32[2,16,16,128], index: 2, kind: output, shape index: {0}]   ;;  %s9183_s3 = inlined_call_operand.hbm [shape: f32[2,1,8,128], index: 3, kind: output, shape index: {1}]  }
   0x1   :  { %11 = vsyncpa [#allocation3 + $0x1], 0 }
   0x2   :  { %12 = vsyncpa [#allocation5], 0 }
   0x3   :  { %14 = vsyncpa [#allocation5 + $0x1], 0  ;;  %s7223_s12 = smov 0   ;;  %s7225_s13 = smov 0  }
   0x4   :  { %s7227_s14 = smov 0   ;;  %s7229_s15 = smov 0  }
   0x5   :  { %s7231_s16 = smov 0   ;;  %s7233_s17 = smov 0  }
   0x6 LB: > { %s5314_s18 = sadd.s32 4294967295, %s7197_s17   ;;  %s5315_s19 = sadd.s32 4294967294, %s7197_s17   ;;  %s7197_s17 = sphi %s7233_s17, %s20_s17   ;;  %s7193_s16 = sphi %s7231_s16, %s9256_s16   ;;  %s7189_s15 = sphi %s7229_s15, %s9255_s15   ;;  %s7185_s14 = sphi %s7227_s14, %s9254_s14   ;;  %s7181_s13 = sphi %s7225_s13, %s9253_s13   ;;  %s7177_s12 = sphi %s7223_s12, %s9252_s12  }
   0x7   : > { %s32_s20 = sadd.s32 1, %s7193_s16  ;;  %s88_s21 = sadd.s32 1, %s7185_s14 }
   0x8   : > { %p34_p0 = scmp.ge.s32.totalorder %s32_s20, 2  ;;  %p98_p1 = scmp.ne.s32.totalorder %s7185_s14, %s7181_s13 }
   0x9   : > { %p99_p2 = scmp.eq.s32.totalorder %s5314_s18, 1  ;;  %p104_p3 = scmp.ne.s32.totalorder %s7181_s13, %s7177_s12 }
   0xa   : > { %s9258_s20 = smov (%p34_p0, %s32_s20), 0  ;;  %p105_p5 = scmp.eq.s32.totalorder %s5315_s19, 1 }
   0xb   : > { %p7263_p4 = por %p99_p2, %p98_p1  ;;  %s83_s23 = ssub.s32 %s7193_s16, %s9258_s20 }
   0xc   : > { %p5318_p6 = scmp.ge.s32.totalorder %s7197_s17, 1  ;;  %p86_p7 = scmp.eq.s32.totalorder %s83_s23, 0 }
   0xd   : > { %p7270_p8 = por %p105_p5, %p104_p3  ;;  %p162_p9 = scmp.lt.s32.totalorder %s7197_s17, 3 }
   0xe   : > { %s7276_s25 = scalar_select %p86_p7, %s7185_s14, %s88_s21  }
   0xf   : > { %p163_p10 = pnand %p5318_p6, %p162_p9 }
  0x11   : > { %166 = sbr.rel (%p163_p10) target bundleno = 641 (0x281), region = 28 }
  0x18   : > { %v6897_v0 = vld [vmem:[%s9181_s1 + $0x40] sm:$0xff]   ;;  %p191_p11 = scmp.lt.s32.totalorder %s7189_s15, 1  ;;  %v6899_v2 = vld [vmem:[%s9181_s1 + $0x48] sm:$0xff]   ;;  %v6901_v4 = vld [vmem:[%s9181_s1 + $0x50] sm:$0xff]   ;;  %vm266_vm0 = vsmask.f32 3328 }
  0x19   : > { %v6898_v1 = vld [vmem:[%s9181_s1 + $0x100] sm:$0xff]   ;;  %6130 = vmatprep.subr.bf16.mxu1 %v6897_v0  ;;  %v6900_v3 = vld [vmem:[%s9181_s1 + $0x108] sm:$0xff]   ;;  %v6902_v5 = vld [vmem:[%s9181_s1 + $0x110] sm:$0xff]   ;;  %vm267_vm1 = vsmask.f32 7440  ;;  %vm1296_vm3 = vcmask 1042432  }
  0x1a   : > { %6322 = vmatprep.subr.bf16.mxu0 %v6898_v1  ;;  %6131 = vmatpush3.bf16.msra.mxu1 %v6897_v0  ;;  %s192_s11 = scalar_select %p191_p11, %s7189_s15, 1  ;;  %v6903_v6 = vld [vmem:[%s9181_s1 + $0x58] sm:$0xff]   ;;  %v6905_v8 = vld [vmem:[%s9181_s1 + $0x60] sm:$0xff]   ;;  %v6907_v10 = vld [vmem:[%s9181_s1 + $0x68] sm:$0xff]   ;;  %vm1297_vm4 = vcmask 1046532  }
  0x1b   : > { %6323 = vmatpush3.bf16.msra.mxu0 %v6898_v1  ;;  %6132 = vmatprep.subr.bf16.mxu1 %v6899_v2  ;;  %v6904_v7 = vld [vmem:[%s9181_s1 + $0x118] sm:$0xff]   ;;  %v6906_v9 = vld [vmem:[%s9181_s1 + $0x120] sm:$0xff]   ;;  %v6908_v11 = vld [vmem:[%s9181_s1 + $0x128] sm:$0xff]   ;;  %s5913_s4 = sshll.u32 %s7189_s15, 12  ;;  %s7199_s18 = smov [#allocation2]  }
  0x1c   : > { %6324 = vmatprep.subr.bf16.mxu0 %v6900_v3  ;;  %s6834_s26 = smul.u32 216, %s192_s11  ;;  %v6909_v25 = vld [vmem:[%s9181_s1 + $0x70] sm:$0xff]   ;;  %v6911_v36 = vld [vmem:[%s9181_s1 + $0x78] sm:$0xff]   ;;  %vm7345_vm2 = vmor %vm266_vm0, %vm267_vm1  ;;  %s9096_s9 = scalar_lea.hbm %s9182_s2, %s5913_s4 }
  0x1d   : > { %v6910_v30 = vld [vmem:[%s9181_s1 + $0x130] sm:$0xff]   ;;  %v6912_v51 = vld [vmem:[%s9181_s1 + $0x138] sm:$0xff]   ;;  %vm7591_vm5 = vmor %vm1296_vm3, %vm1297_vm4  ;;  %s7091_s19 = sshll.u32 %s7199_s18, 4  ;;  %s7092_s19 = int_to_ptr.vmem [resolvable:$false] %s7091_s19 }
  0x1e   : > { %6133 = vmatpush3.bf16.msra.mxu1 %v6899_v2  ;;  %s7313_s6 = scalar_lea.vmem %s9180_s0, %s6834_s26  ;;  %s7093_s21 = scalar_lea.vmem %s7092_s19, 8192 }
  0x1f   : > { %6325 = vmatpush3.bf16.msra.mxu0 %v6900_v3  ;;  %6134 = vmatprep.subr.bf16.mxu1 %v6901_v4  ;;  %v202_v12 = vld [vmem:[%s7313_s6] sm:$0xf]  ;;  %v203_v13 = vld [vmem:[%s7313_s6 + $0x4] sm:$0xf]  ;;  %v250_v14 = vld [vmem:[%s7313_s6 + $0x8] sm:$0x1] }
  0x20   : > { %6326 = vmatprep.subr.bf16.mxu0 %v6902_v5  ;;  %v270_v15 = vshrl.u32 %v202_v12, 16  ;;  %v273_v16 = vshll.u32 %v202_v12, 16  ;;  %v279_v17 = vshll.u32 %v203_v13, 16  ;;  %v283_v18 = vshrl.u32 %v203_v13, 16  ;;  %v5514_v20 = vld [vmem:[%s7313_s6 + $0xc] sm:$0xf] }
  0x21   : > { %v289_v19 = vshll.u32 %v250_v14, 16  ;;  %v7326_v23 = vld [vmem:[%s7313_s6 + $0x10] sm:$0xf]  ;;  %v7329_v24 = vld [vmem:[%s7313_s6 + $0x14] sm:$0x1]  ;;  %v2172_v29 = vshrl.u32 %v5514_v20, 16 }
  0x22   : > { %6135 = vmatpush3.bf16.msra.mxu1 %v6901_v4  ;;  %v272_v21 = vrot.slane %v270_v15, 4  ;;  %v275_v22 = vrot.slane %v273_v16, 5  ;;  %v281_v26 = vrot.slane %v279_v17, 5  ;;  %v285_v27 = vrot.slane %v283_v18, 4  ;;  %v204_v35 = vld [vmem:[%s7313_s6 + $0xc] sm:$0xf] }
  0x23   : > { %6327 = vmatpush3.bf16.msra.mxu0 %v6902_v5  ;;  %6136 = vmatprep.subr.bf16.mxu1 %v6903_v6  ;;  %v291_v28 = vrot.slane %v289_v19, 5  ;;  %v2175_v32 = vshll.u32 %v5514_v20, 16  ;;  %v2181_v33 = vshll.u32 %v7326_v23, 16  ;;  %v2185_v34 = vshrl.u32 %v7326_v23, 16  ;;  %v205_v42 = vld [vmem:[%s7313_s6 + $0x10] sm:$0xf] }
  0x24   : > { %6328 = vmatprep.subr.bf16.mxu0 %v6904_v7  ;;  %v276_v31 = vor.u32 %v275_v22, %v272_v21  ;;  %v286_v38 = vor.u32 %v285_v27, %v281_v26  ;;  %v2174_v39 = vrot.slane %v2172_v29, 4  ;;  %v2191_v40 = vshll.u32 %v7329_v24, 16  ;;  %v251_v55 = vld [vmem:[%s7313_s6 + $0x14] sm:$0x1]  ;;  %v5517_v57 = vld [vmem:[%s7313_s6 + $0x18] sm:$0xf] }
  0x25   : > { %v2946_v41 = vrot.slane %v7329_v24, 5  ;;  %v2177_v44 = vrot.slane %v2175_v32, 5  ;;  %v2183_v45 = vrot.slane %v2181_v33, 5  ;;  %v2187_v46 = vrot.slane %v2185_v34, 4  ;;  %v7362_v62 = vld [vmem:[%s7313_s6 + $0x1c] sm:$0xf] }
  0x26   : > { %6137 = vmatpush3.bf16.msra.mxu1 %v6903_v6  ;;  %v277_v43 = vrot.slane %v276_v31, 4  ;;  %v287_v47 = vrot.slane %v286_v38, 4  ;;  %v2193_v48 = vrot.slane %v2191_v40, 5  ;;  %v294_v49 = vshrl.u32 %v204_v35, 16  ;;  %v6913_v3 = vld [vmem:[%s9181_s1] sm:$0xff]  }
  0x27   : > { %6329 = vmatpush3.bf16.msra.mxu0 %v6904_v7  ;;  %6138 = vmatprep.subr.bf16.mxu1 %v6905_v8  ;;  %v297_v50 = vshll.u32 %v204_v35, 16  ;;  %v2178_v53 = vor.u32 %v2177_v44, %v2174_v39  ;;  %v2188_v54 = vor.u32 %v2187_v46, %v2183_v45  ;;  %v303_v56 = vshll.u32 %v205_v42, 16  ;;  %v7370_v4 = vld [vmem:[%s9181_s1 + $0x140] sm:$0xff]   ;;  %v206_v21 = vld [vmem:[%s7313_s6 + $0x18] sm:$0xf]  ;;  %v6916_v46 = vld [vmem:[%s9181_s1 + $0x8] sm:$0xff]  }
  0x28   : > { %6330 = vmatprep.subr.bf16.mxu0 %v6906_v9  ;;  %v282_v52 = vsel %vm7345_vm2, %v277_v43, %v281_v26  ;;  %v292_v58 = vsel %vm7345_vm2, %v287_v47, %v291_v28  ;;  %v296_v59 = vrot.slane %v294_v49, 4  ;;  %v307_v61 = vshrl.u32 %v205_v42, 16  ;;  %v207_v28 = vld [vmem:[%s7313_s6 + $0x1c] sm:$0xf]  ;;  %v252_v33 = vld [vmem:[%s7313_s6 + $0x20] sm:$0x1] }
  0x29   : > { %v299_v60 = vrot.slane %v297_v50, 5  ;;  %v5338_v63 = vcombine.low %v282_v52, %v292_v58  ;;  %v2179_v0 = vrot.slane %v2178_v53, 4  ;;  %v2189_v1 = vrot.slane %v2188_v54, 4  ;;  %v5520_v39 = vld [vmem:[%s7313_s6 + $0x24] sm:$0xf] }
  0x2a   : > { %6139 = vmatpush3.bf16.msra.mxu1 %v6905_v8  ;;  %v305_v2 = vrot.slane %v303_v56, 5  ;;  %v309_v6 = vrot.slane %v307_v61, 4  ;;  %v313_v7 = vshll.u32 %v251_v55, 16  ;;  %v7373_v8 = vld [vmem:[%s7313_s6 + $0x20] sm:$0x1]  ;;  %v2199_v12 = vshll.u32 %v5517_v57, 16 }
  0x2b   : > { %6331 = vmatpush3.bf16.msra.mxu0 %v6906_v9  ;;  %6140 = vmatprep.subr.bf16.mxu1 %v6907_v10  ;;  %v300_v5 = vor.u32 %v299_v60, %v296_v59  ;;  %v2184_v9 = vsel %vm7345_vm2, %v2179_v0, %v2183_v45  ;;  %v2205_v19 = vshll.u32 %v7362_v62, 16  ;;  %v2209_v20 = vshrl.u32 %v7362_v62, 16  ;;  %v7398_v45 = vld [vmem:[%s7313_s6 + $0x28] sm:$0xf]  ;;  %v208_v52 = vld [vmem:[%s7313_s6 + $0x24] sm:$0xf] }
  0x2c   : > { %6332 = vmatprep.subr.bf16.mxu0 %v6908_v11  ;;  %6146 = vmatprep.mubr.bf16.mxu1 %v5338_v63  ;;  %v310_v15 = vor.u32 %v309_v6, %v305_v2  ;;  %v315_v16 = vrot.slane %v313_v7, 5  ;;  %v2201_v18 = vrot.slane %v2199_v12, 5  ;;  %v2215_v26 = vshll.u32 %v7373_v8, 16  ;;  %v6915_v63 = vld [vmem:[%s9181_s1 + $0x148] sm:$0xff]  }
  0x2d   : > { %v301_v14 = vrot.slane %v300_v5, 4  ;;  %v2950_v27 = vrot.slane %v7362_v62, 5  ;;  %v2211_v31 = vrot.slane %v2209_v20, 4  ;;  %v2953_v32 = vrot.slane %v7373_v8, 5  ;;  %v209_v5 = vld [vmem:[%s7313_s6 + $0x28] sm:$0xf] }
  0x2e   : > { %6141 = vmatpush3.bf16.msra.mxu1 %v6907_v10  ;;  %v2194_v10 = vsel %vm7345_vm2, %v2189_v1, %v2193_v48  ;;  %v2217_v35 = vrot.slane %v2215_v26, 5  ;;  %v318_v38 = vshrl.u32 %v206_v21, 16  ;;  %v321_v44 = vshll.u32 %v206_v21, 16 }
  0x2f   : > { %6333 = vmatpush3.bf16.msra.mxu0 %v6908_v11  ;;  %6142 = vmatprep.subr.bf16.mxu1 %v6909_v25  ;;  %v2196_v11 = vshrl.u32 %v5517_v57, 16  ;;  %v5578_v13 = vcombine.low %v2184_v9, %v2194_v10  ;;  %v306_v22 = vsel %vm7345_vm2, %v301_v14, %v305_v2  ;;  %v327_v48 = vshll.u32 %v207_v28, 16 }
  0x30   : > { %6334 = vmatprep.subr.bf16.mxu0 %v6910_v30  ;;  %v320_v47 = vrot.slane %v318_v38, 4  ;;  %v331_v49 = vshrl.u32 %v207_v28, 16  ;;  %v337_v50 = vshll.u32 %v252_v33, 16  ;;  %v323_v55 = vrot.slane %v321_v44, 5  ;;  %v7429_v33 = vld [vmem:[%s7313_s6 + $0x34] sm:$0xf] }
  0x31   : > { %v2198_v17 = vrot.slane %v2196_v11, 4  ;;  %6338 = vmatprep.mubr.bf16.mxu0 %v5578_v13  ;;  %v2220_v56 = vshrl.u32 %v5520_v39, 16  ;;  %v329_v57 = vrot.slane %v327_v48, 5  ;;  %v2223_v60 = vshll.u32 %v5520_v39, 16  ;;  %v253_v11 = vld [vmem:[%s7313_s6 + $0x2c] sm:$0x1] }
  0x32   : > { %6143 = vmatpush3.bf16.msra.mxu1 %v6909_v25  ;;  %v311_v25 = vrot.slane %v310_v15, 4  ;;  %v333_v58 = vrot.slane %v331_v49, 4  ;;  %v339_v59 = vrot.slane %v337_v50, 5  ;;  %v324_v0 = vor.u32 %v323_v55, %v320_v47  ;;  %v6918_v48 = vld [vmem:[%s9181_s1 + $0x158] sm:$0xff]  }
  0x33   : > { %6335 = vmatpush3.bf16.msra.mxu0 %v6910_v30  ;;  %6144 = vmatprep.subr.bf16.mxu1 %v6911_v36  ;;  %v2202_v29 = vor.u32 %v2201_v18, %v2198_v17  ;;  %v2207_v30 = vrot.slane %v2205_v19, 5  ;;  %v2222_v1 = vrot.slane %v2220_v56, 4  ;;  %v2229_v2 = vshll.u32 %v7398_v45, 16 }
  0x34   : > { %6336 = vmatprep.subr.bf16.mxu0 %v6912_v51  ;;  %v316_v34 = vsel %vm7345_vm2, %v311_v25, %v315_v16  ;;  %v334_v7 = vor.u32 %v333_v58, %v329_v57  ;;  %v2225_v9 = vrot.slane %v2223_v60, 5  ;;  %v2233_v10 = vshrl.u32 %v7398_v45, 16  ;;  %v5523_v16 = vld [vmem:[%s7313_s6 + $0x30] sm:$0xf]  ;;  %v6925_v60 = vld [vmem:[%s9181_s1 + $0x20] sm:$0xff]  }
  0x35   : > { %v5339_v40 = vcombine.low %v306_v22, %v316_v34  ;;  %v2203_v42 = vrot.slane %v2202_v29, 4  ;;  %v2212_v43 = vor.u32 %v2211_v31, %v2207_v30  ;;  %v325_v12 = vrot.slane %v324_v0, 4  ;;  %v6922_v34 = vld [vmem:[%s9181_s1 + $0x18] sm:$0xff]  }
  0x36   : > { %6145 = vmatpush3.bf16.msra.mxu1 %v6911_v36  ;;  %v7394_v36 = vrot.slane %v2950_v27, 4  ;;  %v2231_v13 = vrot.slane %v2229_v2, 5  ;;  %v342_v15 = vshrl.u32 %v208_v52, 16  ;;  %v335_v17 = vrot.slane %v334_v7, 4  ;;  %v254_v2 = vld [vmem:[%s7313_s6 + $0x38] sm:$0x1] }
  0x37   : > { %6337 = vmatpush3.bf16.msra.mxu0 %v6912_v51  ;;  %6178 = vmatprep.subr.bf16.mxu1 %v6913_v3  ;;  %v7404_v51 = vld [vmem:[%s7313_s6 + $0x2c] sm:$0x1]  ;;  %v2208_v53 = vsel %vm7345_vm2, %v2203_v42, %v2207_v30  ;;  %v2213_v54 = vrot.slane %v2212_v43, 4  ;;  %v2226_v18 = vor.u32 %v2225_v9, %v2222_v1  ;;  %v2235_v19 = vrot.slane %v2233_v10, 4  ;;  %v5526_v9 = vld [vmem:[%s7313_s6 + $0x3c] sm:$0xf] }
  0x38   : > { %6370 = vmatprep.subr.bf16.mxu0 %v7370_v4  ;;  %v2239_v14 = vshll.u32 %v7404_v51, 16  ;;  %v345_v20 = vshll.u32 %v208_v52, 16  ;;  %v330_v21 = vsel %vm7345_vm2, %v325_v12, %v329_v57  ;;  %v344_v25 = vrot.slane %v342_v15, 4 }
  0x39   : > { %6147 = vmatmul.mubr.bf16.vlgmr.msra.gmra.mrb[0].mxu1 %v5339_v40  ;;  %v2218_v61 = vsel %vm7345_vm2, %v2213_v54, %v2217_v35  ;;  %v351_v26 = vshll.u32 %v209_v5, 16  ;;  %v340_v28 = vsel %vm7345_vm2, %v335_v17, %v339_v59  ;;  %v2227_v29 = vrot.slane %v2226_v18, 4  ;;  %v210_v54 = vld [vmem:[%s7313_s6 + $0x30] sm:$0xf]  ;;  %v211_v59 = vld [vmem:[%s7313_s6 + $0x34] sm:$0xf] }
  0x3a   : > { %6179 = vmatpush3.bf16.msra.mxu1 %v6913_v3  ;;  %v6919_v3 = vld [vmem:[%s9181_s1 + $0x10] sm:$0xff]   ;;  %v5579_v6 = vcombine.low %v2208_v53, %v2218_v61  ;;  %v2241_v22 = vrot.slane %v2239_v14, 5  ;;  %v2236_v30 = vor.u32 %v2235_v19, %v2231_v13  ;;  %v347_v31 = vrot.slane %v345_v20, 5  ;;  %v6927_v14 = vld [vmem:[%s9181_s1 + $0x28] sm:$0xff]   ;;  %v7463_v19 = vld [vmem:[%s7313_s6 + $0x40] sm:$0xf] }
  0x3b   : > { %6180 = vmatprep.subr.bf16.mxu1 %v6916_v46  ;;  %v5340_v35 = vcombine.low %v330_v21, %v340_v28  ;;  %v353_v38 = vrot.slane %v351_v26, 5  ;;  %v355_v39 = vshrl.u32 %v209_v5, 16  ;;  %v361_v40 = vshll.u32 %v253_v11, 16  ;;  %v6920_v20 = vld [vmem:[%s9181_s1 + $0x160] sm:$0xff]  }
  0x3c   : > { %6339 = vmatmul.mubr.bf16.vlgmr.msra.gmra.mrb[0].mxu0 %v5579_v6  ;;  %v2232_v42 = vsel %vm7345_vm2, %v2227_v29, %v2231_v13  ;;  %v2237_v43 = vrot.slane %v2236_v30, 4  ;;  %v348_v44 = vor.u32 %v347_v31, %v344_v25  ;;  %v2244_v47 = vshrl.u32 %v5523_v16, 16  ;;  %v7471_v28 = vld [vmem:[%s7313_s6 + $0x44] sm:$0x1] }
  0x3d   : > { %6371 = vmatpush3.bf16.msra.mxu0 %v7370_v4  ;;  %v6917_v4 = vld [vmem:[%s9181_s1 + $0x150] sm:$0xff]   ;;  %6150 = vmatprep.mubr.bf16.mxu1 %v5340_v35  ;;  %v357_v49 = vrot.slane %v355_v39, 4  ;;  %v363_v50 = vrot.slane %v361_v40, 5  ;;  %v2247_v52 = vshll.u32 %v5523_v16, 16  ;;  %v2253_v53 = vshll.u32 %v7429_v33, 16 }
  0x3e   : > { %6181 = vmatpush3.bf16.msra.mxu1 %v6916_v46  ;;  %6372 = vmatprep.subr.bf16.mxu0 %v6915_v63  ;;  %v7440_v46 = vld [vmem:[%s7313_s6 + $0x38] sm:$0x1]  ;;  %v2242_v55 = vsel %vm7345_vm2, %v2237_v43, %v2241_v22  ;;  %v349_v56 = vrot.slane %v348_v44, 4  ;;  %v2246_v57 = vrot.slane %v2244_v47, 4  ;;  %v2257_v58 = vshrl.u32 %v7429_v33, 16  ;;  %v6929_v35 = vld [vmem:[%s9181_s1 + $0x30] sm:$0xff]  }
  0x3f   : > { %6182 = vmatprep.subr.bf16.mxu1 %v6919_v3  ;;  %v5580_v61 = vcombine.low %v2232_v42, %v2242_v55  ;;  %v2249_v0 = vrot.slane %v2247_v52, 5  ;;  %v2255_v1 = vrot.slane %v2253_v53, 5  ;;  %v2263_v6 = vshll.u32 %v7440_v46, 16  ;;  %v213_v55 = vld [vmem:[%s7313_s6 + $0x40] sm:$0xf] }
  0x40   : > { %v354_v5 = vsel %vm7345_vm2, %v349_v56, %v353_v38  ;;  %v366_v7 = vshrl.u32 %v210_v54, 16  ;;  %v369_v12 = vshll.u32 %v210_v54, 16  ;;  %v375_v13 = vshll.u32 %v211_v59, 16 }
  0x41   : > { %6373 = vmatpush3.bf16.msra.mxu0 %v6915_v63  ;;  %v358_v63 = vor.u32 %v357_v49, %v353_v38  ;;  %6342 = vmatprep.mubr.bf16.mxu0 %v5580_v61  ;;  %v2250_v11 = vor.u32 %v2249_v0, %v2246_v57  ;;  %v2265_v16 = vrot.slane %v2263_v6, 5  ;;  %v379_v18 = vshrl.u32 %v211_v59, 16 }
  0x42   : > { %6183 = vmatpush3.bf16.msra.mxu1 %v6919_v3  ;;  %6374 = vmatprep.subr.bf16.mxu0 %v6917_v4  ;;  %v2259_v3 = vrot.slane %v2257_v58, 4  ;;  %v368_v17 = vrot.slane %v366_v7, 4  ;;  %v371_v25 = vrot.slane %v369_v12, 5  ;;  %v377_v26 = vrot.slane %v375_v13, 5 }
  0x43   : > { %6184 = vmatprep.subr.bf16.mxu1 %v6922_v34  ;;  %v359_v10 = vrot.slane %v358_v63, 4  ;;  %v2251_v22 = vrot.slane %v2250_v11, 4  ;;  %v381_v31 = vrot.slane %v379_v18, 4  ;;  %v2268_v40 = vshrl.u32 %v5526_v9, 16  ;;  %v255_v63 = vld [vmem:[%s7313_s6 + $0x44] sm:$0x1] }
  0x44   : > { %v2260_v15 = vor.u32 %v2259_v3, %v2255_v1  ;;  %v372_v39 = vor.u32 %v371_v25, %v368_v17  ;;  %v2271_v42 = vshll.u32 %v5526_v9, 16  ;;  %v2277_v49 = vshll.u32 %v7463_v19, 16  ;;  %v5529_v9 = vld [vmem:[%s7313_s6 + $0x48] sm:$0xf] }
  0x45   : > { %6375 = vmatpush3.bf16.msra.mxu0 %v6917_v4  ;;  %v364_v21 = vsel %vm7345_vm2, %v359_v10, %v363_v50  ;;  %v385_v4 = vshll.u32 %v254_v2, 16  ;;  %v2256_v38 = vsel %vm7345_vm2, %v2251_v22, %v2255_v1  ;;  %v382_v44 = vor.u32 %v381_v31, %v377_v26  ;;  %v6931_v2 = vld [vmem:[%s9181_s1 + $0x38] sm:$0xff]   ;;  %v7504_v22 = vld [vmem:[%s7313_s6 + $0x50] sm:$0x1] }
  0x46   : > { %6185 = vmatpush3.bf16.msra.mxu1 %v6922_v34  ;;  %6376 = vmatprep.subr.bf16.mxu0 %v6918_v48  ;;  %v5341_v29 = vcombine.low %v354_v5, %v364_v21  ;;  %v2261_v30 = vrot.slane %v2260_v15, 4  ;;  %v212_v34 = vld [vmem:[%s7313_s6 + $0x3c] sm:$0xf]  ;;  %v373_v52 = vrot.slane %v372_v39, 4  ;;  %v2270_v53 = vrot.slane %v2268_v40, 4  ;;  %v6923_v15 = vld [vmem:[%s9181_s1 + $0x170] sm:$0xff]  }
  0x47   : > { %6186 = vmatprep.subr.bf16.mxu1 %v6925_v60  ;;  %v387_v47 = vrot.slane %v385_v4, 5  ;;  %v2273_v54 = vrot.slane %v2271_v42, 5  ;;  %v383_v56 = vrot.slane %v382_v44, 4  ;;  %v2279_v57 = vrot.slane %v2277_v49, 5  ;;  %v6924_v31 = vld [vmem:[%s9181_s1 + $0x178] sm:$0xff]   ;;  %v7515_v4 = vld [vmem:[%s9181_s1 + $0x80] sm:$0xff]  }
  0x48   : > { %6151 = vmatmul.mubr.bf16.gmra.mrb[4].mxu1 %v5341_v29  ;;  %v2266_v43 = vsel %vm7345_vm2, %v2261_v30, %v2265_v16  ;;  %v2281_v58 = vshrl.u32 %v7463_v19, 16  ;;  %v2287_v59 = vshll.u32 %v7471_v28, 16  ;;  %v390_v0 = vshrl.u32 %v212_v34, 16  ;;  %v214_v30 = vld [vmem:[%s7313_s6 + $0x48] sm:$0xf] }
  0x49   : > { %6377 = vmatpush3.bf16.msra.mxu0 %v6918_v48  ;;  %v5581_v50 = vcombine.low %v2256_v38, %v2266_v43  ;;  %v6921_v48 = vld [vmem:[%s9181_s1 + $0x168] sm:$0xff]   ;;  %v2274_v61 = vor.u32 %v2273_v54, %v2270_v53  ;;  %v393_v1 = vshll.u32 %v212_v34, 16  ;;  %v388_v5 = vsel %vm7345_vm2, %v383_v56, %v387_v47  ;;  %v256_v54 = vld [vmem:[%s7313_s6 + $0x50] sm:$0x1] }
  0x4a   : > { %6187 = vmatpush3.bf16.msra.mxu1 %v6925_v60  ;;  %6378 = vmatprep.subr.bf16.mxu0 %v6920_v20  ;;  %v378_v60 = vsel %vm7345_vm2, %v373_v52, %v377_v26  ;;  %v2283_v3 = vrot.slane %v2281_v58, 4  ;;  %v2289_v6 = vrot.slane %v2287_v59, 5  ;;  %v399_v7 = vshll.u32 %v213_v55, 16  ;;  %v215_v53 = vld [vmem:[%s7313_s6 + $0x4c] sm:$0xf] }
  0x4b   : > { %6188 = vmatprep.subr.bf16.mxu1 %v6927_v14  ;;  %6343 = vmatmul.mubr.bf16.gmra.mrb[4].mxu0 %v5581_v50  ;;  %v5342_v10 = vcombine.low %v378_v60, %v388_v5  ;;  %v2275_v11 = vrot.slane %v2274_v61, 4  ;;  %v392_v12 = vrot.slane %v390_v0, 4  ;;  %v395_v13 = vrot.slane %v393_v1, 5  ;;  %v5532_v58 = vld [vmem:[%s7313_s6 + $0x54] sm:$0xf] }
  0x4c   : > { %v2284_v16 = vor.u32 %v2283_v3, %v2279_v57  ;;  %v401_v17 = vrot.slane %v399_v7, 5  ;;  %v403_v18 = vshrl.u32 %v213_v55, 16  ;;  %v409_v21 = vshll.u32 %v255_v63, 16  ;;  %v7529_v0 = vld [vmem:[%s7313_s6 + $0x58] sm:$0xf] }
  0x4d   : > { %6379 = vmatpush3.bf16.msra.mxu0 %v6920_v20  ;;  %6154 = vmatprep.mubr.bf16.mxu1 %v5342_v10  ;;  %v2280_v20 = vsel %vm7345_vm2, %v2275_v11, %v2279_v57  ;;  %v396_v25 = vor.u32 %v395_v13, %v392_v12  ;;  %v2292_v26 = vshrl.u32 %v5529_v9, 16  ;;  %v2295_v29 = vshll.u32 %v5529_v9, 16 }
  0x4e   : > { %6189 = vmatpush3.bf16.msra.mxu1 %v6927_v14  ;;  %v7498_v14 = vld [vmem:[%s7313_s6 + $0x4c] sm:$0xf]  ;;  %6380 = vmatprep.subr.bf16.mxu0 %v6921_v48  ;;  %v2285_v34 = vrot.slane %v2284_v16, 4  ;;  %v411_v38 = vrot.slane %v409_v21, 5  ;;  %v2311_v52 = vshll.u32 %v7504_v22, 16  ;;  %v414_v61 = vshrl.u32 %v214_v30, 16 }
  0x4f   : > { %6190 = vmatprep.subr.bf16.mxu1 %v6929_v35  ;;  %v2301_v39 = vshll.u32 %v7498_v14, 16  ;;  %v397_v40 = vrot.slane %v396_v25, 4  ;;  %v2294_v42 = vrot.slane %v2292_v26, 4  ;;  %v2297_v43 = vrot.slane %v2295_v29, 5 }
  0x50   : > { %v2305_v44 = vshrl.u32 %v7498_v14, 16  ;;  %v2290_v47 = vsel %vm7345_vm2, %v2285_v34, %v2289_v6  ;;  %v2313_v60 = vrot.slane %v2311_v52, 5  ;;  %v417_v63 = vshll.u32 %v214_v30, 16  ;;  %v7534_v6 = vld [vmem:[%s9181_s1 + $0x180] sm:$0xff]  }
  0x51   : > { %6381 = vmatpush3.bf16.msra.mxu0 %v6921_v48  ;;  %v2303_v50 = vrot.slane %v2301_v39, 5  ;;  %v5582_v55 = vcombine.low %v2280_v20, %v2290_v47  ;;  %v402_v48 = vsel %vm7345_vm2, %v397_v40, %v401_v17  ;;  %v2298_v56 = vor.u32 %v2297_v43, %v2294_v42  ;;  %v7541_v20 = vld [vmem:[%s7313_s6 + $0x5c] sm:$0x1]  ;;  %v217_v43 = vld [vmem:[%s7313_s6 + $0x58] sm:$0xf] }
  0x52   : > { %6191 = vmatpush3.bf16.msra.mxu1 %v6929_v35  ;;  %v405_v35 = vrot.slane %v403_v18, 4  ;;  %6382 = vmatprep.subr.bf16.mxu0 %v6923_v15  ;;  %v2307_v57 = vrot.slane %v2305_v44, 4  ;;  %v427_v3 = vshrl.u32 %v215_v53, 16  ;;  %v416_v9 = vrot.slane %v414_v61, 4  ;;  %v5535_v52 = vld [vmem:[%s7313_s6 + $0x60] sm:$0xf] }
  0x53   : > { %6192 = vmatprep.subr.bf16.mxu1 %v6931_v2  ;;  %6346 = vmatprep.mubr.bf16.mxu0 %v5582_v55  ;;  %v2299_v1 = vrot.slane %v2298_v56, 4  ;;  %v419_v10 = vrot.slane %v417_v63, 5  ;;  %v433_v11 = vshll.u32 %v256_v54, 16  ;;  %v2316_v25 = vshrl.u32 %v5532_v58, 16 }
  0x54   : > { %v406_v49 = vor.u32 %v405_v35, %v401_v17  ;;  %v2308_v5 = vor.u32 %v2307_v57, %v2303_v50  ;;  %v429_v18 = vrot.slane %v427_v3, 4  ;;  %v2319_v29 = vshll.u32 %v5532_v58, 16  ;;  %v216_v35 = vld [vmem:[%s7313_s6 + $0x54] sm:$0xf] }
  0x55   : > { %6383 = vmatpush3.bf16.msra.mxu0 %v6923_v15  ;;  %v2304_v13 = vsel %vm7345_vm2, %v2299_v1, %v2303_v50  ;;  %v420_v17 = vor.u32 %v419_v10, %v416_v9  ;;  %v435_v21 = vrot.slane %v433_v11, 5  ;;  %v2325_v30 = vshll.u32 %v7529_v0, 16  ;;  %v257_v50 = vld [vmem:[%s7313_s6 + $0x5c] sm:$0x1] }
  0x56   : > { %6193 = vmatpush3.bf16.msra.mxu1 %v6931_v2  ;;  %v407_v59 = vrot.slane %v406_v49, 4  ;;  %v423_v2 = vshll.u32 %v215_v53, 16  ;;  %6384 = vmatprep.subr.bf16.mxu0 %v6924_v31  ;;  %v2309_v15 = vrot.slane %v2308_v5, 4  ;;  %v2329_v34 = vshrl.u32 %v7529_v0, 16 }
  0x57   : > { %6226 = vmatprep.subr.bf16.mxu1 %v7515_v4  ;;  %v421_v39 = vrot.slane %v420_v17, 4  ;;  %v2318_v42 = vrot.slane %v2316_v25, 4  ;;  %v2327_v44 = vrot.slane %v2325_v30, 5  ;;  %v2335_v49 = vshll.u32 %v7541_v20, 16  ;;  %v7565_v17 = vld [vmem:[%s7313_s6 + $0x68] sm:$0x1] }
  0x58   : > { %v412_v7 = vsel %vm7345_vm2, %v407_v59, %v411_v38  ;;  %v425_v16 = vrot.slane %v423_v2, 5  ;;  %v2314_v26 = vsel %vm7345_vm2, %v2309_v15, %v2313_v60  ;;  %v2331_v47 = vrot.slane %v2329_v34, 4  ;;  %v7556_v60 = vld [vmem:[%s7313_s6 + $0x64] sm:$0xf]  ;;  %v7569_v25 = vld [vmem:[%s7313_s6 + $0x60] sm:$0xf] }
  0x59   : > { %v5343_v12 = vcombine.low %v402_v48, %v412_v7  ;;  %6385 = vmatpush3.bf16.msra.mxu0 %v6924_v31  ;;  %v5583_v38 = vcombine.low %v2304_v13, %v2314_v26  ;;  %v2321_v31 = vrot.slane %v2319_v29, 5  ;;  %v438_v55 = vshrl.u32 %v216_v35, 16 }
  0x5a   : > { %6418 = vmatprep.subr.bf16.mxu0 %v7534_v6  ;;  %v430_v40 = vor.u32 %v429_v18, %v425_v16  ;;  %v426_v53 = vsel %vm7345_vm2, %v421_v39, %v425_v16  ;;  %v441_v48 = vshll.u32 %v216_v35, 16  ;;  %v2332_v57 = vor.u32 %v2331_v47, %v2327_v44  ;;  %v7572_v35 = vld [vmem:[%s7313_s6 + $0x64] sm:$0xf] }
  0x5b   : > { %6155 = vmatmul.mubr.bf16.gmra.mrb[8].mxu1 %v5343_v12  ;;  %6347 = vmatmul.mubr.bf16.gmra.mrb[8].mxu0 %v5583_v38  ;;  %v2322_v56 = vor.u32 %v2321_v31, %v2318_v42  ;;  %v2337_v58 = vrot.slane %v2335_v49, 5  ;;  %v447_v59 = vshll.u32 %v217_v43, 16  ;;  %v440_v63 = vrot.slane %v438_v55, 4 }
  0x5c   : > { %v431_v54 = vrot.slane %v430_v40, 4  ;;  %v443_v1 = vrot.slane %v441_v48, 5  ;;  %v451_v5 = vshrl.u32 %v217_v43, 16  ;;  %v2333_v7 = vrot.slane %v2332_v57, 4  ;;  %v258_v43 = vld [vmem:[%s7313_s6 + $0x68] sm:$0x1] }
  0x5d   : > { %v2323_v3 = vrot.slane %v2322_v56, 4  ;;  %v449_v9 = vrot.slane %v447_v59, 5  ;;  %v457_v12 = vshll.u32 %v257_v50, 16  ;;  %v2340_v13 = vshrl.u32 %v5535_v52, 16  ;;  %v5602_v50 = vld [vmem:[%s7313_s6 + $0xc] sm:$0xe] }
  0x5e   : > { %v436_v61 = vsel %vm7345_vm2, %v431_v54, %v435_v21  ;;  %v444_v10 = vor.u32 %v443_v1, %v440_v63  ;;  %v453_v11 = vrot.slane %v451_v5, 4  ;;  %v2338_v16 = vsel %vm7345_vm2, %v2333_v7, %v2337_v58  ;;  %v7587_v5 = vld [vmem:[%s7313_s6 + $0x6c] sm:$0xf] }
  0x5f   : > { %v5344_v2 = vcombine.low %v426_v53, %v436_v61  ;;  %v2328_v15 = vsel %vm7345_vm2, %v2323_v3, %v2327_v44  ;;  %v2343_v18 = vshll.u32 %v5535_v52, 16  ;;  %v2349_v21 = vshll.u32 %v7556_v60, 16 }
  0x60   : > { %v5584_v26 = vcombine.low %v2328_v15, %v2338_v16  ;;  %v445_v29 = vrot.slane %v444_v10, 4  ;;  %v454_v30 = vor.u32 %v453_v11, %v449_v9  ;;  %v459_v34 = vrot.slane %v457_v12, 5 }
  0x61   : > { %6158 = vmatprep.mubr.bf16.mxu1 %v5344_v2  ;;  %v2342_v38 = vrot.slane %v2340_v13, 4  ;;  %v2345_v39 = vrot.slane %v2343_v18, 5  ;;  %v2351_v40 = vrot.slane %v2349_v21, 5  ;;  %v2353_v42 = vshrl.u32 %v7556_v60, 16  ;;  %v7599_v21 = vld [vmem:[%s7313_s6 + $0x70] sm:$0xf] }
  0x62   : > { %6350 = vmatprep.mubr.bf16.mxu0 %v5584_v26  ;;  %v450_v31 = vsel %vm7345_vm2, %v445_v29, %v449_v9  ;;  %v455_v44 = vrot.slane %v454_v30, 4  ;;  %v2359_v47 = vshll.u32 %v7565_v17, 16  ;;  %v462_v49 = vshrl.u32 %v7569_v25, 16  ;;  %v7015_v9 = vld [vmem:[%s7313_s6 + $0xb4] sm:$0xff]  }
  0x63   : > { %v2346_v52 = vor.u32 %v2345_v39, %v2342_v38  ;;  %v2355_v53 = vrot.slane %v2353_v42, 4  ;;  %v465_v54 = vshll.u32 %v7569_v25, 16  ;;  %v471_v55 = vshll.u32 %v7572_v35, 16 }
  0x64   : > { %v460_v48 = vsel %vm7345_vm2, %v455_v44, %v459_v34  ;;  %v2361_v56 = vrot.slane %v2359_v47, 5  ;;  %v464_v57 = vrot.slane %v462_v49, 4  ;;  %v475_v58 = vshrl.u32 %v7572_v35, 16  ;;  %v7610_v47 = vld [vmem:[%s7313_s6 + $0x78] sm:$0xf] }
  0x65   : > { %v5345_v59 = vcombine.low %v450_v31, %v460_v48  ;;  %v2347_v61 = vrot.slane %v2346_v52, 4  ;;  %v2356_v63 = vor.u32 %v2355_v53, %v2351_v40  ;;  %v467_v1 = vrot.slane %v465_v54, 5  ;;  %v7621_v54 = vld [vmem:[%s7313_s6 + $0x7c] sm:$0xf] }
  0x66   : > { %v473_v2 = vrot.slane %v471_v55, 5  ;;  %v477_v3 = vrot.slane %v475_v58, 4  ;;  %v481_v7 = vshll.u32 %v258_v43, 16  ;;  %v5618_v10 = vrot.slane %v5602_v50, 9  ;;  %v260_v58 = vld [vmem:[%s7313_s6 + $0x80] sm:$0x1] }
  0x67   : > { %6159 = vmatmul.mubr.bf16.gmra.mrb[12].mxu1 %v5345_v59  ;;  %v2352_v11 = vsel %vm7345_vm2, %v2347_v61, %v2351_v40  ;;  %v2357_v12 = vrot.slane %v2356_v63, 4  ;;  %v468_v13 = vor.u32 %v467_v1, %v464_v57  ;;  %v2943_v15 = vrot.slane %v7326_v23, 5  ;;  %v259_v40 = vld [vmem:[%s7313_s6 + $0x74] sm:$0x1]  ;;  %v5603_v23 = vld [vmem:[%s7313_s6 + $0x18] sm:$0xe] }
  0x68   : > { %v478_v16 = vor.u32 %v477_v3, %v473_v2  ;;  %v483_v18 = vrot.slane %v481_v7, 5  ;;  %v486_v26 = vshrl.u32 %v7587_v5, 16  ;;  %v489_v29 = vshll.u32 %v7587_v5, 16 }
  0x69   : > { %v2362_v30 = vsel %vm7345_vm2, %v2357_v12, %v2361_v56  ;;  %v469_v34 = vrot.slane %v468_v13, 4  ;;  %v2944_v38 = vsel %vm7591_vm5, %v5618_v10, %v2943_v15  ;;  %v2945_v39 = vrot.slane %v2943_v15, 4  ;;  %v5604_v13 = vld [vmem:[%s7313_s6 + $0x24] sm:$0xe] }
  0x6a   : > { %v5585_v42 = vcombine.low %v2352_v11, %v2362_v30  ;;  %v479_v43 = vrot.slane %v478_v16, 4  ;;  %v488_v31 = vrot.slane %v486_v26, 4  ;;  %v491_v44 = vrot.slane %v489_v29, 5  ;;  %v7643_v16 = vld [vmem:[%s7313_s6 + $0x84] sm:$0xf]  ;;  %v6928_v29 = vld [vmem:[%s9181_s1 + $0x188] sm:$0xff]  }
  0x6b   : > { %v474_v49 = vsel %vm7345_vm2, %v469_v34, %v473_v2  ;;  %v2947_v50 = vsel %vm7591_vm5, %v2945_v39, %v2946_v41  ;;  %v495_v52 = vshll.u32 %v7599_v21, 16  ;;  %v499_v53 = vshrl.u32 %v7599_v21, 16 }
  0x6c   : > { %6351 = vmatmul.mubr.bf16.gmra.mrb[12].mxu0 %v5585_v42  ;;  %v484_v55 = vsel %vm7345_vm2, %v479_v43, %v483_v18  ;;  %v5650_v48 = vcombine.low %v2944_v38, %v2947_v50  ;;  %v492_v56 = vor.u32 %v491_v44, %v488_v31  ;;  %v505_v57 = vshll.u32 %v259_v40, 16  ;;  %v7651_v40 = vld [vmem:[%s7313_s6 + $0x88] sm:$0xf]  ;;  %v261_v31 = vld [vmem:[%s7313_s6 + $0x8c] sm:$0x1] }
  0x6d   : > { %v5346_v59 = vcombine.low %v474_v49, %v484_v55  ;;  %v497_v24 = vrot.slane %v495_v52, 5  ;;  %v501_v61 = vrot.slane %v499_v53, 4  ;;  %v5619_v63 = vrot.slane %v5603_v23, 9 }
  0x6e   : > { %6386 = vmatprep.mubr.bf16.mxu0 %v5650_v48  ;;  %v493_v41 = vrot.slane %v492_v56, 4  ;;  %v507_v1 = vrot.slane %v505_v57, 5  ;;  %v2954_v2 = vsel %vm7591_vm5, %v7394_v36, %v2953_v32  ;;  %v510_v3 = vshrl.u32 %v7610_v47, 16 }
  0x6f   : > { %6162 = vmatprep.mubr.bf16.mxu1 %v5346_v59  ;;  %v502_v7 = vor.u32 %v501_v61, %v497_v24  ;;  %v2951_v10 = vsel %vm7591_vm5, %v5619_v63, %v2950_v27  ;;  %v513_v11 = vshll.u32 %v7610_v47, 16  ;;  %v519_v12 = vshll.u32 %v7621_v54, 16 }
  0x70   : > { %v498_v8 = vsel %vm7345_vm2, %v493_v41, %v497_v24  ;;  %v5651_v15 = vcombine.low %v2951_v10, %v2954_v2  ;;  %v512_v32 = vrot.slane %v510_v3, 4  ;;  %v523_v36 = vshrl.u32 %v7621_v54, 16  ;;  %v7672_v2 = vld [vmem:[%s7313_s6 + $0x90] sm:$0xf]  ;;  %v7675_v3 = vld [vmem:[%s7313_s6 + $0x94] sm:$0xf] }
  0x71   : > { %v503_v62 = vrot.slane %v502_v7, 4  ;;  %v515_v18 = vrot.slane %v513_v11, 5  ;;  %v521_v26 = vrot.slane %v519_v12, 5  ;;  %v529_v27 = vshll.u32 %v260_v58, 16 }
  0x72   : > { %v525_v30 = vrot.slane %v523_v36, 4  ;;  %v5620_v34 = vrot.slane %v5604_v13, 9  ;;  %v2957_v38 = vrot.slane %v7398_v45, 5  ;;  %v2960_v39 = vrot.slane %v7404_v51, 5  ;;  %v5605_v45 = vld [vmem:[%s7313_s6 + $0x30] sm:$0xe] }
  0x73   : > { %v508_v23 = vsel %vm7345_vm2, %v503_v62, %v507_v1  ;;  %v516_v42 = vor.u32 %v515_v18, %v512_v32  ;;  %v531_v43 = vrot.slane %v529_v27, 5  ;;  %v534_v44 = vshrl.u32 %v7643_v16, 16  ;;  %v262_v62 = vld [vmem:[%s7313_s6 + $0x98] sm:$0x1] }
  0x74   : > { %v5347_v49 = vcombine.low %v498_v8, %v508_v23  ;;  %6387 = vmatmul.mubr.bf16.vlgmr.msra.gmra.mrb[0].mxu0 %v5651_v15  ;;  %v526_v50 = vor.u32 %v525_v30, %v521_v26  ;;  %v2958_v52 = vsel %vm7591_vm5, %v5620_v34, %v2957_v38  ;;  %v2959_v53 = vrot.slane %v2957_v38, 4  ;;  %v6932_v30 = vld [vmem:[%s9181_s1 + $0x198] sm:$0xff]  }
  0x75   : > { %6419 = vmatpush3.bf16.msra.mxu0 %v7534_v6  ;;  %v517_v51 = vrot.slane %v516_v42, 4  ;;  %v536_v55 = vrot.slane %v534_v44, 4  ;;  %v537_v48 = vshll.u32 %v7643_v16, 16  ;;  %v543_v56 = vshll.u32 %v7651_v40, 16  ;;  %v6930_v6 = vld [vmem:[%s9181_s1 + $0x190] sm:$0xff]  }
  0x76   : > { %6163 = vmatmul.mubr.bf16.gmra.mrb[16].mxu1 %v5347_v49  ;;  %v527_v57 = vrot.slane %v526_v50, 4  ;;  %v2961_v58 = vsel %vm7591_vm5, %v2959_v53, %v2960_v39  ;;  %v547_v59 = vshrl.u32 %v7651_v40, 16  ;;  %v553_v24 = vshll.u32 %v261_v31, 16  ;;  %6420 = vmatprep.subr.bf16.mxu0 %v6928_v29  ;;  %v5606_v38 = vld [vmem:[%s7313_s6 + $0x3c] sm:$0xe] }
  0x77   : > { %v522_v61 = vsel %vm7345_vm2, %v517_v51, %v521_v26  ;;  %v5652_v63 = vcombine.low %v2958_v52, %v2961_v58  ;;  %v539_v41 = vrot.slane %v537_v48, 5  ;;  %v545_v1 = vrot.slane %v543_v56, 5  ;;  %v7693_v31 = vld [vmem:[%s7313_s6 + $0x9c] sm:$0xf]  ;;  %v7702_v48 = vld [vmem:[%s7313_s6 + $0xa0] sm:$0xf] }
  0x78   : > { %v532_v7 = vsel %vm7345_vm2, %v527_v57, %v531_v43  ;;  %v549_v10 = vrot.slane %v547_v59, 4  ;;  %v555_v11 = vrot.slane %v553_v24, 5  ;;  %v5621_v12 = vrot.slane %v5605_v45, 9  ;;  %v6936_v56 = vld [vmem:[%s9181_s1 + $0x1a0] sm:$0xff]  }
  0x79   : > { %v5348_v13 = vcombine.low %v522_v61, %v532_v7  ;;  %6390 = vmatprep.mubr.bf16.mxu0 %v5652_v63  ;;  %v540_v8 = vor.u32 %v539_v41, %v536_v55  ;;  %v2964_v15 = vrot.slane %v7429_v33, 5  ;;  %v2967_v32 = vrot.slane %v7440_v46, 5  ;;  %6421 = vmatpush3.bf16.msra.mxu0 %v6928_v29  ;;  %v263_v61 = vld [vmem:[%s7313_s6 + $0xa4] sm:$0x1] }
  0x7a   : > { %v550_v36 = vor.u32 %v549_v10, %v545_v1  ;;  %v558_v18 = vshrl.u32 %v7672_v2, 16  ;;  %v561_v26 = vshll.u32 %v7672_v2, 16  ;;  %v567_v27 = vshll.u32 %v7675_v3, 16  ;;  %6422 = vmatprep.subr.bf16.mxu0 %v6930_v6 }
  0x7b   : > { %6166 = vmatprep.mubr.bf16.mxu1 %v5348_v13  ;;  %v541_v34 = vrot.slane %v540_v8, 4  ;;  %v2965_v33 = vsel %vm7591_vm5, %v5621_v12, %v2964_v15  ;;  %v2966_v46 = vrot.slane %v2964_v15, 4  ;;  %v571_v29 = vshrl.u32 %v7675_v3, 16  ;;  %v5607_v15 = vld [vmem:[%s7313_s6 + $0x48] sm:$0xe] }
  0x7c   : > { %v551_v39 = vrot.slane %v550_v36, 4  ;;  %v560_v23 = vrot.slane %v558_v18, 4  ;;  %v563_v42 = vrot.slane %v561_v26, 5  ;;  %v569_v43 = vrot.slane %v567_v27, 5  ;;  %v7727_v27 = vld [vmem:[%s7313_s6 + $0xa8] sm:$0xf] }
  0x7d   : > { %v546_v44 = vsel %vm7345_vm2, %v541_v34, %v545_v1  ;;  %v2968_v49 = vsel %vm7591_vm5, %v2966_v46, %v2967_v32  ;;  %v573_v50 = vrot.slane %v571_v29, 4  ;;  %v577_v52 = vshll.u32 %v262_v62, 16  ;;  %6423 = vmatpush3.bf16.msra.mxu0 %v6930_v6  ;;  %v6940_v32 = vld [vmem:[%s9181_s1 + $0x1a8] sm:$0xff]  }
  0x7e   : > { %v556_v53 = vsel %vm7345_vm2, %v551_v39, %v555_v11  ;;  %v5653_v45 = vcombine.low %v2965_v33, %v2968_v49  ;;  %v564_v51 = vor.u32 %v563_v42, %v560_v23  ;;  %v5622_v55 = vrot.slane %v5606_v38, 9  ;;  %6424 = vmatprep.subr.bf16.mxu0 %v6932_v30  ;;  %v7730_v29 = vld [vmem:[%s7313_s6 + $0xac] sm:$0xf] }
  0x7f   : > { %v5349_v57 = vcombine.low %v546_v44, %v556_v53  ;;  %v574_v58 = vor.u32 %v573_v50, %v569_v43  ;;  %v579_v59 = vrot.slane %v577_v52, 5  ;;  %v2971_v24 = vrot.slane %v7463_v19, 5  ;;  %v5608_v53 = vld [vmem:[%s7313_s6 + $0x54] sm:$0xe] }
  0x80   : > { %6391 = vmatmul.mubr.bf16.gmra.mrb[4].mxu0 %v5653_v45  ;;  %v565_v6 = vrot.slane %v564_v51, 4  ;;  %v2974_v63 = vrot.slane %v7471_v28, 5  ;;  %v582_v41 = vshrl.u32 %v7693_v31, 16  ;;  %v585_v1 = vshll.u32 %v7693_v31, 16  ;;  %v6944_v45 = vld [vmem:[%s9181_s1 + $0x1b0] sm:$0xff]  }
  0x81   : > { %6167 = vmatmul.mubr.bf16.gmra.mrb[20].mxu1 %v5349_v57  ;;  %v575_v7 = vrot.slane %v574_v58, 4  ;;  %v2972_v10 = vsel %vm7591_vm5, %v5622_v55, %v2971_v24  ;;  %v2973_v11 = vrot.slane %v2971_v24, 4  ;;  %v591_v12 = vshll.u32 %v7702_v48, 16  ;;  %6425 = vmatpush3.bf16.msra.mxu0 %v6932_v30 }
  0x82   : > { %v570_v19 = vsel %vm7345_vm2, %v565_v6, %v569_v43  ;;  %v584_v13 = vrot.slane %v582_v41, 4  ;;  %v587_v28 = vrot.slane %v585_v1, 5  ;;  %v595_v8 = vshrl.u32 %v7702_v48, 16  ;;  %6426 = vmatprep.subr.bf16.mxu0 %v6936_v56  ;;  %v264_v43 = vld [vmem:[%s7313_s6 + $0xb0] sm:$0x1] }
  0x83   : > { %v580_v36 = vsel %vm7345_vm2, %v575_v7, %v579_v59  ;;  %v2975_v62 = vsel %vm7591_vm5, %v2973_v11, %v2974_v63  ;;  %v593_v18 = vrot.slane %v591_v12, 5  ;;  %v601_v26 = vshll.u32 %v263_v61, 16  ;;  %v7750_v41 = vld [vmem:[%s7313_s6 + $0xb4] sm:$0xf]  ;;  %v7755_v12 = vld [vmem:[%s7313_s6 + $0xb8] sm:$0xf] }
  0x84   : > { %v5350_v30 = vcombine.low %v570_v19, %v580_v36  ;;  %v5654_v34 = vcombine.low %v2972_v10, %v2975_v62  ;;  %v588_v33 = vor.u32 %v587_v28, %v584_v13  ;;  %v597_v46 = vrot.slane %v595_v8, 4  ;;  %v265_v19 = vld [vmem:[%s7313_s6 + $0xbc] sm:$0x1] }
  0x85   : > { %v603_v38 = vrot.slane %v601_v26, 5  ;;  %v5623_v39 = vrot.slane %v5607_v15, 9  ;;  %v2978_v23 = vrot.slane %v7498_v14, 5  ;;  %v2981_v42 = vrot.slane %v7504_v22, 5  ;;  %6427 = vmatpush3.bf16.msra.mxu0 %v6936_v56  ;;  %v6948_v13 = vld [vmem:[%s9181_s1 + $0x1b8] sm:$0xff]  }
  0x86   : > { %6170 = vmatprep.mubr.bf16.mxu1 %v5350_v30  ;;  %6394 = vmatprep.mubr.bf16.mxu0 %v5654_v34  ;;  %v589_v44 = vrot.slane %v588_v33, 4  ;;  %v598_v49 = vor.u32 %v597_v46, %v593_v18  ;;  %v606_v50 = vshrl.u32 %v7727_v27, 16  ;;  %v609_v52 = vshll.u32 %v7727_v27, 16  ;;  %v5609_v30 = vld [vmem:[%s7313_s6 + $0x60] sm:$0xe] }
  0x87   : > { %v2979_v14 = vsel %vm7591_vm5, %v5623_v39, %v2978_v23  ;;  %v2980_v22 = vrot.slane %v2978_v23, 4  ;;  %v615_v51 = vshll.u32 %v7730_v29, 16  ;;  %v619_v55 = vshrl.u32 %v7730_v29, 16  ;;  %6428 = vmatprep.subr.bf16.mxu0 %v6940_v32  ;;  %v5539_v39 = vld [vmem:[%s7313_s6 + $0x70] sm:$0xf] }
  0x88   : > { %v594_v56 = vsel %vm7345_vm2, %v589_v44, %v593_v18  ;;  %v599_v57 = vrot.slane %v598_v49, 4  ;;  %v608_v58 = vrot.slane %v606_v50, 4  ;;  %v611_v59 = vrot.slane %v609_v52, 5  ;;  %v7777_v44 = vld [vmem:[%s9181_s1 + $0x1c0] sm:$0xff]  }
  0x89   : > { %v2982_v24 = vsel %vm7591_vm5, %v2980_v22, %v2981_v42  ;;  %v617_v61 = vrot.slane %v615_v51, 5  ;;  %v621_v6 = vrot.slane %v619_v55, 4  ;;  %v625_v63 = vshll.u32 %v264_v43, 16  ;;  %6429 = vmatpush3.bf16.msra.mxu0 %v6940_v32  ;;  %v5610_v43 = vld [vmem:[%s7313_s6 + $0x6c] sm:$0xe] }
  0x8a   : > { %v604_v1 = vsel %vm7345_vm2, %v599_v57, %v603_v38  ;;  %v5655_v7 = vcombine.low %v2979_v14, %v2982_v24  ;;  %v612_v10 = vor.u32 %v611_v59, %v608_v58  ;;  %v5624_v11 = vrot.slane %v5608_v53, 9  ;;  %6430 = vmatprep.subr.bf16.mxu0 %v6944_v45  ;;  %v5540_v55 = vld [vmem:[%s7313_s6 + $0x74] sm:$0x1]  ;;  %v5611_v24 = vld [vmem:[%s7313_s6 + $0x78] sm:$0xe] }
  0x8b   : > { %v5351_v28 = vcombine.low %v594_v56, %v604_v1  ;;  %v622_v8 = vor.u32 %v621_v6, %v617_v61  ;;  %v627_v15 = vrot.slane %v625_v63, 5  ;;  %v2985_v32 = vrot.slane %v7529_v0, 5 }
  0x8c   : > { %6395 = vmatmul.mubr.bf16.gmra.mrb[8].mxu0 %v5655_v7  ;;  %v613_v36 = vrot.slane %v612_v10, 4  ;;  %v2988_v62 = vrot.slane %v7541_v20, 5  ;;  %v630_v18 = vshrl.u32 %v7750_v41, 16  ;;  %v633_v26 = vshll.u32 %v7750_v41, 16 }
  0x8d   : > { %6171 = vmatmul.mubr.bf16.gmra.mrb[24].mxu1 %v5351_v28  ;;  %v623_v34 = vrot.slane %v622_v8, 4  ;;  %v2986_v33 = vsel %vm7591_vm5, %v5624_v11, %v2985_v32  ;;  %v2987_v46 = vrot.slane %v2985_v32, 4  ;;  %v639_v38 = vshll.u32 %v7755_v12, 16  ;;  %6431 = vmatpush3.bf16.msra.mxu0 %v6944_v45  ;;  %v7790_v11 = vld [vmem:[%s7313_s6 + $0x7c] sm:$0xf] }
  0x8e   : > { %v618_v0 = vsel %vm7345_vm2, %v613_v36, %v617_v61  ;;  %v632_v20 = vrot.slane %v630_v18, 4  ;;  %v635_v23 = vrot.slane %v633_v26, 5  ;;  %v643_v42 = vshrl.u32 %v7755_v12, 16  ;;  %6432 = vmatprep.subr.bf16.mxu0 %v6948_v13  ;;  %v7017_v36 = vld [vmem:[%s7313_s6] sm:$0xf] }
  0x8f   : > { %v628_v49 = vsel %vm7345_vm2, %v623_v34, %v627_v15  ;;  %v2989_v50 = vsel %vm7591_vm5, %v2987_v46, %v2988_v62  ;;  %v641_v52 = vrot.slane %v639_v38, 5  ;;  %v649_v53 = vshll.u32 %v265_v19, 16  ;;  %v5545_v15 = vld [vmem:[%s7313_s6 + $0x88] sm:$0xf]  ;;  %v7805_v62 = vld [vmem:[%s7313_s6 + $0x4] sm:$0xf] }
  0x90   : > { %v5352_v45 = vcombine.low %v618_v0, %v628_v49  ;;  %v5656_v14 = vcombine.low %v2986_v33, %v2989_v50  ;;  %v636_v22 = vor.u32 %v635_v23, %v632_v20  ;;  %v645_v51 = vrot.slane %v643_v42, 4  ;;  %v5546_v26 = vld [vmem:[%s7313_s6 + $0x8c] sm:$0x1]  ;;  %v5549_v23 = vld [vmem:[%s7313_s6 + $0x98] sm:$0x1] }
  0x91   : > { %v651_v56 = vrot.slane %v649_v53, 5  ;;  %v5625_v57 = vrot.slane %v5609_v30, 9  ;;  %v2992_v58 = vrot.slane %v7556_v60, 5  ;;  %v2995_v59 = vrot.slane %v7565_v17, 5  ;;  %6433 = vmatpush3.bf16.msra.mxu0 %v6948_v13  ;;  %v7793_v17 = vld [vmem:[%s7313_s6 + $0x80] sm:$0x1] }
  0x92   : > { %6174 = vmatprep.mubr.bf16.mxu1 %v5352_v45  ;;  %6398 = vmatprep.mubr.bf16.mxu0 %v5656_v14  ;;  %v637_v61 = vrot.slane %v636_v22, 4  ;;  %v646_v6 = vor.u32 %v645_v51, %v641_v52  ;;  %v5626_v63 = vrot.slane %v5610_v43, 9  ;;  %v2999_v1 = vrot.slane %v5539_v39, 5  ;;  %v5612_v30 = vld [vmem:[%s7313_s6 + $0x84] sm:$0xe] }
  0x93   : > { %v2993_v7 = vsel %vm7591_vm5, %v5625_v57, %v2992_v58  ;;  %v2994_v10 = vrot.slane %v2992_v58, 4  ;;  %v3002_v60 = vrot.slane %v5540_v55, 5  ;;  %6466 = vmatprep.subr.bf16.mxu0 %v7777_v44  ;;  %v5362_v18 = vcombine.low %v7017_v36, %v7805_v62  ;;  %v5548_v39 = vld [vmem:[%s7313_s6 + $0x94] sm:$0xf]  ;;  %v5613_v42 = vld [vmem:[%s7313_s6 + $0x90] sm:$0xe] }
  0x94   : > { %v642_v19 = vsel %vm7345_vm2, %v637_v61, %v641_v52  ;;  %v647_v13 = vrot.slane %v646_v6, 4  ;;  %v3000_v28 = vsel %vm7591_vm5, %v5626_v63, %v2999_v1  ;;  %v3001_v8 = vrot.slane %v2999_v1, 4  ;;  %v5614_v50 = vld [vmem:[%s7313_s6 + $0x9c] sm:$0xe]  ;;  %v5551_v14 = vld [vmem:[%s7313_s6 + $0xa0] sm:$0xf] }
  0x95   : > { %v2996_v32 = vsel %vm7591_vm5, %v2994_v10, %v2995_v59  ;;  %v5627_v38 = vrot.slane %v5611_v24, 9  ;;  %v3006_v43 = vrot.slane %v7790_v11, 5  ;;  %v3009_v49 = vrot.slane %v7793_v17, 5  ;;  %v5552_v22 = vld [vmem:[%s7313_s6 + $0xa4] sm:$0x1] }
  0x96   : > { %v652_v34 = vsel %vm7345_vm2, %v647_v13, %v651_v56  ;;  %v5657_v33 = vcombine.low %v2993_v7, %v2996_v32  ;;  %v3003_v46 = vsel %vm7591_vm5, %v3001_v8, %v3002_v60  ;;  %v5628_v52 = vrot.slane %v5612_v30, 9  ;;  %v5554_v59 = vld [vmem:[%s7313_s6 + $0xac] sm:$0xf]  ;;  %v7829_v61 = vld [vmem:[%s7313_s6 + $0x10] sm:$0xf] }
  0x97   : > { %v5353_v0 = vcombine.low %v642_v19, %v652_v34  ;;  %v5658_v20 = vcombine.low %v3000_v28, %v3003_v46  ;;  %v3013_v53 = vrot.slane %v5545_v15, 5  ;;  %v3016_v45 = vrot.slane %v5546_v26, 5  ;;  %v7019_v24 = vld [vmem:[%s7313_s6 + $0xc] sm:$0xf]  ;;  %v7021_v8 = vld [vmem:[%s7313_s6 + $0x18] sm:$0xf] }
  0x98   : > { %6399 = vmatmul.mubr.bf16.gmra.mrb[12].mxu0 %v5657_v33  ;;  %v3007_v51 = vsel %vm7591_vm5, %v5627_v38, %v3006_v43  ;;  %v3008_v55 = vrot.slane %v3006_v43, 4  ;;  %v3020_v58 = vrot.slane %v5548_v39, 5  ;;  %v5363_v6 = vcombine.low %v7019_v24, %v7829_v61  ;;  %v6939_v19 = vld [vmem:[%s9181_s1 + $0x88] sm:$0xff]   ;;  %v7841_v15 = vld [vmem:[%s7313_s6 + $0x1c] sm:$0xf] }
  0x99   : > { %6175 = vmatmul.mubr.bf16.gmra.mrb[28].mxu1 %v5353_v0  ;;  %6402 = vmatprep.mubr.bf16.mxu0 %v5658_v20  ;;  %v3014_v56 = vsel %vm7591_vm5, %v5628_v52, %v3013_v53  ;;  %v3015_v57 = vrot.slane %v3013_v53, 4  ;;  %v5629_v1 = vrot.slane %v5613_v42, 9  ;;  %v3023_v7 = vrot.slane %v5549_v23, 5  ;;  %v5555_v30 = vld [vmem:[%s7313_s6 + $0xb0] sm:$0x1] }
  0x9a   : > { %6194 = vmatprep.mubr.bf16.mxu1 %v5362_v18  ;;  %v3010_v63 = vsel %vm7591_vm5, %v3008_v55, %v3009_v49  ;;  %v3022_v13 = vrot.slane %v3020_v58, 4  ;;  %v5630_v28 = vrot.slane %v5614_v50, 9  ;;  %v5364_v32 = vcombine.low %v7021_v8, %v7841_v15  ;;  %v5615_v34 = vld [vmem:[%s7313_s6 + $0xa8] sm:$0xe]  ;;  %v5557_v33 = vld [vmem:[%s7313_s6 + $0xb8] sm:$0xf] }
  0x9b   : > { %v5659_v10 = vcombine.low %v3007_v51, %v3010_v63  ;;  %v3017_v60 = vsel %vm7591_vm5, %v3015_v57, %v3016_v45  ;;  %v3027_v18 = vrot.slane %v5551_v14, 5  ;;  %v3030_v26 = vrot.slane %v5552_v22, 5  ;;  %v5558_v20 = vld [vmem:[%s7313_s6 + $0xbc] sm:$0x1]  ;;  %v5616_v23 = vld [vmem:[%s7313_s6 + $0xb4] sm:$0xe] }
  0x9c   : > { %v5660_v36 = vcombine.low %v3014_v56, %v3017_v60  ;;  %v3034_v38 = vrot.slane %v5554_v59, 5  ;;  %v3021_v39 = vsel %vm7591_vm5, %v5629_v1, %v3020_v58  ;;  %v3024_v0 = vsel %vm7591_vm5, %v3022_v13, %v3023_v7  ;;  %v6943_v50 = vld [vmem:[%s9181_s1 + $0x90] sm:$0xff]   ;;  %v5560_v53 = vld [vmem:[%s7313_s6 + $0xc4] sm:$0xf]  ;;  %v7864_v51 = vld [vmem:[%s7313_s6 + $0x28] sm:$0xf] }
  0x9d   : > { %v3029_v46 = vrot.slane %v3027_v18, 4  ;;  %v3028_v42 = vsel %vm7591_vm5, %v5630_v28, %v3027_v18  ;;  %v3041_v49 = vrot.slane %v5557_v33, 5  ;;  %v5631_v52 = vrot.slane %v5615_v34, 9  ;;  %v7023_v22 = vld [vmem:[%s7313_s6 + $0x24] sm:$0xf]  ;;  %v6947_v1 = vld [vmem:[%s9181_s1 + $0x98] sm:$0xff]  }
  0x9e   : > { %v5661_v45 = vcombine.low %v3021_v39, %v3024_v0  ;;  %v3036_v14 = vrot.slane %v3034_v38, 4  ;;  %v5365_v55 = vcombine.low %v7023_v22, %v7864_v51  ;;  %v7025_v57 = vld [vmem:[%s7313_s6 + $0x30] sm:$0xf]  ;;  %v7869_v58 = vld [vmem:[%s7313_s6 + $0x34] sm:$0xf]  ;;  %v5632_v24 = vrot.slane %v5616_v23, 9 }
  0x9f   : > { %v3031_v43 = vsel %vm7591_vm5, %v3029_v46, %v3030_v26  ;;  %v5366_v59 = vcombine.low %v7025_v57, %v7869_v58  ;;  %v3044_v63 = vrot.slane %v5558_v20, 5  ;;  %v5617_v7 = vld [vmem:[%s7313_s6 + $0xc0] sm:$0xe]  ;;  %v3035_v60 = vsel %vm7591_vm5, %v5631_v52, %v3034_v38  ;;  %v5561_v8 = vld [vmem:[%s7313_s6 + $0xc8] sm:$0x1]  ;;  %v6950_v22 = vld [vmem:[%s7313_s6 + $0x18] sm:$0xff]  }
  0xa0   : > { %6403 = vmatmul.mubr.bf16.gmra.mrb[16].mxu0 %v5659_v10  ;;  %v5662_v56 = vcombine.low %v3028_v42, %v3031_v43  ;;  %v3048_v10 = vrot.slane %v5560_v53, 5  ;;  %v3042_v13 = vsel %vm7591_vm5, %v5632_v24, %v3041_v49  ;;  %v5633_v18 = vrot.slane %v5617_v7, 9  ;;  %v7027_v26 = vld [vmem:[%s7313_s6 + $0x3c] sm:$0xf]  ;;  %v7029_v39 = vld [vmem:[%s7313_s6 + $0x48] sm:$0xf] }
  0xa1   : > { %6195 = vmatmul.mubr.bf16.vlgmr.msra.gmra.mrb[0].mxu1 %v5363_v6  ;;  %6406 = vmatprep.mubr.bf16.mxu0 %v5660_v36  ;;  %v3043_v6 = vrot.slane %v3041_v49, 4  ;;  %v3051_v38 = vrot.slane %v5561_v8, 5  ;;  %v7895_v0 = vld [vmem:[%s7313_s6 + $0x4c] sm:$0xf]  ;;  %v6964_v49 = vld [vmem:[%s9181_s1 + $0xb0] sm:$0xff]   ;;  %v2401_v52 = vshrl.u32 %v7790_v11, 16 }
  0xa2   : > { %6227 = vmatpush3.bf16.msra.mxu1 %v7515_v4  ;;  %6198 = vmatprep.mubr.bf16.mxu1 %v5364_v32  ;;  %v3037_v4 = vrot.slane %v5555_v30, 5  ;;  %v6952_v32 = vld [vmem:[%s9181_s1 + $0xa0] sm:$0xff]   ;;  %v3050_v46 = vrot.slane %v3048_v10, 4  ;;  %v5368_v20 = vcombine.low %v7029_v39, %v7895_v0  ;;  %v6958_v23 = vld [vmem:[%s9181_s1 + $0xa8] sm:$0xff]   ;;  %v3049_v42 = vsel %vm7591_vm5, %v5633_v18, %v3048_v10  ;;  %v6956_v18 = vld [vmem:[%s7313_s6 + $0x30] sm:$0xff]  }
  0xa3   : > { %6228 = vmatprep.subr.bf16.mxu1 %v6939_v19  ;;  %v3045_v28 = vsel %vm7591_vm5, %v3043_v6, %v3044_v63  ;;  %v7890_v30 = vld [vmem:[%s7313_s6 + $0x40] sm:$0xf]  ;;  %v7923_v57 = vrot.slane %v2401_v52, 4  ;;  %v6953_v6 = vld [vmem:[%s7313_s6 + $0x24] sm:$0xff]   ;;  %v1308_v7 = vrot.slane %v7829_v61, 5  ;;  %v2407_v8 = vshll.u32 %v7793_v17, 16 }
  0xa4   : > { %v5367_v34 = vcombine.low %v7027_v26, %v7890_v30  ;;  %v5664_v33 = vcombine.low %v3042_v13, %v3045_v28  ;;  %v3052_v43 = vsel %vm7591_vm5, %v3050_v46, %v3051_v38  ;;  %v1248_v63 = vld [vmem:[%s7313_s6] sm:$0xe]  ;;  %v1249_v10 = vld [vmem:[%s7313_s6 + $0xc] sm:$0xe]  ;;  %v1315_v13 = vrot.slane %v7841_v15, 5 }
  0xa5   : > { %v5665_v53 = vcombine.low %v3049_v42, %v3052_v43  ;;  %v1251_v61 = vld [vmem:[%s7313_s6 + $0x24] sm:$0xe]  ;;  %v5373_v15 = vcombine.low %v7643_v16, %v7651_v40  ;;  %v5374_v26 = vcombine.low %v7672_v2, %v7675_v3  ;;  %v5386_v17 = vrot.slane %v1248_v63, 9  ;;  %v7035_v38 = vld [vmem:[%s7313_s6 + $0x20] sm:$0x1]  ;;  %v6965_v2 = vld [vmem:[%s7313_s6 + $0x54] sm:$0xff]  }
  0xa6   : > { %6229 = vmatpush3.bf16.msra.mxu1 %v6939_v19  ;;  %v3038_v19 = vsel %vm7591_vm5, %v3036_v14, %v3037_v4  ;;  %v7912_v14 = vld [vmem:[%s7313_s6 + $0x58] sm:$0xf]  ;;  %v1317_v46 = vrot.slane %v1315_v13, 4  ;;  %v1318_v39 = vrot.slane %v7035_v38, 5  ;;  %v7036_v43 = vld [vmem:[%s7313_s6 + $0x2c] sm:$0x1] }
  0xa7   : > { %6230 = vmatprep.subr.bf16.mxu1 %v6943_v50  ;;  %v5663_v36 = vcombine.low %v3035_v60, %v3038_v19  ;;  %v7938_v60 = vld [vmem:[%s9181_s1 + $0xc0] sm:$0xff]   ;;  %v1250_v19 = vld [vmem:[%s7313_s6 + $0x18] sm:$0xe]  ;;  %v7039_v38 = vld [vmem:[%s7313_s6 + $0x50] sm:$0x1]  ;;  %v1350_v16 = vrot.slane %v7912_v14, 5 }
  0xa8   : > { %6407 = vmatmul.mubr.bf16.gmra.mrb[20].mxu0 %v5661_v45  ;;  %v7031_v45 = vld [vmem:[%s7313_s6 + $0x54] sm:$0xf]  ;;  %v8061_v40 = vld [vmem:[%s7313_s6 + $0x64] sm:$0xf] }
  0xa9   : > { %6199 = vmatmul.mubr.bf16.gmra.mrb[4].mxu1 %v5365_v55  ;;  %6410 = vmatprep.mubr.bf16.mxu0 %v5662_v56  ;;  %v5369_v4 = vcombine.low %v7031_v45, %v7912_v14  ;;  %v5370_v55 = vcombine.low %v7569_v25, %v7572_v35  ;;  %v6970_v56 = vld [vmem:[%s9181_s1 + $0xb8] sm:$0xff]   ;;  %v7034_v25 = vld [vmem:[%s7313_s6 + $0x14] sm:$0x1]  ;;  %v6968_v3 = vld [vmem:[%s7313_s6 + $0x60] sm:$0xff]  }
  0xaa   : > { %6202 = vmatprep.mubr.bf16.mxu1 %v5366_v59  ;;  %6231 = vmatpush3.bf16.msra.mxu1 %v6943_v50  ;;  %v2397_v50 = vshll.u32 %v7790_v11, 16  ;;  %v7926_v59 = vld [vmem:[%s7313_s6 + $0x8] sm:$0x1]  ;;  %v1311_v35 = vrot.slane %v7034_v25, 5 }
  0xab   : > { %6232 = vmatprep.subr.bf16.mxu1 %v6947_v1  ;;  %v1304_v24 = vrot.slane %v7926_v59, 5 }
  0xac   : > { %v7921_v11 = vrot.slane %v2397_v50, 5 }
  0xae   : > { %6233 = vmatpush3.bf16.msra.mxu1 %v6947_v1  ;;  %v1301_v1 = vrot.slane %v7805_v62, 5  ;;  %v5371_v62 = vcombine.low %v7587_v5, %v7599_v21  ;;  %v5387_v21 = vrot.slane %v1249_v10, 9  ;;  %v5746_v10 = vld [vmem:[%s7313_s6 + $0x18] sm:$0xf] }
  0xaf   : > { %6234 = vmatprep.subr.bf16.mxu1 %v6952_v32 }
  0xb0   : > { %6411 = vmatmul.mubr.bf16.gmra.mrb[24].mxu0 %v5663_v36  ;;  %v5372_v36 = vcombine.low %v7610_v47, %v7621_v54  ;;  %v1303_v5 = vrot.slane %v1301_v1, 4  ;;  %v6960_v47 = vld [vmem:[%s9181_s1 + $0x1c8] sm:$0xff]   ;;  %v5388_v54 = vrot.slane %v1250_v19, 9  ;;  %v7981_v59 = vsel %vm7591_vm5, %v5386_v17, %v1301_v1  ;;  %v5747_v19 = vld [vmem:[%s7313_s6 + $0x1c] sm:$0xf] }
  0xb1   : > { %6203 = vmatmul.mubr.bf16.gmra.mrb[8].mxu1 %v5367_v34  ;;  %6414 = vmatprep.mubr.bf16.mxu0 %v5664_v33  ;;  %v1329_v34 = vrot.slane %v7869_v58, 5  ;;  %v1310_v33 = vrot.slane %v1308_v7, 4  ;;  %v5389_v58 = vrot.slane %v1251_v61, 9  ;;  %v1343_v1 = vrot.slane %v7895_v0, 5  ;;  %v6962_v0 = vld [vmem:[%s7313_s6 + $0x48] sm:$0xff]  }
  0xb2   : > { %6206 = vmatprep.mubr.bf16.mxu1 %v5368_v20  ;;  %6235 = vmatpush3.bf16.msra.mxu1 %v6952_v32  ;;  %v1322_v32 = vrot.slane %v7864_v51, 5  ;;  %v1252_v51 = vld [vmem:[%s7313_s6 + $0x30] sm:$0xe]  ;;  %v5375_v20 = vcombine.low %v7693_v31, %v7702_v48  ;;  %v7989_v25 = vsel %vm7591_vm5, %v1303_v5, %v1304_v24  ;;  %v7997_v63 = vsel %vm7591_vm5, %v5388_v54, %v1315_v13  ;;  %v1254_v13 = vld [vmem:[%s7313_s6 + $0x48] sm:$0xe] }
  0xb3   : > { %6236 = vmatprep.subr.bf16.mxu1 %v6958_v23  ;;  %v5390_v50 = vrot.slane %v1252_v51, 9  ;;  %v1331_v52 = vrot.slane %v1329_v34, 4  ;;  %v3814_v5 = vshrl.u32 %v5746_v10, 16  ;;  %v3827_v51 = vshrl.u32 %v5747_v19, 16  ;;  %v6971_v48 = vld [vmem:[%s7313_s6 + $0x6c] sm:$0xff]  }
  0xb4   : > { %v1324_v42 = vrot.slane %v1322_v32, 4  ;;  %v8009_v24 = vsel %vm7591_vm5, %v5389_v58, %v1322_v32  ;;  %v7038_v32 = vld [vmem:[%s7313_s6 + $0x44] sm:$0x1]  ;;  %v5392_v54 = vrot.slane %v1254_v13, 9  ;;  %v5750_v13 = vld [vmem:[%s7313_s6 + $0x28] sm:$0xf] }
  0xb5   : > { %v8019_v61 = vsel %vm7591_vm5, %v5390_v50, %v1329_v34  ;;  %v1339_v17 = vrot.slane %v7038_v32, 5  ;;  %v5748_v50 = vld [vmem:[%s7313_s6 + $0x20] sm:$0x1]  ;;  %v1256_v32 = vld [vmem:[%s7313_s6 + $0x60] sm:$0xe] }
  0xb6   : > { %6237 = vmatpush3.bf16.msra.mxu1 %v6958_v23  ;;  %v5376_v23 = vcombine.low %v7727_v27, %v7730_v29 }
  0xb7   : > { %6238 = vmatprep.subr.bf16.mxu1 %v6964_v49 }
  0xb8   : > { %6415 = vmatmul.mubr.bf16.gmra.mrb[28].mxu0 %v5665_v53  ;;  %v7037_v53 = vld [vmem:[%s7313_s6 + $0x38] sm:$0x1] }
  0xb9   : > { %6207 = vmatmul.mubr.bf16.gmra.mrb[12].mxu1 %v5369_v4  ;;  %6434 = vmatprep.mubr.bf16.mxu0 %v6950_v22  ;;  %v1332_v45 = vrot.slane %v7037_v53, 5  ;;  %v1253_v4 = vld [vmem:[%s7313_s6 + $0x3c] sm:$0xe]  ;;  %v1336_v22 = vrot.slane %v7890_v30, 5  ;;  %v7985_v30 = vsel %vm7591_vm5, %v5387_v21, %v1308_v7  ;;  %v3817_v21 = vshll.u32 %v5746_v10, 16  ;;  %v6976_v53 = vld [vmem:[%s9181_s1 + $0x1e0] sm:$0xff]  }
  0xba   : > { %6210 = vmatprep.mubr.bf16.mxu1 %v5370_v55  ;;  %6239 = vmatpush3.bf16.msra.mxu1 %v6964_v49  ;;  %v1325_v49 = vrot.slane %v7036_v43, 5  ;;  %v7972_v55 = vrot.slane %v2407_v8, 5  ;;  %v6959_v7 = vld [vmem:[%s7313_s6 + $0x3c] sm:$0xff]   ;;  %v8005_v8 = vsel %vm7591_vm5, %v1317_v46, %v1318_v39  ;;  %v1345_v46 = vrot.slane %v1343_v1, 4  ;;  %v5752_v43 = vld [vmem:[%s7313_s6 + $0x30] sm:$0xf] }
  0xbb   : > { %6240 = vmatprep.subr.bf16.mxu1 %v6970_v56  ;;  %v1346_v39 = vrot.slane %v7039_v38, 5  ;;  %v3816_v10 = vrot.slane %v3814_v5, 4 }
  0xbc   : > { %9204 = vst [vmem:[#allocation8_spill] sm:$0xff] %v7972_v55 }
  0xbe   : > { %6241 = vmatpush3.bf16.msra.mxu1 %v6970_v56  ;;  %v6966_v56 = vld [vmem:[%s9181_s1 + $0x1d0] sm:$0xff]  }
  0xbf   : > { %6274 = vmatprep.subr.bf16.mxu1 %v7938_v60 }
  0xc0   : > { %6435 = vmatmul.mubr.bf16.vlgmr.msra.gmra.mrb[0].mxu0 %v6953_v6  ;;  %v7993_v6 = vsel %vm7591_vm5, %v1310_v33, %v1311_v35  ;;  %v8013_v35 = vsel %vm7591_vm5, %v1324_v42, %v1325_v49  ;;  %v3823_v33 = vshll.u32 %v5747_v19, 16  ;;  %v3819_v19 = vrot.slane %v3817_v21, 5  ;;  %v1257_v21 = vld [vmem:[%s7313_s6 + $0x6c] sm:$0xe] }
  0xc1   : > { %6211 = vmatmul.mubr.bf16.gmra.mrb[16].mxu1 %v5371_v62  ;;  %6467 = vmatpush3.bf16.msra.mxu0 %v7777_v44  ;;  %v5391_v62 = vrot.slane %v1253_v4, 9  ;;  %v5395_v58 = vrot.slane %v1257_v21, 9 }
  0xc2   : > { %6214 = vmatprep.mubr.bf16.mxu1 %v5372_v36  ;;  %6438 = vmatprep.mubr.bf16.mxu0 %v6956_v18  ;;  %v8023_v36 = vsel %vm7591_vm5, %v1331_v52, %v1332_v45  ;;  %v1338_v18 = vrot.slane %v1336_v22, 4  ;;  %v5749_v52 = vld [vmem:[%s7313_s6 + $0x24] sm:$0xf]  ;;  %v3851_v45 = vshrl.u32 %v5750_v13, 16 }
  0xc3   : > { %6468 = vmatprep.subr.bf16.mxu0 %v6960_v47  ;;  %v8040_v49 = vsel %vm7591_vm5, %v5391_v62, %v1336_v22  ;;  %v8057_v22 = vld [vmem:[%s7313_s6 + $0x54] sm:$0xe]  ;;  %v3829_v62 = vrot.slane %v3827_v51, 4  ;;  %v3838_v38 = vshrl.u32 %v5749_v52, 16  ;;  %v3841_v28 = vshll.u32 %v5749_v52, 16 }
  0xc4   : > { %v8054_v4 = vsel %vm7591_vm5, %v1338_v18, %v1339_v17  ;;  %v3833_v17 = vshll.u32 %v5748_v50, 16  ;;  %v5393_v5 = vrot.slane %v8057_v22, 9  ;;  %v6980_v50 = vld [vmem:[%s9181_s1 + $0x1e8] sm:$0xff]   ;;  %v1352_v52 = vrot.slane %v1350_v16, 4 }
  0xc5   : > { %6469 = vmatpush3.bf16.msra.mxu0 %v6960_v47  ;;  %v6972_v47 = vld [vmem:[%s9181_s1 + $0x1d8] sm:$0xff]   ;;  %v3820_v22 = vor.u32 %v3819_v19, %v3816_v10  ;;  %v3840_v34 = vrot.slane %v3838_v38, 4  ;;  %v3843_v44 = vrot.slane %v3841_v28, 5  ;;  %v7044_v10 = vld [vmem:[%s7313_s6 + $0x74] sm:$0x1]  ;;  %v3853_v28 = vrot.slane %v3851_v45, 4 }
  0xc6   : > { %6470 = vmatprep.subr.bf16.mxu0 %v6966_v56  ;;  %v8095_v42 = vrot.slane %v3833_v17, 5  ;;  %v1367_v19 = vrot.slane %v7044_v10, 5  ;;  %v3862_v38 = vshrl.u32 %v5752_v43, 16  ;;  %v8120_v27 = vsel %vm7591_vm5, %v5393_v5, %v1350_v16 }
  0xc7   : > { %v3821_v21 = vrot.slane %v3820_v22, 4 }
  0xc8   : > { %6439 = vmatmul.mubr.bf16.gmra.mrb[4].mxu0 %v6959_v7  ;;  %v8067_v7 = vrot.slane %v3823_v33, 5  ;;  %v7042_v33 = vld [vmem:[%s7313_s6 + $0x70] sm:$0xf] }
  0xc9   : > { %6215 = vmatmul.mubr.bf16.gmra.mrb[20].mxu1 %v5373_v15  ;;  %6442 = vmatprep.mubr.bf16.mxu0 %v6962_v0  ;;  %v1357_v15 = vrot.slane %v8061_v40, 5  ;;  %v7041_v0 = vld [vmem:[%s7313_s6 + $0x5c] sm:$0x1]  ;;  %v1364_v51 = vrot.slane %v7042_v33, 5 }
  0xca   : > { %6218 = vmatprep.mubr.bf16.mxu1 %v5374_v26  ;;  %6471 = vmatpush3.bf16.msra.mxu0 %v6966_v56  ;;  %v1353_v18 = vrot.slane %v7041_v0, 5  ;;  %v8076_v26 = vsel %vm7591_vm5, %v5392_v54, %v1343_v1  ;;  %v8080_v56 = vsel %vm7591_vm5, %v1345_v46, %v1346_v39  ;;  %v7043_v1 = vld [vmem:[%s7313_s6 + $0x68] sm:$0x1]  ;;  %v3847_v0 = vshll.u32 %v5750_v13, 16  ;;  %v6988_v40 = vld [vmem:[%s9181_s1 + $0x1f8] sm:$0xff]  }
  0xcb   : > { %6472 = vmatprep.subr.bf16.mxu0 %v6972_v47  ;;  %v1360_v54 = vrot.slane %v7043_v1, 5  ;;  %v5394_v46 = vrot.slane %v1256_v32, 9  ;;  %v1359_v39 = vrot.slane %v1357_v15, 4  ;;  %v3830_v33 = vor.u32 %v3829_v62, %v8067_v7  ;;  %v5753_v1 = vld [vmem:[%s7313_s6 + $0x34] sm:$0xf] }
  0xcc   : > { %v1366_v32 = vrot.slane %v1364_v51, 4  ;;  %v5751_v62 = vld [vmem:[%s7313_s6 + $0x2c] sm:$0x1]  ;;  %v8107_v17 = vrot.slane %v3847_v0, 5  ;;  %v3871_v13 = vshll.u32 %v5753_v1, 16  ;;  %v3875_v31 = vshrl.u32 %v5753_v1, 16 }
  0xcd   : > { %v3831_v10 = vrot.slane %v3830_v33, 4  ;;  %v8124_v29 = vsel %vm7591_vm5, %v1352_v52, %v1353_v18  ;;  %v8131_v45 = vsel %vm7591_vm5, %v5394_v46, %v1357_v15  ;;  %v8135_v14 = vsel %vm7591_vm5, %v1359_v39, %v1360_v54  ;;  %v1258_v18 = vld [vmem:[%s7313_s6 + $0x78] sm:$0xe] }
  0xce   : > { %6473 = vmatpush3.bf16.msra.mxu0 %v6972_v47  ;;  %v8139_v16 = vsel %vm7591_vm5, %v5395_v58, %v1364_v51  ;;  %v8149_v15 = vsel %vm7591_vm5, %v1366_v32, %v1367_v19  ;;  %v3854_v5 = vor.u32 %v3853_v28, %v8107_v17  ;;  %v3864_v52 = vrot.slane %v3862_v38, 4  ;;  %v5755_v58 = vld [vmem:[%s7313_s6 + $0x3c] sm:$0xf]  ;;  %v5756_v51 = vld [vmem:[%s7313_s6 + $0x40] sm:$0xf] }
  0xcf   : > { %6474 = vmatprep.subr.bf16.mxu0 %v6976_v53  ;;  %v3826_v0 = vsel %vm7345_vm2, %v3821_v21, %v8067_v7  ;;  %v3836_v46 = vsel %vm7345_vm2, %v3831_v10, %v8095_v42  ;;  %v8160_v39 = vrot.slane %v3871_v13, 5  ;;  %v3877_v22 = vrot.slane %v3875_v31, 4  ;;  %v7046_v19 = vld [vmem:[%s7313_s6 + $0x80] sm:$0x1]  ;;  %v8319_v47 = vld [vmem:[%s7313_s6 + $0x68] sm:$0x1] }
  0xd0   : > { %6443 = vmatmul.mubr.bf16.gmra.mrb[8].mxu0 %v6965_v2  ;;  %v3865_v2 = vshll.u32 %v5752_v43, 16  ;;  %v3857_v43 = vshll.u32 %v5751_v62, 16  ;;  %v5396_v32 = vrot.slane %v1258_v18, 9  ;;  %v1259_v62 = vld [vmem:[%s7313_s6 + $0x84] sm:$0xe]  ;;  %v3886_v28 = vshrl.u32 %v5755_v58, 16 }
  0xd1   : > { %6219 = vmatmul.mubr.bf16.gmra.mrb[24].mxu1 %v5375_v20  ;;  %6446 = vmatprep.mubr.bf16.mxu0 %v6968_v3  ;;  %v6984_v20 = vld [vmem:[%s9181_s1 + $0x1f0] sm:$0xff]   ;;  %v7045_v3 = vld [vmem:[%s7313_s6 + $0x7c] sm:$0xf]  ;;  %v3889_v7 = vshll.u32 %v5755_v58, 16  ;;  %v3895_v38 = vshll.u32 %v5756_v51, 16  ;;  %v9205_v42 = vcombine.low %v7750_v41, %v7755_v12  ;;  %v8171_v13 = vrot.slane %v3854_v5, 4 }
  0xd2   : > { %6222 = vmatprep.mubr.bf16.mxu1 %v5376_v23  ;;  %6475 = vmatpush3.bf16.msra.mxu0 %v6976_v53  ;;  %v3844_v23 = vor.u32 %v3843_v44, %v3840_v34  ;;  %v6973_v53 = vld [vmem:[%s7313_s6 + $0x78] sm:$0xff]   ;;  %v1371_v44 = vrot.slane %v7045_v3, 5  ;;  %v3867_v54 = vrot.slane %v3865_v2, 5  ;;  %v8164_v1 = vrot.slane %v3857_v43, 5  ;;  %v8176_v21 = vld [vmem:[%s9181_s1 + $0x200] sm:$0xff]   ;;  %9213 = vst [vmem:[#allocation11_spill] sm:$0xff] %v8319_v47 }
  0xd3   : > { %6476 = vmatprep.subr.bf16.mxu0 %v6980_v50  ;;  %v5754_v34 = vld [vmem:[%s7313_s6 + $0x38] sm:$0x1]  ;;  %v3899_v2 = vshrl.u32 %v5756_v51, 16  ;;  %v6975_v43 = vld [vmem:[%s7313_s6 + $0x84] sm:$0xff]   ;;  %v3878_v12 = vor.u32 %v3877_v22, %v8160_v39  ;;  %v3891_v58 = vrot.slane %v3889_v7, 5  ;;  %v8198_v51 = vrot.slane %v3895_v38, 5 }
  0xd4   : > { %v8162_v33 = vrot.slane %v3844_v23, 4  ;;  %v1373_v10 = vrot.slane %v1371_v44, 4  ;;  %v3868_v31 = vor.u32 %v3867_v54, %v3864_v52  ;;  %v9206_v23 = vcombine.low %v7981_v59, %v7989_v25  ;;  %v7047_v18 = vld [vmem:[%s7313_s6 + $0x88] sm:$0xf]  ;;  %v5757_v5 = vld [vmem:[%s7313_s6 + $0x44] sm:$0x1] }
  0xd5   : > { %v1378_v3 = vrot.slane %v7047_v18, 5  ;;  %v8189_v59 = vcombine.low %v3826_v0, %v3836_v46  ;;  %v5758_v52 = vld [vmem:[%s7313_s6 + $0x48] sm:$0xf]  ;;  %v3888_v54 = vrot.slane %v3886_v28, 4  ;;  %v3901_v22 = vrot.slane %v3899_v2, 4 }
  0xd6   : > { %6477 = vmatpush3.bf16.msra.mxu0 %v6980_v50  ;;  %v1374_v50 = vrot.slane %v7046_v19, 5  ;;  %v6977_v19 = vld [vmem:[%s7313_s6 + $0x90] sm:$0xff]   ;;  %v3850_v0 = vsel %vm7345_vm2, %v8162_v33, %v8107_v17  ;;  %v3869_v46 = vrot.slane %v3868_v31, 4  ;;  %v3860_v28 = vsel %vm7345_vm2, %v8171_v13, %v8164_v1  ;;  %v8220_v33 = vld [vmem:[%s7313_s6 + $0x58] sm:$0xf]  ;;  %v6978_v31 = vld [vmem:[%s9181_s1 + $0xc8] sm:$0xff]  }
  0xd7   : > { %6478 = vmatprep.subr.bf16.mxu0 %v6984_v20  ;;  %v3879_v38 = vrot.slane %v3878_v12, 4  ;;  %v1380_v2 = vrot.slane %v1378_v3, 4  ;;  %v5761_v17 = vld [vmem:[%s7313_s6 + $0x54] sm:$0xf]  ;;  %v3905_v1 = vshll.u32 %v5757_v5, 16  ;;  %v3910_v13 = vshrl.u32 %v5758_v52, 16 }
  0xd8   : > { %6447 = vmatmul.mubr.bf16.gmra.mrb[12].mxu0 %v6971_v48  ;;  %v3881_v48 = vshll.u32 %v5754_v34, 16  ;;  %v8216_v7 = vsel %vm7591_vm5, %v1373_v10, %v1374_v50  ;;  %v3913_v50 = vshll.u32 %v5758_v52, 16  ;;  %v3892_v10 = vor.u32 %v3891_v58, %v3888_v54  ;;  %v6979_v54 = vld [vmem:[%s7313_s6 + $0x9c] sm:$0xff]   ;;  %v7053_v41 = vld [vmem:[%s7313_s6 + $0xac] sm:$0xf] }
  0xd9   : > { %6223 = vmatmul.mubr.bf16.gmra.mrb[28].mxu1 %v9205_v42  ;;  %6450 = vmatprep.mubr.bf16.mxu0 %v6973_v53  ;;  %v5397_v53 = vrot.slane %v1259_v62, 9  ;;  %v7048_v42 = vld [vmem:[%s7313_s6 + $0x8c] sm:$0x1]  ;;  %v3943_v5 = vshll.u32 %v8220_v33, 16  ;;  %v9208_v52 = vcombine.low %v7997_v63, %v8005_v8  ;;  %v8256_v63 = vld [vmem:[%s7313_s6 + $0x50] sm:$0x1] }
  0xda   : > { %6242 = vmatprep.mubr.bf16.mxu1 %v9206_v23  ;;  %6479 = vmatpush3.bf16.msra.mxu0 %v6984_v20  ;;  %v8195_v20 = vsel %vm7591_vm5, %v5396_v32, %v1371_v44  ;;  %v3883_v62 = vrot.slane %v3881_v48, 5  ;;  %v1381_v23 = vrot.slane %v7048_v42, 5  ;;  %v1260_v44 = vld [vmem:[%s7313_s6 + $0x90] sm:$0xe]  ;;  %v8208_v32 = vld [vmem:[%s7313_s6 + $0x4c] sm:$0xf]  ;;  %v3902_v48 = vor.u32 %v3901_v22, %v8198_v51 }
  0xdb   : > { %6480 = vmatprep.subr.bf16.mxu0 %v6988_v40  ;;  %v3919_v12 = vshll.u32 %v8208_v32, 16  ;;  %v3923_v18 = vshrl.u32 %v8208_v32, 16  ;;  %v9207_v42 = vcombine.low %v7985_v30, %v7993_v6  ;;  %v6982_v30 = vld [vmem:[%s9181_s1 + $0xd0] sm:$0xff]   ;;  %v3874_v6 = vsel %vm7345_vm2, %v3869_v46, %v8160_v39  ;;  %v6981_v8 = vld [vmem:[%s7313_s6 + $0xa8] sm:$0xff]   ;;  %v8263_v39 = vld [vmem:[%s7313_s6 + $0x5c] sm:$0x1] }
  0xdc   : > { %v3884_v58 = vsel %vm7345_vm2, %v3879_v38, %v3883_v62  ;;  %v5398_v22 = vrot.slane %v1260_v44, 9  ;;  %v3915_v25 = vrot.slane %v3913_v50, 5  ;;  %9209 = vst [vmem:[#allocation9_spill] sm:$0xff] %v8263_v39  ;;  %v3893_v46 = vrot.slane %v3892_v10, 4 }
  0xdd   : > { %v3903_v62 = vrot.slane %v3902_v48, 4  ;;  %v8265_v38 = vrot.slane %v3919_v12, 5  ;;  %v8267_v34 = vrot.slane %v3943_v5, 5  ;;  %v8272_v50 = vcombine.low %v3850_v0, %v3860_v28  ;;  %v5764_v28 = vld [vmem:[%s7313_s6 + $0x60] sm:$0xf] }
  0xde   : > { %6481 = vmatpush3.bf16.msra.mxu0 %v6988_v40  ;;  %v8228_v40 = vsel %vm7591_vm5, %v5397_v53, %v1378_v3  ;;  %v3934_v53 = vshrl.u32 %v5761_v17, 16  ;;  %v3937_v3 = vshll.u32 %v5761_v17, 16  ;;  %v7049_v17 = vld [vmem:[%s7313_s6 + $0x94] sm:$0xf]  ;;  %v8276_v48 = vcombine.low %v3874_v6, %v3884_v58 }
  0xdf   : > { %6514 = vmatprep.subr.bf16.mxu0 %v8176_v21  ;;  %v3929_v0 = vshll.u32 %v8256_v63, 16  ;;  %v3898_v6 = vsel %vm7345_vm2, %v3893_v46, %v8198_v51  ;;  %v9212_v46 = vcombine.low %v8019_v61, %v8023_v36 }
  0xe0   : > { %6451 = vmatmul.mubr.bf16.gmra.mrb[16].mxu0 %v6975_v43  ;;  %v3947_v43 = vshrl.u32 %v8220_v33, 16  ;;  %v3936_v44 = vrot.slane %v3934_v53, 4  ;;  %v7050_v53 = vld [vmem:[%s7313_s6 + $0x98] sm:$0x1] }
  0xe1   : > { %6243 = vmatmul.mubr.bf16.vlgmr.msra.gmra.mrb[0].mxu1 %v9207_v42  ;;  %6454 = vmatprep.mubr.bf16.mxu0 %v6977_v19  ;;  %v8259_v19 = vrot.slane %v3905_v1, 5  ;;  %v1385_v42 = vrot.slane %v7049_v17, 5  ;;  %v7051_v17 = vld [vmem:[%s7313_s6 + $0xa0] sm:$0xf]  ;;  %v3931_v36 = vrot.slane %v3929_v0, 5 }
  0xe2   : > { %6275 = vmatpush3.bf16.msra.mxu1 %v7938_v60  ;;  %6246 = vmatprep.mubr.bf16.mxu1 %v9208_v52  ;;  %v8253_v60 = vsel %vm7591_vm5, %v1380_v2, %v1381_v23  ;;  %v3912_v52 = vrot.slane %v3910_v13, 4  ;;  %v3925_v23 = vrot.slane %v3923_v18, 4  ;;  %v3939_v2 = vrot.slane %v3937_v3, 5  ;;  %v6986_v13 = vld [vmem:[%s9181_s1 + $0xd8] sm:$0xff]  }
  0xe3   : > { %6276 = vmatprep.subr.bf16.mxu1 %v6978_v31  ;;  %v3949_v1 = vrot.slane %v3947_v43, 4  ;;  %v1261_v18 = vld [vmem:[%s7313_s6 + $0x9c] sm:$0xe]  ;;  %v1388_v3 = vrot.slane %v7050_v53, 5  ;;  %v8289_v43 = vld [vmem:[%s7313_s6 + $0x64] sm:$0xf] }
  0xe4   : > { %v3916_v5 = vor.u32 %v3915_v25, %v3912_v52  ;;  %9210 = vst [vmem:[#allocation10_spill] sm:$0xff] %v8289_v43  ;;  %v3926_v58 = vor.u32 %v3925_v23, %v8265_v38  ;;  %v1392_v12 = vrot.slane %v7051_v17, 5  ;;  %v9211_v25 = vcombine.low %v8009_v24, %v8013_v35  ;;  %v6983_v23 = vld [vmem:[%s7313_s6 + $0xb4] sm:$0xff]   ;;  %v6989_v24 = vld [vmem:[%s9181_s1 + $0xe0] sm:$0xff]   ;;  %v5767_v17 = vld [vmem:[%s7313_s6 + $0x6c] sm:$0xf] }
  0xe5   : > { %v1387_v52 = vrot.slane %v1385_v42, 4  ;;  %v3940_v53 = vor.u32 %v3939_v2, %v3936_v44  ;;  %v3950_v51 = vor.u32 %v3949_v1, %v8267_v34  ;;  %v3958_v35 = vshrl.u32 %v5764_v28, 16  ;;  %v7052_v2 = vld [vmem:[%s7313_s6 + $0xa4] sm:$0x1] }
  0xe6   : > { %6277 = vmatpush3.bf16.msra.mxu1 %v6978_v31  ;;  %v8283_v31 = vsel %vm7591_vm5, %v5398_v22, %v1385_v42  ;;  %v3953_v22 = vshll.u32 %v8263_v39, 16  ;;  %v3971_v42 = vshrl.u32 %v8289_v43, 16  ;;  %v3917_v61 = vrot.slane %v3916_v5, 4  ;;  %v8458_v39 = vld [vmem:[%s7313_s6 + $0x98] sm:$0x1] }
  0xe7   : > { %6278 = vmatprep.subr.bf16.mxu1 %v6982_v30  ;;  %v5399_v44 = vrot.slane %v1261_v18, 9  ;;  %v1395_v1 = vrot.slane %v7052_v2, 5  ;;  %v3941_v5 = vrot.slane %v3940_v53, 4  ;;  %v3951_v18 = vrot.slane %v3950_v51, 4  ;;  %9226 = vst [vmem:[#allocation20_spill] sm:$0xff] %v8458_v39 }
  0xe8   : > { %6455 = vmatmul.mubr.bf16.gmra.mrb[20].mxu0 %v6979_v54  ;;  %v3908_v54 = vsel %vm7345_vm2, %v3903_v62, %v8259_v19  ;;  %v3967_v19 = vshll.u32 %v8289_v43, 16  ;;  %v6985_v62 = vld [vmem:[%s7313_s6 + $0xc0] sm:$0xff]   ;;  %v3955_v10 = vrot.slane %v3953_v22, 5  ;;  %v8325_v43 = vsel %vm7591_vm5, %v1387_v52, %v1388_v3 }
  0xe9   : > { %6247 = vmatmul.mubr.bf16.gmra.mrb[4].mxu1 %v9211_v25  ;;  %6458 = vmatprep.mubr.bf16.mxu0 %v6981_v8  ;;  %v3961_v8 = vshll.u32 %v5764_v28, 16  ;;  %v3927_v25 = vrot.slane %v3926_v58, 4  ;;  %v1399_v28 = vrot.slane %v7053_v41, 5  ;;  %v8321_v55 = vcombine.low %v3898_v6, %v3908_v54  ;;  %v6991_v41 = vld [vmem:[%s9181_s1 + $0xe8] sm:$0xff]  }
  0xea   : > { %6250 = vmatprep.mubr.bf16.mxu1 %v9212_v46  ;;  %6279 = vmatpush3.bf16.msra.mxu1 %v6982_v30  ;;  %v1262_v30 = vld [vmem:[%s7313_s6 + $0xa8] sm:$0xe]  ;;  %v1394_v46 = vrot.slane %v1392_v12, 4  ;;  %v3960_v0 = vrot.slane %v3958_v35, 4  ;;  %v8327_v58 = vrot.slane %v3967_v19, 5  ;;  %v3973_v22 = vrot.slane %v3971_v42, 4 }
  0xeb   : > { %6280 = vmatprep.subr.bf16.mxu1 %v6986_v13  ;;  %v3963_v2 = vrot.slane %v3961_v8, 5  ;;  %v3922_v3 = vsel %vm7345_vm2, %v3917_v61, %v8265_v38  ;;  %v8337_v6 = vsel %vm7591_vm5, %v5399_v44, %v1392_v12  ;;  %v3982_v54 = vshrl.u32 %v5767_v17, 16  ;;  %v7054_v38 = vld [vmem:[%s7313_s6 + $0xb0] sm:$0x1]  ;;  %v1263_v19 = vld [vmem:[%s7313_s6 + $0xb4] sm:$0xe] }
  0xec   : > { %v3985_v52 = vshll.u32 %v5767_v17, 16  ;;  %v3932_v53 = vsel %vm7345_vm2, %v3927_v25, %v3931_v36  ;;  %v8346_v51 = vsel %vm7591_vm5, %v1394_v46, %v1395_v1  ;;  %v5400_v35 = vrot.slane %v1262_v30, 9  ;;  %v8368_v30 = vld [vmem:[%s7313_s6 + $0x74] sm:$0x1]  ;;  %v7055_v25 = vld [vmem:[%s7313_s6 + $0xb8] sm:$0xf] }
  0xed   : > { %v1402_v8 = vrot.slane %v7054_v38, 5  ;;  %v9215_v12 = vcombine.low %v8040_v49, %v8054_v4  ;;  %v3946_v42 = vsel %vm7345_vm2, %v3941_v5, %v8267_v34  ;;  %v3956_v61 = vsel %vm7345_vm2, %v3951_v18, %v3955_v10  ;;  %v6987_v4 = vld [vmem:[%s7313_s6 + $0xcc] sm:$0xff]   ;;  %9217 = vst [vmem:[#allocation13_spill] sm:$0xff] %v8368_v30  ;;  %v5773_v38 = vld [vmem:[%s7313_s6 + $0x84] sm:$0xf] }
  0xee   : > { %6281 = vmatpush3.bf16.msra.mxu1 %v6986_v13  ;;  %v8340_v13 = vld [vmem:[%s7313_s6 + $0x70] sm:$0xf]  ;;  %v1401_v36 = vrot.slane %v1399_v28, 4  ;;  %v3977_v44 = vshll.u32 %v8319_v47, 16  ;;  %v9216_v49 = vcombine.low %v8076_v26, %v8080_v56  ;;  %v3974_v1 = vor.u32 %v3973_v22, %v8327_v58  ;;  %v8385_v22 = vld [vmem:[%s7313_s6 + $0x7c] sm:$0xf] }
  0xef   : > { %6282 = vmatprep.subr.bf16.mxu1 %v6989_v24  ;;  %9214 = vst [vmem:[#allocation12_spill] sm:$0xff] %v8340_v13  ;;  %v3991_v34 = vshll.u32 %v8340_v13, 16  ;;  %v3995_v10 = vshrl.u32 %v8340_v13, 16  ;;  %v5401_v17 = vrot.slane %v1263_v19, 9  ;;  %v1406_v46 = vrot.slane %v7055_v25, 5  ;;  %9218 = vst [vmem:[#allocation14_spill] sm:$0xff] %v8385_v22 }
  0xf0   : > { %6459 = vmatmul.mubr.bf16.gmra.mrb[24].mxu0 %v6983_v23  ;;  %v6993_v23 = vld [vmem:[%s9181_s1 + $0xf0] sm:$0xff]   ;;  %v3984_v26 = vrot.slane %v3982_v54, 4  ;;  %v3987_v56 = vrot.slane %v3985_v52, 5  ;;  %v8376_v18 = vcombine.low %v3922_v3, %v3932_v53  ;;  %v8388_v19 = vcombine.low %v3946_v42, %v3956_v61  ;;  %v7056_v3 = vld [vmem:[%s7313_s6 + $0xbc] sm:$0x1] }
  0xf1   : > { %6251 = vmatmul.mubr.bf16.gmra.mrb[8].mxu1 %v9215_v12  ;;  %6462 = vmatprep.mubr.bf16.mxu0 %v6985_v62  ;;  %v3964_v62 = vor.u32 %v3963_v2, %v3960_v0  ;;  %v8382_v2 = vsel %vm7591_vm5, %v5400_v35, %v1399_v28  ;;  %v8392_v54 = vsel %vm7591_vm5, %v1401_v36, %v1402_v8  ;;  %v8394_v52 = vrot.slane %v3977_v44, 5  ;;  %v6995_v12 = vld [vmem:[%s9181_s1 + $0xf8] sm:$0xff]   ;;  %v8401_v28 = vld [vmem:[%s7313_s6 + $0x88] sm:$0xf] }
  0xf2   : > { %6254 = vmatprep.mubr.bf16.mxu1 %v9216_v49  ;;  %6283 = vmatpush3.bf16.msra.mxu1 %v6989_v24  ;;  %v5770_v24 = vld [vmem:[%s7313_s6 + $0x78] sm:$0xf]  ;;  %v1409_v53 = vrot.slane %v7056_v3, 5  ;;  %9219 = vst [vmem:[#allocation15_spill] sm:$0xff] %v8401_v28  ;;  %v8405_v42 = vrot.slane %v3974_v1, 4  ;;  %v8407_v61 = vrot.slane %v3991_v34, 5  ;;  %v8411_v36 = vsel %vm7591_vm5, %v5401_v17, %v1406_v46 }
  0xf3   : > { %6284 = vmatprep.subr.bf16.mxu1 %v6991_v41  ;;  %v8403_v35 = vrot.slane %v3964_v62, 4  ;;  %v3997_v8 = vrot.slane %v3995_v10, 4  ;;  %v1408_v44 = vrot.slane %v1406_v46, 4  ;;  %v3988_v49 = vor.u32 %v3987_v56, %v3984_v26  ;;  %v5776_v3 = vld [vmem:[%s7313_s6 + $0x90] sm:$0xf] }
  0xf4   : > { %v4001_v25 = vshll.u32 %v8368_v30, 16  ;;  %v4009_v0 = vshll.u32 %v5770_v24, 16  ;;  %v4015_v62 = vshll.u32 %v8385_v22, 16  ;;  %v4019_v1 = vshrl.u32 %v8385_v22, 16  ;;  %v8418_v34 = vld [vmem:[%s7313_s6 + $0x94] sm:$0xf] }
  0xf5   : > { %9220 = vst [vmem:[#allocation16_spill] sm:$0xff] %v8418_v34  ;;  %v9221_v10 = vcombine.low %v8120_v27, %v8124_v29  ;;  %v4030_v17 = vshrl.u32 %v5773_v38, 16  ;;  %v4033_v46 = vshll.u32 %v5773_v38, 16  ;;  %v4043_v26 = vshrl.u32 %v8401_v28, 16  ;;  %v5779_v38 = vld [vmem:[%s7313_s6 + $0x9c] sm:$0xf] }
  0xf6   : > { %6285 = vmatpush3.bf16.msra.mxu1 %v6991_v41  ;;  %v4006_v41 = vshrl.u32 %v5770_v24, 16  ;;  %v9222_v56 = vcombine.low %v8131_v45, %v8135_v14  ;;  %v3998_v29 = vor.u32 %v3997_v8, %v8407_v61  ;;  %v4057_v24 = vshll.u32 %v5776_v3, 16  ;;  %v8440_v45 = vld [vmem:[%s7313_s6 + $0x80] sm:$0x1] }
  0xf7   : > { %6286 = vmatprep.subr.bf16.mxu1 %v6993_v23  ;;  %v8437_v5 = vrot.slane %v4001_v25, 5  ;;  %9223 = vst [vmem:[#allocation17_spill] sm:$0xff] %v8440_v45  ;;  %v4063_v14 = vshll.u32 %v8418_v34, 16  ;;  %v4011_v27 = vrot.slane %v4009_v0, 5  ;;  %v4021_v8 = vrot.slane %v4019_v1, 4 }
  0xf8   : > { %6463 = vmatmul.mubr.bf16.gmra.mrb[28].mxu0 %v6987_v4  ;;  %v4039_v4 = vshll.u32 %v8401_v28, 16  ;;  %v8444_v28 = vrot.slane %v4015_v62, 5  ;;  %v8450_v22 = vld [vmem:[%s7313_s6 + $0xa0] sm:$0xf]  ;;  %v4032_v25 = vrot.slane %v4030_v17, 4  ;;  %v4035_v30 = vrot.slane %v4033_v46, 5 }
  0xf9   : > { %6255 = vmatmul.mubr.bf16.gmra.mrb[12].mxu1 %v9221_v10  ;;  %6482 = vmatprep.mubr.bf16.mxu0 %v8189_v59  ;;  %v4054_v59 = vshrl.u32 %v5776_v3, 16  ;;  %v8435_v10 = vrot.slane %v3988_v49, 4  ;;  %v8447_v3 = vld [vmem:[%s7313_s6 + $0x8c] sm:$0x1]  ;;  %9225 = vst [vmem:[#allocation19_spill] sm:$0xff] %v8450_v22  ;;  %v4045_v47 = vrot.slane %v4043_v26, 4  ;;  %v8467_v62 = vsel %vm7591_vm5, %v1408_v44, %v1409_v53 }
  0xfa   : > { %6258 = vmatprep.mubr.bf16.mxu1 %v9222_v56  ;;  %6287 = vmatpush3.bf16.msra.mxu1 %v6993_v23  ;;  %v4067_v23 = vshrl.u32 %v8418_v34, 16  ;;  %v4008_v56 = vrot.slane %v4006_v41, 4  ;;  %9224 = vst [vmem:[#allocation18_spill] sm:$0xff] %v8447_v3  ;;  %v6992_v49 = vld [vmem:[%s9181_s1 + $0x208] sm:$0xff]   ;;  %v8455_v13 = vrot.slane %v4039_v4, 5  ;;  %v4059_v34 = vrot.slane %v4057_v24, 5 }
  0xfb   : > { %6288 = vmatprep.subr.bf16.mxu1 %v6995_v12  ;;  %v5782_v41 = vld [vmem:[%s7313_s6 + $0xa8] sm:$0xf]  ;;  %v4056_v1 = vrot.slane %v4054_v59, 4  ;;  %v8472_v17 = vld [vmem:[%s9181_s1 + $0x100] sm:$0xff]   ;;  %v8475_v46 = vrot.slane %v4063_v14, 5  ;;  %v4078_v26 = vshrl.u32 %v5779_v38, 16  ;;  %v9228_v24 = vcombine.low %v8139_v16, %v8149_v15 }
  0xfc   : > { %9227 = vst [vmem:[#allocation21_spill] sm:$0xff] %v8472_v17  ;;  %v4069_v4 = vrot.slane %v4067_v23, 4  ;;  %v4081_v0 = vshll.u32 %v5779_v38, 16  ;;  %v8478_v53 = vrot.slane %v3998_v29, 4  ;;  %v4087_v44 = vshll.u32 %v8450_v22, 16  ;;  %v6994_v16 = vld [vmem:[%s9181_s1 + $0x210] sm:$0xff]  }
  0xfd   : > { %v4091_v59 = vshrl.u32 %v8450_v22, 16  ;;  %v4012_v14 = vor.u32 %v4011_v27, %v4008_v56  ;;  %v4022_v38 = vor.u32 %v4021_v8, %v8444_v28  ;;  %v4036_v23 = vor.u32 %v4035_v30, %v4032_v25  ;;  %v8490_v29 = vld [vmem:[%s7313_s6 + $0xac] sm:$0xf]  ;;  %v8503_v25 = vld [vmem:[%s7313_s6 + $0xa4] sm:$0x1] }
  0xfe   : > { %6289 = vmatpush3.bf16.msra.mxu1 %v6995_v12  ;;  %v4025_v12 = vshll.u32 %v8440_v45, 16  ;;  %9229 = vst [vmem:[#allocation22_spill] sm:$0xff] %v8490_v29  ;;  %v4046_v15 = vor.u32 %v4045_v47, %v8455_v13  ;;  %v4102_v27 = vshrl.u32 %v5782_v41, 16  ;;  %v4105_v30 = vshll.u32 %v5782_v41, 16 }
  0xff   : > { %6562 = vmatprep.subr.bf16.mxu1 %v8472_v17  ;;  %v9230_v17 = vcombine.low %v8195_v20, %v8216_v7  ;;  %v4060_v56 = vor.u32 %v4059_v34, %v4056_v1  ;;  %v4070_v8 = vor.u32 %v4069_v4, %v8475_v46  ;;  %v4080_v20 = vrot.slane %v4078_v26, 4 }
 0x100   : > { %6483 = vmatmul.mubr.bf16.vlgmr.msra.gmra.mrb[0].mxu0 %v8272_v50  ;;  %v4049_v50 = vshll.u32 %v8447_v3, 16  ;;  %v4083_v7 = vrot.slane %v4081_v0, 5  ;;  %v4115_v22 = vshrl.u32 %v8490_v29, 16  ;;  %v4013_v47 = vrot.slane %v4012_v14, 4  ;;  %v6996_v0 = vld [vmem:[%s9181_s1 + $0x218] sm:$0xff]  }
 0x101   : > { %6259 = vmatmul.mubr.bf16.gmra.mrb[16].mxu1 %v9228_v24  ;;  %6515 = vmatpush3.bf16.msra.mxu0 %v8176_v21  ;;  %v4073_v21 = vshll.u32 %v8458_v39, 16  ;;  %v4111_v24 = vshll.u32 %v8490_v29, 16  ;;  %v4023_v39 = vrot.slane %v4022_v38, 4  ;;  %v4027_v3 = vrot.slane %v4025_v12, 5 }
 0x102   : > { %6262 = vmatprep.mubr.bf16.mxu1 %v9230_v17  ;;  %6486 = vmatprep.mubr.bf16.mxu0 %v8276_v48  ;;  %v8505_v17 = vrot.slane %v4087_v44, 5  ;;  %v4093_v48 = vrot.slane %v4091_v59, 4  ;;  %v4051_v41 = vrot.slane %v4049_v50, 5  ;;  %v4037_v34 = vrot.slane %v4036_v23, 4 }
 0x103   : > { %6516 = vmatprep.subr.bf16.mxu0 %v6992_v49  ;;  %v4047_v1 = vrot.slane %v4046_v15, 4  ;;  %v4104_v4 = vrot.slane %v4102_v27, 4  ;;  %v4107_v45 = vrot.slane %v4105_v30, 5  ;;  %v4061_v26 = vrot.slane %v4060_v56, 4  ;;  %v8571_v27 = vld [vmem:[%s7313_s6 + $0xbc] sm:$0x1] }
 0x104   : > { %v4075_v44 = vrot.slane %v4073_v21, 5  ;;  %v4084_v59 = vor.u32 %v4083_v7, %v4080_v20  ;;  %v4097_v29 = vshll.u32 %v8503_v25, 16  ;;  %v4094_v12 = vor.u32 %v4093_v48, %v8505_v17  ;;  %v8538_v21 = vld [vmem:[%s7313_s6 + $0xb0] sm:$0x1] }
 0x105   : > { %6517 = vmatpush3.bf16.msra.mxu0 %v6992_v49  ;;  %v4071_v49 = vrot.slane %v4070_v8, 4  ;;  %v8515_v14 = vrot.slane %v4111_v24, 5  ;;  %v4117_v38 = vrot.slane %v4115_v22, 4  ;;  %v9231_v23 = vor.u32 %v7923_v57, %v7921_v11 }
 0x106   : > { %6518 = vmatprep.subr.bf16.mxu0 %v6994_v16  ;;  %v9232_v15 = vcombine.low %v8228_v40, %v8253_v60  ;;  %v4004_v22 = vsel %vm7345_vm2, %v8478_v53, %v8437_v5  ;;  %v4018_v57 = vsel %vm7345_vm2, %v4013_v47, %v8444_v28  ;;  %v9233_v40 = vcombine.low %v8283_v31, %v8325_v43  ;;  %v6999_v31 = vld [vmem:[%s9181_s1 + $0x220] sm:$0xff]  }
 0x107   : > { %v8520_v50 = vrot.slane %v9231_v23, 4  ;;  %v4028_v60 = vsel %vm7345_vm2, %v4023_v39, %v4027_v3  ;;  %v4108_v5 = vor.u32 %v4107_v45, %v4104_v4  ;;  %v4052_v28 = vsel %vm7345_vm2, %v4047_v1, %v4051_v41  ;;  %v5838_v41 = vld [vmem:[%s7313_s6 + $0x48] sm:$0xe] }
 0x108   : > { %6487 = vmatmul.mubr.bf16.gmra.mrb[4].mxu0 %v8321_v55  ;;  %v3994_v55 = vsel %vm7345_vm2, %v8435_v10, %v8407_v61  ;;  %v5785_v61 = vld [vmem:[%s7313_s6 + $0xb4] sm:$0xf]  ;;  %v8550_v10 = vld [vmem:[%s7313_s6 + $0xb8] sm:$0xf]  ;;  %v4066_v39 = vsel %vm7345_vm2, %v4061_v26, %v8475_v46  ;;  %v8560_v43 = vrot.slane %v4084_v59, 4  ;;  %v8562_v3 = vrot.slane %v4097_v29, 5 }
 0x109   : > { %6263 = vmatmul.mubr.bf16.gmra.mrb[20].mxu1 %v9232_v15  ;;  %6490 = vmatprep.mubr.bf16.mxu0 %v8376_v18  ;;  %v4042_v18 = vsel %vm7345_vm2, %v4037_v34, %v8455_v13  ;;  %v4076_v13 = vsel %vm7345_vm2, %v4071_v49, %v4075_v44  ;;  %v8566_v45 = vrot.slane %v4094_v12, 4  ;;  %v4118_v53 = vor.u32 %v4117_v38, %v8515_v14  ;;  %v5839_v26 = vld [vmem:[%s7313_s6 + $0x54] sm:$0xe] }
 0x10a   : > { %6266 = vmatprep.mubr.bf16.mxu1 %v9233_v40  ;;  %6519 = vmatpush3.bf16.msra.mxu0 %v6994_v16  ;;  %v4121_v16 = vshll.u32 %v8538_v21, 16  ;;  %v9234_v46 = vsel %vm7345_vm2, %v8405_v42, %v8394_v52  ;;  %v9235_v29 = vsel %vm7345_vm2, %v8403_v35, %v8327_v58  ;;  %v4126_v56 = vshrl.u32 %v5785_v61, 16 }
 0x10b   : > { %6520 = vmatprep.subr.bf16.mxu0 %v6996_v0  ;;  %v5816_v30 = vcombine.low %v9235_v29, %v9234_v46  ;;  %v4129_v8 = vshll.u32 %v5785_v61, 16  ;;  %v4135_v20 = vshll.u32 %v8550_v10, 16  ;;  %v5432_v7 = vcombine.low %v8382_v2, %v8392_v54  ;;  %v7002_v2 = vld [vmem:[%s9181_s1 + $0x228] sm:$0xff]   ;;  %v5788_v54 = vld [vmem:[%s7313_s6 + $0xc0] sm:$0xf] }
 0x10c   : > { %v5433_v48 = vcombine.low %v8411_v36, %v8467_v62  ;;  %v5817_v24 = vcombine.low %v3994_v55, %v4004_v22  ;;  %v8588_v52 = vrot.slane %v4108_v5, 4  ;;  %v5818_v42 = vcombine.low %v4018_v57, %v4028_v60  ;;  %v9239_v29 = vld [vmem:[#allocation11_spill] sm:$0xff] }
 0x10d   : > { %v8590_v58 = vcombine.low %v4042_v18, %v4052_v28  ;;  %v8592_v35 = vcombine.low %v4066_v39, %v4076_v13  ;;  %v4090_v47 = vsel %vm7345_vm2, %v8560_v43, %v8505_v17  ;;  %v4100_v34 = vsel %vm7345_vm2, %v8566_v45, %v8562_v3  ;;  %v5841_v28 = vld [vmem:[%s7313_s6 + $0x6c] sm:$0xe]  ;;  %v9237_v39 = vld [vmem:[#allocation9_spill] sm:$0xff] }
 0x10e   : > { %6521 = vmatpush3.bf16.msra.mxu0 %v6996_v0  ;;  %v8608_v1 = vrot.slane %v4118_v53, 4  ;;  %v8610_v4 = vrot.slane %v4121_v16, 5  ;;  %v4139_v0 = vshrl.u32 %v8550_v10, 16  ;;  %v9236_v44 = vcombine.low %v8337_v6, %v8346_v51  ;;  %v7005_v6 = vld [vmem:[%s9181_s1 + $0x230] sm:$0xff]   ;;  %v8632_v51 = vld [vmem:[%s7313_s6 + $0xc4] sm:$0xf] }
 0x10f   : > { %6522 = vmatprep.subr.bf16.mxu0 %v6999_v31  ;;  %v8617_v59 = vrot.slane %v4126_v56, 4  ;;  %v8621_v49 = vrot.slane %v4135_v20, 5  ;;  %v4145_v12 = vshll.u32 %v8571_v27, 16  ;;  %v4114_v38 = vsel %vm7345_vm2, %v8588_v52, %v8515_v14  ;;  %v5840_v14 = vld [vmem:[%s7313_s6 + $0x60] sm:$0xe]  ;;  %v6997_v13 = vld [vmem:[%s7313_s6 + $0xc] sm:$0xff]  }
 0x110   : > { %6491 = vmatmul.mubr.bf16.gmra.mrb[8].mxu0 %v8388_v19  ;;  %v8619_v19 = vrot.slane %v4129_v8, 5  ;;  %v4150_v23 = vshrl.u32 %v5788_v54, 16  ;;  %v5854_v15 = vrot.slane %v5838_v41, 9  ;;  %v4613_v55 = vrot.slane %v8208_v32, 5  ;;  %v9238_v16 = vld [vmem:[#allocation10_spill] sm:$0xff]  ;;  %v7008_v56 = vld [vmem:[%s9181_s1 + $0x238] sm:$0xff]  }
 0x111   : > { %6267 = vmatmul.mubr.bf16.gmra.mrb[24].mxu1 %v9236_v44  ;;  %6494 = vmatprep.mubr.bf16.mxu0 %v5816_v30  ;;  %v4153_v22 = vshll.u32 %v5788_v54, 16  ;;  %v4616_v57 = vrot.slane %v8256_v63, 5  ;;  %v5855_v40 = vrot.slane %v5839_v26, 9  ;;  %v4620_v60 = vrot.slane %v8220_v33, 5  ;;  %v9240_v52 = vld [vmem:[#allocation12_spill] sm:$0xff] }
 0x112   : > { %6270 = vmatprep.mubr.bf16.mxu1 %v5432_v7  ;;  %6523 = vmatpush3.bf16.msra.mxu0 %v6999_v31  ;;  %v4124_v18 = vsel %vm7345_vm2, %v8608_v1, %v8610_v4  ;;  %v8642_v5 = vrot.slane %v4139_v0, 4  ;;  %v8646_v61 = vsel %vm7591_vm5, %v5854_v15, %v4613_v55  ;;  %v4615_v32 = vrot.slane %v4613_v55, 4  ;;  %v9241_v4 = vld [vmem:[#allocation13_spill] sm:$0xff]  ;;  %v8683_v26 = vld [vmem:[%s7313_s6 + $0xc8] sm:$0x1] }
 0x113   : > { %6524 = vmatprep.subr.bf16.mxu0 %v7002_v2  ;;  %v4159_v31 = vshll.u32 %v8632_v51, 16  ;;  %v8652_v63 = vsel %vm7591_vm5, %v5855_v40, %v4620_v60  ;;  %v4622_v33 = vrot.slane %v4620_v60, 4  ;;  %v4623_v3 = vrot.slane %v9237_v39, 5  ;;  %v6998_v40 = vld [vmem:[%s7313_s6 + $0x18] sm:$0xff]   ;;  %v7000_v39 = vld [vmem:[%s7313_s6 + $0x24] sm:$0xff]  }
 0x114   : > { %v8658_v45 = vsel %vm7591_vm5, %v4615_v32, %v4616_v57  ;;  %v5856_v53 = vrot.slane %v5840_v14, 9  ;;  %v4627_v46 = vrot.slane %v9238_v16, 5  ;;  %v4630_v30 = vrot.slane %v9239_v29, 5 }
 0x115   : > { %v5886_v8 = vcombine.low %v8646_v61, %v8658_v45  ;;  %v8669_v20 = vsel %vm7591_vm5, %v4622_v33, %v4623_v3  ;;  %v5857_v7 = vrot.slane %v5841_v28, 9  ;;  %v4637_v0 = vrot.slane %v9241_v4, 5  ;;  %v9243_v28 = vld [vmem:[#allocation17_spill] sm:$0xff]  ;;  %v5547_v61 = vld [vmem:[%s7313_s6 + $0x90] sm:$0xf]  ;;  %v7014_v45 = vld [vmem:[%s7313_s6 + $0xa8] sm:$0xff]  }
 0x116   : > { %6525 = vmatpush3.bf16.msra.mxu0 %v7002_v2  ;;  %v4634_v2 = vrot.slane %v9240_v52, 5  ;;  %v5887_v54 = vcombine.low %v8652_v63, %v8669_v20  ;;  %v8676_v41 = vsel %vm7591_vm5, %v5856_v53, %v4627_v46  ;;  %v4629_v1 = vrot.slane %v4627_v46, 4  ;;  %v9244_v53 = vld [vmem:[#allocation8_spill] sm:$0xff]  ;;  %v7078_v63 = vld [vmem:[%s7313_s6 + $0x8c] sm:$0x1] }
 0x117   : > { %6526 = vmatprep.subr.bf16.mxu0 %v7005_v6  ;;  %v8685_v44 = vrot.slane %v4150_v23, 4  ;;  %v8698_v36 = vcombine.low %v4090_v47, %v4100_v34  ;;  %v4132_v62 = vor.u32 %v8619_v19, %v8617_v59  ;;  %v5842_v23 = vld [vmem:[%s7313_s6 + $0x78] sm:$0xe]  ;;  %v8710_v57 = vrot.slane %v4145_v12, 5  ;;  %v5791_v12 = vld [vmem:[%s7313_s6 + $0xcc] sm:$0xf] }
 0x118   : > { %6495 = vmatmul.mubr.bf16.gmra.mrb[12].mxu0 %v5817_v24  ;;  %v8687_v24 = vrot.slane %v4153_v22, 5  ;;  %v8691_v15 = vsel %vm7591_vm5, %v5857_v7, %v4634_v2  ;;  %v4636_v55 = vrot.slane %v4634_v2, 4  ;;  %v8708_v22 = vcombine.low %v4114_v38, %v4124_v18  ;;  %v5541_v47 = vld [vmem:[%s7313_s6 + $0x78] sm:$0xf]  ;;  %v9242_v18 = vld [vmem:[#allocation14_spill] sm:$0xff] }
 0x119   : > { %6271 = vmatmul.mubr.bf16.gmra.mrb[28].mxu1 %v5433_v48  ;;  %6498 = vmatprep.mubr.bf16.mxu0 %v5818_v42  ;;  %v4163_v48 = vshrl.u32 %v8632_v51, 16  ;;  %v8705_v42 = vsel %vm7591_vm5, %v4629_v1, %v4630_v30  ;;  %v4142_v34 = vor.u32 %v8642_v5, %v8621_v49  ;;  %v8721_v59 = vrot.slane %v4159_v31, 5  ;;  %v8735_v31 = vld [vmem:[%s7313_s6 + $0xd0] sm:$0xf]  ;;  %v9245_v1 = vld [vmem:[#allocation15_spill] sm:$0xff] }
 0x11a   : > { %6290 = vmatprep.mubr.bf16.mxu1 %v6997_v13  ;;  %6527 = vmatpush3.bf16.msra.mxu0 %v7005_v6  ;;  %v5888_v17 = vcombine.low %v8676_v41, %v8705_v42  ;;  %v8716_v43 = vsel %vm7591_vm5, %v4636_v55, %v4637_v0  ;;  %v4169_v19 = vshll.u32 %v8683_v26, 16  ;;  %v5843_v6 = vld [vmem:[%s7313_s6 + $0x84] sm:$0xe]  ;;  %v4156_v60 = vor.u32 %v8687_v24, %v8685_v44 }
 0x11b   : > { %6528 = vmatprep.subr.bf16.mxu0 %v7008_v56  ;;  %v5889_v38 = vcombine.low %v8691_v15, %v8716_v43  ;;  %v5858_v14 = vrot.slane %v5842_v23, 9  ;;  %v4641_v32 = vrot.slane %v9242_v18, 5  ;;  %v4644_v33 = vrot.slane %v9243_v28, 5  ;;  %v9246_v24 = vld [vmem:[#allocation18_spill] sm:$0xff] }
 0x11c   : > { %v4165_v5 = vrot.slane %v4163_v48, 4  ;;  %v2388_v3 = vshrl.u32 %v5541_v47, 16  ;;  %v2391_v13 = vshll.u32 %v5541_v47, 16  ;;  %v2410_v16 = vsel %vm7345_vm2, %v8520_v50, %v9244_v53 }
 0x11d   : > { %v4174_v46 = vshrl.u32 %v5791_v12, 16  ;;  %v8743_v29 = vsel %vm7591_vm5, %v5858_v14, %v4641_v32  ;;  %v4643_v30 = vrot.slane %v4641_v32, 4  ;;  %v5859_v7 = vrot.slane %v5843_v6, 9  ;;  %v7058_v6 = vld [vmem:[%s9181_s1 + $0x108] sm:$0xff]  }
 0x11e   : > { %6529 = vmatpush3.bf16.msra.mxu0 %v7008_v56  ;;  %v4177_v52 = vshll.u32 %v5791_v12, 16  ;;  %v2390_v2 = vrot.slane %v2388_v3, 4  ;;  %v2393_v56 = vrot.slane %v2391_v13, 5  ;;  %v4648_v4 = vrot.slane %v9245_v1, 5  ;;  %v5844_v12 = vld [vmem:[%s7313_s6 + $0x90] sm:$0xe] }
 0x11f   : > { %v4183_v50 = vshll.u32 %v8735_v31, 16  ;;  %v4187_v0 = vshrl.u32 %v8735_v31, 16  ;;  %v8752_v44 = vsel %vm7591_vm5, %v4643_v30, %v4644_v33  ;;  %v4651_v55 = vrot.slane %v9246_v24, 5  ;;  %v7001_v3 = vld [vmem:[%s7313_s6 + $0x30] sm:$0xff]  }
 0x120   : > { %6499 = vmatmul.mubr.bf16.gmra.mrb[16].mxu0 %v8590_v58  ;;  %v9247_v58 = vld [vmem:[#allocation21_spill] sm:$0xff]  ;;  %v4166_v48 = vor.u32 %v4165_v5, %v8721_v59  ;;  %v2394_v23 = vor.u32 %v2393_v56, %v2390_v2  ;;  %v4650_v47 = vrot.slane %v4648_v4, 4  ;;  %v4143_v14 = vrot.slane %v4142_v34, 4  ;;  %v8773_v13 = vld [vmem:[%s7313_s6 + $0xd4] sm:$0x1] }
 0x121   : > { %6291 = vmatmul.mubr.bf16.vlgmr.msra.gmra.mrb[0].mxu1 %v6998_v40  ;;  %6502 = vmatprep.mubr.bf16.mxu0 %v8592_v35  ;;  %v5890_v35 = vcombine.low %v8743_v29, %v8752_v44  ;;  %v4133_v40 = vrot.slane %v4132_v62, 4  ;;  %v4171_v18 = vrot.slane %v4169_v19, 5  ;;  %v8765_v32 = vsel %vm7591_vm5, %v5859_v7, %v4648_v4  ;;  %v7003_v19 = vld [vmem:[%s7313_s6 + $0x3c] sm:$0xff]   ;;  %v9248_v2 = vld [vmem:[#allocation16_spill] sm:$0xff] }
 0x122   : > { %6570 = vmatpush3.bf16.msra.mxu1 %v9247_v58  ;;  %6294 = vmatprep.mubr.bf16.mxu1 %v7000_v39  ;;  %v4176_v28 = vrot.slane %v4174_v46, 4  ;;  %v4179_v33 = vrot.slane %v4177_v52, 5  ;;  %v2395_v39 = vrot.slane %v2394_v23, 4  ;;  %v8769_v5 = vsel %vm7591_vm5, %v4650_v47, %v4651_v55  ;;  %v7059_v1 = vld [vmem:[%s9181_s1 + $0x110] sm:$0xff]   ;;  %v7060_v47 = vld [vmem:[%s7313_s6 + $0x1c] sm:$0xf] }
 0x123   : > { %6563 = vmatprep.subr.bf16.mxu1 %v7058_v6  ;;  %v8775_v53 = vrot.slane %v4183_v50, 5  ;;  %v4189_v30 = vrot.slane %v4187_v0, 4  ;;  %v5891_v62 = vcombine.low %v8765_v32, %v8769_v5  ;;  %v5860_v34 = vrot.slane %v5844_v12, 9 }
 0x124   : > { %v4157_v7 = vrot.slane %v4156_v60, 4  ;;  %v4167_v46 = vrot.slane %v4166_v48, 4  ;;  %v2400_v52 = vsel %vm7345_vm2, %v2395_v39, %v7921_v11  ;;  %v4655_v56 = vrot.slane %v9248_v2, 5  ;;  %v9249_v11 = vld [vmem:[#allocation20_spill] sm:$0xff]  ;;  %v7004_v39 = vld [vmem:[%s7313_s6 + $0x48] sm:$0xff]  }
 0x125   : > { %v4138_v4 = vsel %vm7345_vm2, %v4133_v40, %v8621_v49  ;;  %v4148_v60 = vsel %vm7345_vm2, %v4143_v14, %v8710_v57  ;;  %v8793_v50 = vcombine.low %v2400_v52, %v2410_v16  ;;  %v4658_v0 = vrot.slane %v9249_v11, 5  ;;  %v5834_v57 = vld [vmem:[%s7313_s6 + $0x18] sm:$0xe]  ;;  %v5845_v16 = vld [vmem:[%s7313_s6 + $0x9c] sm:$0xe] }
 0x126   : > { %6571 = vmatpush3.bf16.msra.mxu1 %v7058_v6  ;;  %v4180_v24 = vor.u32 %v4179_v33, %v4176_v28  ;;  %v4193_v55 = vshll.u32 %v8773_v13, 16  ;;  %v8800_v58 = vsel %vm7591_vm5, %v5860_v34, %v4655_v56  ;;  %v4657_v48 = vrot.slane %v4655_v56, 4  ;;  %v7061_v40 = vld [vmem:[%s9181_s1 + $0x118] sm:$0xff]   ;;  %v9250_v34 = vld [vmem:[#allocation19_spill] sm:$0xff]  ;;  %v7062_v2 = vld [vmem:[%s7313_s6 + $0x20] sm:$0x1] }
 0x127   : > { %6564 = vmatprep.subr.bf16.mxu1 %v7059_v1  ;;  %v4190_v49 = vor.u32 %v4189_v30, %v8775_v53  ;;  %v4172_v23 = vsel %vm7345_vm2, %v4167_v46, %v4171_v18  ;;  %v4585_v12 = vrot.slane %v7060_v47, 5  ;;  %v5823_v6 = vcombine.low %v4138_v4, %v4148_v60  ;;  %v7006_v46 = vld [vmem:[%s7313_s6 + $0x54] sm:$0xff]   ;;  %v5846_v11 = vld [vmem:[%s7313_s6 + $0xa8] sm:$0xe] }
 0x128   : > { %6503 = vmatmul.mubr.bf16.gmra.mrb[20].mxu0 %v8698_v36  ;;  %v4162_v36 = vsel %vm7345_vm2, %v4157_v7, %v8721_v59  ;;  %v4181_v14 = vrot.slane %v4180_v24, 4  ;;  %v4195_v28 = vrot.slane %v4193_v55, 5  ;;  %v5850_v18 = vrot.slane %v5834_v57, 9  ;;  %v5835_v55 = vld [vmem:[%s7313_s6 + $0x24] sm:$0xe] }
 0x129   : > { %6295 = vmatmul.mubr.bf16.gmra.mrb[4].mxu1 %v7001_v3  ;;  %6506 = vmatprep.mubr.bf16.mxu0 %v8708_v22  ;;  %v8814_v22 = vsel %vm7591_vm5, %v4657_v48, %v4658_v0  ;;  %v5861_v33 = vrot.slane %v5845_v16, 9  ;;  %v5824_v3 = vcombine.low %v4162_v36, %v4172_v23  ;;  %v4191_v30 = vrot.slane %v4190_v49, 4  ;;  %v7064_v48 = vld [vmem:[%s7313_s6 + $0x28] sm:$0xf]  ;;  %v7065_v36 = vld [vmem:[%s7313_s6 + $0x34] sm:$0xf] }
 0x12a   : > { %6298 = vmatprep.mubr.bf16.mxu1 %v7003_v19  ;;  %6572 = vmatpush3.bf16.msra.mxu1 %v7059_v1  ;;  %v5892_v59 = vcombine.low %v8800_v58, %v8814_v22  ;;  %v4662_v19 = vrot.slane %v9250_v34, 5  ;;  %v4665_v7 = vrot.slane %v8503_v25, 5  ;;  %v4587_v52 = vrot.slane %v4585_v12, 4  ;;  %v7063_v1 = vld [vmem:[%s9181_s1 + $0x120] sm:$0xff]  }
 0x12b   : > { %6565 = vmatprep.subr.bf16.mxu1 %v7061_v40  ;;  %v4588_v56 = vrot.slane %v7062_v2, 5  ;;  %v4586_v25 = vsel %vm7591_vm5, %v5850_v18, %v4585_v12  ;;  %v4186_v0 = vsel %vm7345_vm2, %v4181_v14, %v8775_v53  ;;  %v4196_v24 = vsel %vm7345_vm2, %v4191_v30, %v4195_v28  ;;  %v5836_v12 = vld [vmem:[%s7313_s6 + $0x30] sm:$0xe]  ;;  %v7007_v30 = vld [vmem:[%s7313_s6 + $0x60] sm:$0xff]  }
 0x12c   : > { %v8831_v4 = vsel %vm7591_vm5, %v5861_v33, %v4662_v19  ;;  %v4664_v60 = vrot.slane %v4662_v19, 4  ;;  %v4592_v49 = vrot.slane %v7064_v48, 5  ;;  %v4599_v23 = vrot.slane %v7065_v36, 5  ;;  %v7067_v33 = vld [vmem:[%s7313_s6 + $0x2c] sm:$0x1] }
 0x12d   : > { %v4589_v16 = vsel %vm7591_vm5, %v4587_v52, %v4588_v56  ;;  %v5862_v47 = vrot.slane %v5846_v11, 9  ;;  %v5825_v28 = vcombine.low %v4186_v0, %v4196_v24  ;;  %v5851_v18 = vrot.slane %v5835_v55, 9  ;;  %v7009_v52 = vld [vmem:[%s7313_s6 + $0x6c] sm:$0xff]   ;;  %v5847_v11 = vld [vmem:[%s7313_s6 + $0xb4] sm:$0xe] }
 0x12e   : > { %6573 = vmatpush3.bf16.msra.mxu1 %v7061_v40  ;;  %v8845_v57 = vsel %vm7591_vm5, %v4664_v60, %v4665_v7  ;;  %v9251_v40 = vld [vmem:[#allocation22_spill] sm:$0xff]  ;;  %v5882_v34 = vcombine.low %v4586_v25, %v4589_v16  ;;  %v4594_v19 = vrot.slane %v4592_v49, 4  ;;  %v5852_v2 = vrot.slane %v5836_v12, 9  ;;  %v5837_v0 = vld [vmem:[%s7313_s6 + $0x3c] sm:$0xe] }
 0x12f   : > { %6566 = vmatprep.subr.bf16.mxu1 %v7063_v1  ;;  %v5893_v53 = vcombine.low %v8831_v4, %v8845_v57  ;;  %v4669_v14 = vrot.slane %v9251_v40, 5  ;;  %v4601_v56 = vrot.slane %v4599_v23, 4  ;;  %v7069_v24 = vld [vmem:[%s7313_s6 + $0x40] sm:$0xf]  ;;  %v4593_v48 = vsel %vm7591_vm5, %v5851_v18, %v4592_v49  ;;  %v7071_v18 = vld [vmem:[%s7313_s6 + $0x44] sm:$0x1] }
 0x130   : > { %6507 = vmatmul.mubr.bf16.gmra.mrb[24].mxu0 %v5823_v6  ;;  %v7066_v6 = vld [vmem:[%s9181_s1 + $0x128] sm:$0xff]   ;;  %v4606_v55 = vrot.slane %v7069_v24, 5  ;;  %v4676_v12 = vrot.slane %v8550_v10, 5  ;;  %v4600_v49 = vsel %vm7591_vm5, %v5852_v2, %v4599_v23  ;;  %v7072_v10 = vld [vmem:[%s9181_s1 + $0x138] sm:$0xff]   ;;  %v5848_v23 = vld [vmem:[%s7313_s6 + $0xc0] sm:$0xe] }
 0x131   : > { %6299 = vmatmul.mubr.bf16.gmra.mrb[8].mxu1 %v7004_v39  ;;  %6510 = vmatprep.mubr.bf16.mxu0 %v5824_v3  ;;  %v4595_v39 = vrot.slane %v7067_v33, 5  ;;  %v4672_v3 = vrot.slane %v8538_v21, 5  ;;  %v8862_v7 = vsel %vm7591_vm5, %v5862_v47, %v4669_v14  ;;  %v7070_v21 = vld [vmem:[%s9181_s1 + $0x130] sm:$0xff]   ;;  %v5863_v47 = vrot.slane %v5847_v11, 9 }
 0x132   : > { %6302 = vmatprep.mubr.bf16.mxu1 %v7006_v46  ;;  %6574 = vmatpush3.bf16.msra.mxu1 %v7063_v1  ;;  %v4671_v46 = vrot.slane %v4669_v14, 4  ;;  %v7068_v1 = vld [vmem:[%s7313_s6 + $0x38] sm:$0x1]  ;;  %v5853_v14 = vrot.slane %v5837_v0, 9  ;;  %v4609_v33 = vrot.slane %v7071_v18, 5  ;;  %v4683_v11 = vrot.slane %v8632_v51, 5 }
 0x133   : > { %6567 = vmatprep.subr.bf16.mxu1 %v7066_v6  ;;  %v4602_v60 = vrot.slane %v7068_v1, 5  ;;  %v4596_v36 = vsel %vm7591_vm5, %v4594_v19, %v4595_v39  ;;  %v4678_v39 = vrot.slane %v4676_v12, 4  ;;  %v5538_v19 = vld [vmem:[%s7313_s6 + $0x6c] sm:$0xf]  ;;  %v7012_v18 = vld [vmem:[%s7313_s6 + $0x90] sm:$0xff]   ;;  %v2431_v20 = vshll.u32 %v7078_v63, 16 }
 0x134   : > { %v8874_v25 = vsel %vm7591_vm5, %v4671_v46, %v4672_v3  ;;  %v5883_v3 = vcombine.low %v4593_v48, %v4596_v36  ;;  %v4607_v1 = vsel %vm7591_vm5, %v5853_v14, %v4606_v55  ;;  %v2364_v0 = vshrl.u32 %v5538_v19, 16  ;;  %v5849_v51 = vld [vmem:[%s7313_s6 + $0xcc] sm:$0xe] }
 0x135   : > { %v5894_v16 = vcombine.low %v8862_v7, %v8874_v25  ;;  %v4603_v40 = vsel %vm7591_vm5, %v4601_v56, %v4602_v60  ;;  %v5864_v56 = vrot.slane %v5848_v23, 9  ;;  %v2367_v24 = vshll.u32 %v5538_v19, 16 }
 0x136   : > { %6575 = vmatpush3.bf16.msra.mxu1 %v7066_v6  ;;  %v4679_v6 = vrot.slane %v8571_v27, 5  ;;  %v8894_v27 = vsel %vm7591_vm5, %v5863_v47, %v4676_v12  ;;  %v4686_v36 = vrot.slane %v8683_v26, 5  ;;  %v4685_v12 = vrot.slane %v4683_v11, 4 }
 0x137   : > { %6568 = vmatprep.subr.bf16.mxu1 %v7070_v21  ;;  %v2369_v26 = vrot.slane %v2367_v24, 5  ;;  %v4693_v23 = vrot.slane %v8773_v13, 5 }
 0x138   : > { %6511 = vmatmul.mubr.bf16.gmra.mrb[28].mxu0 %v5825_v28  ;;  %v4608_v28 = vrot.slane %v4606_v55, 4  ;;  %v8901_v46 = vsel %vm7591_vm5, %v4678_v39, %v4679_v6  ;;  %v8915_v55 = vsel %vm7591_vm5, %v5864_v56, %v4683_v11  ;;  %v4690_v39 = vrot.slane %v8735_v31, 5  ;;  %v7074_v56 = vld [vmem:[%s7313_s6 + $0x74] sm:$0x1] }
 0x139   : > { %6303 = vmatmul.mubr.bf16.gmra.mrb[12].mxu1 %v7007_v30  ;;  %6530 = vmatprep.mubr.bf16.mxu0 %v5882_v34  ;;  %v7010_v30 = vld [vmem:[%s7313_s6 + $0x78] sm:$0xff]   ;;  %v5884_v34 = vcombine.low %v4600_v49, %v4603_v40  ;;  %v5895_v2 = vcombine.low %v8894_v27, %v8901_v46  ;;  %v8920_v49 = vsel %vm7591_vm5, %v4685_v12, %v4686_v36  ;;  %v2366_v40 = vrot.slane %v2364_v0, 4  ;;  %v7075_v0 = vld [vmem:[%s7313_s6 + $0x88] sm:$0xf] }
 0x13a   : > { %6306 = vmatprep.mubr.bf16.mxu1 %v7009_v52  ;;  %6576 = vmatpush3.bf16.msra.mxu1 %v7070_v21  ;;  %v7011_v52 = vld [vmem:[%s7313_s6 + $0x84] sm:$0xff]   ;;  %v4610_v60 = vsel %vm7591_vm5, %v4608_v28, %v4609_v33  ;;  %v7073_v21 = vld [vmem:[%s7313_s6 + $0x70] sm:$0xf]  ;;  %v5896_v28 = vcombine.low %v8915_v55, %v8920_v49  ;;  %v4692_v19 = vrot.slane %v4690_v39, 4  ;;  %v2421_v24 = vshll.u32 %v7075_v0, 16 }
 0x13b   : > { %6569 = vmatprep.subr.bf16.mxu1 %v7072_v10  ;;  %v2373_v48 = vshll.u32 %v7073_v21, 16  ;;  %v2377_v47 = vshrl.u32 %v7073_v21, 16  ;;  %v5885_v6 = vcombine.low %v4607_v1, %v4610_v60  ;;  %v2383_v1 = vshll.u32 %v7074_v56, 16 }
 0x13c   : > { %v8942_v11 = vsel %vm7591_vm5, %v4692_v19, %v4693_v23  ;;  %v2425_v21 = vshrl.u32 %v7075_v0, 16  ;;  %v7077_v19 = vld [vmem:[%s7313_s6 + $0xa0] sm:$0xf] }
 0x13d   : > { %v8922_v14 = vrot.slane %v2373_v48, 5  ;;  %v2379_v33 = vrot.slane %v2377_v47, 4  ;;  %v2473_v56 = vshrl.u32 %v7077_v19, 16 }
 0x13e   : > { %6577 = vmatpush3.bf16.msra.mxu1 %v7072_v10  ;;  %v5865_v10 = vrot.slane %v5849_v51, 9 }
 0x13f   : > { %v2380_v31 = vor.u32 %v2379_v33, %v8922_v14  ;;  %v2439_v33 = vshll.u32 %v5547_v61, 16 }
 0x140   : > { %6531 = vmatmul.mubr.bf16.vlgmr.msra.gmra.mrb[0].mxu0 %v5883_v3  ;;  %v7013_v3 = vld [vmem:[%s7313_s6 + $0x9c] sm:$0xff]  }
 0x141   : > { %6307 = vmatmul.mubr.bf16.gmra.mrb[16].mxu1 %v7010_v30  ;;  %6534 = vmatprep.mubr.bf16.mxu0 %v5884_v34  ;;  %v5544_v30 = vld [vmem:[%s7313_s6 + $0x84] sm:$0xf]  ;;  %v8933_v34 = vsel %vm7591_vm5, %v5865_v10, %v4690_v39  ;;  %v2381_v47 = vrot.slane %v2380_v31, 4  ;;  %v7076_v10 = vld [vmem:[%s7313_s6 + $0x94] sm:$0xf]  ;;  %v2441_v0 = vrot.slane %v2439_v33, 5 }
 0x142   : > { %6310 = vmatprep.mubr.bf16.mxu1 %v7011_v52  ;;  %v2370_v52 = vor.u32 %v2369_v26, %v2366_v40  ;;  %v2412_v13 = vshrl.u32 %v5544_v30, 16  ;;  %v2415_v60 = vshll.u32 %v5544_v30, 16  ;;  %v5897_v48 = vcombine.low %v8933_v34, %v8942_v11 }
 0x143   : > { %v8951_v40 = vrot.slane %v2421_v24, 5  ;;  %v2427_v26 = vrot.slane %v2425_v21, 4  ;;  %v2445_v39 = vshll.u32 %v7076_v10, 16  ;;  %v2449_v23 = vshrl.u32 %v7076_v10, 16  ;;  %v7080_v10 = vld [vmem:[%s7313_s6 + $0xa4] sm:$0x1] }
 0x144   : > { %v2371_v36 = vrot.slane %v2370_v52, 4  ;;  %v2414_v12 = vrot.slane %v2412_v13, 4  ;;  %v2417_v51 = vrot.slane %v2415_v60, 5  ;;  %v2469_v52 = vshll.u32 %v7077_v19, 16  ;;  %v7081_v19 = vld [vmem:[%s7313_s6 + $0xac] sm:$0xf] }
 0x145   : > { %v2428_v13 = vor.u32 %v2427_v26, %v8951_v40  ;;  %v8968_v41 = vrot.slane %v2445_v39, 5  ;;  %v2451_v42 = vrot.slane %v2449_v23, 4  ;;  %v2475_v21 = vrot.slane %v2473_v56, 4  ;;  %v5556_v23 = vld [vmem:[%s7313_s6 + $0xb4] sm:$0xf] }
 0x146   : > { %v2479_v39 = vshll.u32 %v7080_v10, 16  ;;  %v2497_v15 = vshrl.u32 %v7081_v19, 16  ;;  %v2511_v63 = vshll.u32 %v5556_v23, 16 }
 0x147   : > { %v2452_v26 = vor.u32 %v2451_v42, %v8968_v41 }
 0x148   : > { %6535 = vmatmul.mubr.bf16.gmra.mrb[4].mxu0 %v5885_v6  ;;  %v5550_v6 = vld [vmem:[%s7313_s6 + $0x9c] sm:$0xf] }
 0x149   : > { %6311 = vmatmul.mubr.bf16.gmra.mrb[20].mxu1 %v7012_v18  ;;  %6538 = vmatprep.mubr.bf16.mxu0 %v5886_v8  ;;  %v2385_v8 = vrot.slane %v2383_v1, 5  ;;  %v2436_v18 = vshrl.u32 %v5547_v61, 16  ;;  %v2463_v30 = vshll.u32 %v5550_v6, 16  ;;  %v2376_v1 = vsel %vm7345_vm2, %v2371_v36, %v8922_v14  ;;  %v7016_v61 = vld [vmem:[%s7313_s6 + $0xc0] sm:$0xff]  }
 0x14a   : > { %6314 = vmatprep.mubr.bf16.mxu1 %v7013_v3  ;;  %v2460_v3 = vshrl.u32 %v5550_v6, 16  ;;  %v8970_v14 = vrot.slane %v2469_v52, 5  ;;  %v2493_v52 = vshll.u32 %v7081_v19, 16 }
 0x14b   : > { %v2386_v31 = vsel %vm7345_vm2, %v2381_v47, %v2385_v8  ;;  %v2438_v60 = vrot.slane %v2436_v18, 4  ;;  %v2465_v24 = vrot.slane %v2463_v30, 5  ;;  %v2433_v8 = vrot.slane %v2431_v20, 5  ;;  %v7082_v20 = vld [vmem:[%s7313_s6 + $0xb8] sm:$0xf] }
 0x14c   : > { %v2429_v47 = vrot.slane %v2428_v13, 4  ;;  %v2476_v33 = vor.u32 %v2475_v21, %v8970_v14  ;;  %v2517_v29 = vshll.u32 %v7082_v20, 16  ;;  %v2521_v44 = vshrl.u32 %v7082_v20, 16 }
 0x14e   : > { %v2477_v13 = vrot.slane %v2476_v33, 4 }
 0x150   : > { %6539 = vmatmul.mubr.bf16.gmra.mrb[8].mxu0 %v5887_v54  ;;  %v2418_v54 = vor.u32 %v2417_v51, %v2414_v12  ;;  %v2442_v12 = vor.u32 %v2441_v0, %v2438_v60  ;;  %v7079_v51 = vld [vmem:[%s7313_s6 + $0x98] sm:$0x1]  ;;  %v2481_v60 = vrot.slane %v2479_v39, 5 }
 0x151   : > { %6315 = vmatmul.mubr.bf16.gmra.mrb[24].mxu1 %v7014_v45  ;;  %6542 = vmatprep.mubr.bf16.mxu0 %v5888_v17  ;;  %v2462_v17 = vrot.slane %v2460_v3, 4  ;;  %v5586_v45 = vcombine.low %v2376_v1, %v2386_v31  ;;  %v2455_v6 = vshll.u32 %v7079_v51, 16  ;;  %v2508_v31 = vshrl.u32 %v5556_v23, 16 }
 0x152   : > { %6318 = vmatprep.mubr.bf16.mxu1 %v7015_v9  ;;  %v2419_v36 = vrot.slane %v2418_v54, 4  ;;  %v5553_v9 = vld [vmem:[%s7313_s6 + $0xa8] sm:$0xf]  ;;  %v2443_v56 = vrot.slane %v2442_v12, 4  ;;  %v2482_v32 = vsel %vm7345_vm2, %v2477_v13, %v2481_v60 }
 0x153   : > { %v2466_v18 = vor.u32 %v2465_v24, %v2462_v17  ;;  %v2484_v3 = vshrl.u32 %v5553_v9, 16  ;;  %v2487_v30 = vshll.u32 %v5553_v9, 16  ;;  %v2457_v1 = vrot.slane %v2455_v6, 5 }
 0x154   : > { %v2424_v43 = vsel %vm7345_vm2, %v2419_v36, %v8951_v40  ;;  %v2495_v17 = vrot.slane %v2493_v52, 5  ;;  %v2499_v24 = vrot.slane %v2497_v15, 4  ;;  %v2510_v21 = vrot.slane %v2508_v31, 4  ;;  %v5559_v36 = vld [vmem:[%s7313_s6 + $0xc0] sm:$0xf] }
 0x155   : > { %v2467_v54 = vrot.slane %v2466_v18, 4  ;;  %v2486_v0 = vrot.slane %v2484_v3, 4  ;;  %v2489_v42 = vrot.slane %v2487_v30, 5  ;;  %v2532_v9 = vshrl.u32 %v5559_v36, 16  ;;  %v7084_v18 = vld [vmem:[%s7313_s6 + $0xc4] sm:$0xf] }
 0x156   : > { %v2541_v33 = vshll.u32 %v7084_v18, 16 }
 0x157   : > { %v2472_v51 = vsel %vm7345_vm2, %v2467_v54, %v8970_v14  ;;  %v2490_v5 = vor.u32 %v2489_v42, %v2486_v0  ;;  %v2545_v14 = vshrl.u32 %v7084_v18, 16  ;;  %v2534_v19 = vrot.slane %v2532_v9, 4 }
 0x158   : > { %6543 = vmatmul.mubr.bf16.gmra.mrb[12].mxu0 %v5889_v38  ;;  %v2434_v38 = vsel %vm7345_vm2, %v2429_v47, %v2433_v8  ;;  %v2523_v8 = vrot.slane %v2521_v44, 4  ;;  %v2448_v47 = vsel %vm7345_vm2, %v2443_v56, %v8968_v41  ;;  %v7083_v41 = vld [vmem:[%s7313_s6 + $0xb0] sm:$0x1]  ;;  %v5590_v58 = vcombine.low %v2472_v51, %v2482_v32  ;;  %v7086_v44 = vld [vmem:[%s7313_s6 + $0xc8] sm:$0x1] }
 0x159   : > { %6319 = vmatmul.mubr.bf16.gmra.mrb[28].mxu1 %v7016_v61  ;;  %6546 = vmatprep.mubr.bf16.mxu0 %v5890_v35  ;;  %v2453_v35 = vrot.slane %v2452_v26, 4  ;;  %v5588_v40 = vcombine.low %v2424_v43, %v2434_v38  ;;  %v2513_v61 = vrot.slane %v2511_v63, 5  ;;  %v2503_v6 = vshll.u32 %v7083_v41, 16 }
 0x15a   : > { %6354 = vmatprep.mubr.bf16.mxu1 %v5586_v45  ;;  %v2519_v45 = vrot.slane %v2517_v29, 5  ;;  %v2535_v26 = vshll.u32 %v5559_v36, 16  ;;  %v2491_v22 = vrot.slane %v2490_v5, 4  ;;  %v2543_v15 = vrot.slane %v2541_v33, 5 }
 0x15b   : > { %v2458_v12 = vsel %vm7345_vm2, %v2453_v35, %v2457_v1  ;;  %v2514_v10 = vor.u32 %v2513_v61, %v2510_v21  ;;  %v2505_v30 = vrot.slane %v2503_v6, 5  ;;  %v2547_v43 = vrot.slane %v2545_v14, 4 }
 0x15c   : > { %v2524_v39 = vor.u32 %v2523_v8, %v2519_v45  ;;  %v5589_v3 = vcombine.low %v2448_v47, %v2458_v12  ;;  %v2537_v52 = vrot.slane %v2535_v26, 5  ;;  %v2496_v31 = vsel %vm7345_vm2, %v2491_v22, %v2495_v17 }
 0x15d   : > { %v2515_v38 = vrot.slane %v2514_v10, 4  ;;  %v2548_v29 = vor.u32 %v2547_v43, %v2543_v15  ;;  %v2551_v35 = vshll.u32 %v7086_v44, 16 }
 0x15e   : > { %v2525_v56 = vrot.slane %v2524_v39, 4  ;;  %v2538_v20 = vor.u32 %v2537_v52, %v2534_v19 }
 0x15f   : > { %v2520_v4 = vsel %vm7345_vm2, %v2515_v38, %v2519_v45  ;;  %v2553_v54 = vrot.slane %v2551_v35, 5 }
 0x160   : > { %6547 = vmatmul.mubr.bf16.gmra.mrb[16].mxu0 %v5891_v62  ;;  %v2500_v62 = vor.u32 %v2499_v24, %v2495_v17  ;;  %v2539_v25 = vrot.slane %v2538_v20, 4 }
 0x161   : > { %6355 = vmatmul.mubr.bf16.vlgmr.msra.gmra.mrb[16].mxu1 %v8793_v50  ;;  %6550 = vmatprep.mubr.bf16.mxu0 %v5892_v59  ;;  %v7085_v50 = vld [vmem:[%s7313_s6 + $0xbc] sm:$0x1]  ;;  %s9048_s6 = sand.u32 1, %s7181_s13  }
 0x162   : > { %6358 = vmatprep.mubr.bf16.mxu1 %v5588_v40  ;;  %v2527_v23 = vshll.u32 %v7085_v50, 16  ;;  %v2501_v59 = vrot.slane %v2500_v62, 4  ;;  %v2544_v13 = vsel %vm7345_vm2, %v2539_v25, %v2543_v15  ;;  %s5319_s29 = sshll.u32 %s9048_s6, 8  ;;  %s5163_s10 = scalar_lea.sflag [#allocation3], %s9048_s6 }
 0x163   : > { %s9055_s30 = scalar_lea.vmem [#allocation2], %s5319_s29 }
 0x164   : > { %v2529_v1 = vrot.slane %v2527_v23, 5  ;;  %v2506_v63 = vsel %vm7345_vm2, %v2501_v59, %v2505_v30  ;;  %s5184_s5 = sshll.u32 %s9055_s30, 4  ;;  %s9098_s5 = int_to_ptr.vmem [resolvable:$true] %s5184_s5 }
 0x165   : > { %s7087_s11 = scalar_lea.vmem %s9098_s5, 4096  ;;  %p7094_p1 = scmp.lt.s32.totalorder %s9098_s5, %s7092_s19 }
 0x166   : > { %v2530_v57 = vsel %vm7345_vm2, %v2525_v56, %v2529_v1  ;;  %p7088_p12 = scmp.ne.s32.totalorder %s9098_s5, %s7087_s11  ;;  %p7095_p2 = scmp.lt.s32.totalorder %s7093_s21, %s7087_s11 }
 0x167   : > { %v5592_v7 = vcombine.low %v2520_v4, %v2530_v57 }
 0x168   : > { %6551 = vmatmul.mubr.bf16.gmra.mrb[20].mxu0 %v5893_v53  ;;  %v5591_v53 = vcombine.low %v2496_v31, %v2506_v63  ;;  %p7089_p13 = pnand %p7088_p12, %p7263_p4  ;;  %p7096_p3 = por %p7095_p2, %p7094_p1 }
 0x169   : > { %6359 = vmatmul.mubr.bf16.gmra.mrb[20].mxu1 %v5589_v3  ;;  %6554 = vmatprep.mubr.bf16.mxu0 %v5894_v16  ;;  %v2549_v16 = vrot.slane %v2548_v29, 4 }
 0x16a   : > { %6362 = vmatprep.mubr.bf16.mxu1 %v5590_v58  ;;  %p7090_p0 = pneg %p7089_p13 }
 0x16b   : > { %v2554_v60 = vsel %vm7345_vm2, %v2549_v16, %v2553_v54 }
 0x16c   : > { %v5593_v0 = vcombine.low %v2544_v13, %v2554_v60  ;;  %p7097_p5 = pnand %p7096_p3, %p7090_p0 }
 0x170   : > { %6555 = vmatmul.mubr.bf16.gmra.mrb[24].mxu0 %v5895_v2 }
 0x171   : > { %6363 = vmatmul.mubr.bf16.gmra.mrb[24].mxu1 %v5591_v53  ;;  %6558 = vmatprep.mubr.bf16.mxu0 %v5896_v28 }
 0x172   : > { %6366 = vmatprep.mubr.bf16.mxu1 %v5592_v7 }
 0x178   : > { %6559 = vmatmul.mubr.bf16.gmra.mrb[28].mxu0 %v5897_v48 }
 0x179   : > { %6367 = vmatmul.mubr.bf16.gmra.mrb[28].mxu1 %v5593_v0 }
 0x1f4   : > { %v6292_v27 = vpop.f32.mrb[0].mxu1 }
 0x1f5   : > { %v1964_v46 = vpop.f32.mrb[1].mxu1 }
 0x1f6   : > { %v6293_v2 = vpop.f32.mrb[2].mxu1 }
 0x1f7   : > { %v1967_v42 = vpop.f32.mrb[3].mxu1 }
 0x1fc   : > { %v6296_v55 = vpop.f32.mrb[4].mxu1 }
 0x1fd   : > { %v1980_v49 = vpop.f32.mrb[5].mxu1 }
 0x1fe   : > { %v6297_v28 = vpop.f32.mrb[6].mxu1 }
 0x1ff   : > { %v1983_v17 = vpop.f32.mrb[7].mxu1 }
 0x204   : > { %v6300_v24 = vpop.f32.mrb[8].mxu1 }
 0x205   : > { %v1996_v40 = vpop.f32.mrb[9].mxu1 }
 0x206   : > { %v6301_v21 = vpop.f32.mrb[10].mxu1 }
 0x207   : > { %v9041_v37 = vpop.f32.mrb[11].mxu1 }
 0x20c   : > { %v9043_v61 = vpop.f32.mrb[12].mxu1 }
 0x20d   : > { %v9045_v45 = vpop.f32.mrb[13].mxu1 }
 0x20e   : > { %v9050_v34 = vpop.f32.mrb[14].mxu1 }
 0x20f   : > { %v9052_v11 = vpop.f32.mrb[15].mxu1 }
 0x213   : > { %v6532_v48 = vpop.f32.mrb[0].mxu0 }
 0x214   : > { %v6578_v8 = vadd.f32 %v6532_v48, %v6292_v27  ;;  %v4858_v36 = vpop.f32.mrb[1].mxu0 }
 0x215   : > { %v6579_v47 = vadd.f32 %v4858_v36, %v1964_v46  ;;  %v6533_v12 = vpop.f32.mrb[2].mxu0 }
 0x216   : > { %5019 = vst [vmem:[%s9055_s30 + $0x10] sm:$0xff] %v6578_v8  ;;  %v6580_v51 = vadd.f32 %v6533_v12, %v6293_v2  ;;  %v4861_v32 = vpop.f32.mrb[3].mxu0  ;;  %v5088_v9 = vmul.f32 %v6578_v8, %v6578_v8 }
 0x217   : > { %5017 = vst [vmem:[%s9055_s30] sm:$0xff] %v6579_v47  ;;  %v6581_v5 = vadd.f32 %v4861_v32, %v1967_v42  ;;  %v5086_v62 = vmul.f32 %v6579_v47, %v6579_v47 }
 0x218   : > { %5020 = vst [vmem:[%s9055_s30 + $0x18] sm:$0xff] %v6580_v51  ;;  %v5089_v39 = vmul.f32 %v6580_v51, %v6580_v51 }
 0x219   : > { %5018 = vst [vmem:[%s9055_s30 + $0x8] sm:$0xff] %v6581_v5  ;;  %v5049_v41 = vadd.f32 %v6581_v5, %v6579_v47  ;;  %v5087_v6 = vmul.f32 %v6581_v5, %v6581_v5 }
 0x21b   : > { %v5050_v26 = vadd.f32 %v6578_v8, %v5049_v41  ;;  %v5118_v18 = vadd.f32 %v5087_v6, %v5086_v62  ;;  %v6536_v33 = vpop.f32.mrb[4].mxu0 }
 0x21c   : > { %v6582_v14 = vadd.f32 %v6536_v33, %v6296_v55  ;;  %v4874_v10 = vpop.f32.mrb[5].mxu0 }
 0x21d   : > { %v5119_v50 = vadd.f32 %v5118_v18, %v5088_v9  ;;  %v6583_v23 = vadd.f32 %v4874_v10, %v1980_v49  ;;  %v5051_v3 = vadd.f32 %v6580_v51, %v5050_v26  ;;  %v6537_v58 = vpop.f32.mrb[6].mxu0 }
 0x21e   : > { %5023 = vst [vmem:[%s9055_s30 + $0x30] sm:$0xff] %v6582_v14  ;;  %v6584_v22 = vadd.f32 %v6537_v58, %v6297_v28  ;;  %v4877_v59 = vpop.f32.mrb[7].mxu0  ;;  %v5092_v1 = vmul.f32 %v6582_v14, %v6582_v14 }
 0x21f   : > { %5021 = vst [vmem:[%s9055_s30 + $0x20] sm:$0xff] %v6583_v23  ;;  %v5052_v30 = vadd.f32 %v6583_v23, %v5051_v3  ;;  %v5090_v19 = vmul.f32 %v6583_v23, %v6583_v23  ;;  %v5120_v52 = vadd.f32 %v5119_v50, %v5089_v39  ;;  %v6585_v15 = vadd.f32 %v4877_v59, %v1983_v17 }
 0x220   : > { %5024 = vst [vmem:[%s9055_s30 + $0x38] sm:$0xff] %v6584_v22  ;;  %v5093_v35 = vmul.f32 %v6584_v22, %v6584_v22 }
 0x221   : > { %v5121_v43 = vadd.f32 %v5120_v52, %v5090_v19  ;;  %5022 = vst [vmem:[%s9055_s30 + $0x28] sm:$0xff] %v6585_v15  ;;  %v5053_v38 = vadd.f32 %v6585_v15, %v5052_v30  ;;  %v5091_v56 = vmul.f32 %v6585_v15, %v6585_v15 }
 0x223   : > { %v5054_v31 = vadd.f32 %v6582_v14, %v5053_v38  ;;  %v5122_v63 = vadd.f32 %v5121_v43, %v5091_v56  ;;  %v6540_v20 = vpop.f32.mrb[8].mxu0 }
 0x224   : > { %v6586_v29 = vadd.f32 %v6540_v20, %v6300_v24  ;;  %v4890_v44 = vpop.f32.mrb[9].mxu0 }
 0x225   : > { %v5123_v4 = vadd.f32 %v5122_v63, %v5092_v1  ;;  %v6587_v57 = vadd.f32 %v4890_v44, %v1996_v40  ;;  %v5055_v53 = vadd.f32 %v6584_v22, %v5054_v31  ;;  %v6541_v7 = vpop.f32.mrb[10].mxu0 }
 0x226   : > { %5027 = vst [vmem:[%s9055_s30 + $0x50] sm:$0xff] %v6586_v29  ;;  %v6588_v25 = vadd.f32 %v6541_v7, %v6301_v21  ;;  %v4893_v16 = vpop.f32.mrb[11].mxu0  ;;  %v5096_v42 = vmul.f32 %v6586_v29, %v6586_v29 }
 0x227   : > { %5025 = vst [vmem:[%s9055_s30 + $0x40] sm:$0xff] %v6587_v57  ;;  %v5056_v54 = vadd.f32 %v6587_v57, %v5055_v53  ;;  %v5094_v13 = vmul.f32 %v6587_v57, %v6587_v57  ;;  %v5124_v60 = vadd.f32 %v5123_v4, %v5093_v35  ;;  %v6589_v0 = vadd.f32 %v4893_v16, %v9041_v37 }
 0x228   : > { %5028 = vst [vmem:[%s9055_s30 + $0x58] sm:$0xff] %v6588_v25  ;;  %v5097_v40 = vmul.f32 %v6588_v25, %v6588_v25 }
 0x229   : > { %v5125_v27 = vadd.f32 %v5124_v60, %v5094_v13  ;;  %5026 = vst [vmem:[%s9055_s30 + $0x48] sm:$0xff] %v6589_v0  ;;  %v5057_v46 = vadd.f32 %v6589_v0, %v5056_v54  ;;  %v5095_v2 = vmul.f32 %v6589_v0, %v6589_v0 }
 0x22b   : > { %v5058_v55 = vadd.f32 %v6586_v29, %v5057_v46  ;;  %v5126_v49 = vadd.f32 %v5125_v27, %v5095_v2  ;;  %v6544_v28 = vpop.f32.mrb[12].mxu0 }
 0x22c   : > { %v6590_v17 = vadd.f32 %v6544_v28, %v9043_v61  ;;  %v4906_v24 = vpop.f32.mrb[13].mxu0 }
 0x22d   : > { %v5127_v21 = vadd.f32 %v5126_v49, %v5096_v42  ;;  %v6591_v37 = vadd.f32 %v4906_v24, %v9045_v45  ;;  %v5059_v48 = vadd.f32 %v6588_v25, %v5058_v55  ;;  %v6545_v8 = vpop.f32.mrb[14].mxu0 }
 0x22e   : > { %5031 = vst [vmem:[%s9055_s30 + $0x70] sm:$0xff] %v6590_v17  ;;  %v6592_v36 = vadd.f32 %v6545_v8, %v9050_v34  ;;  %v4909_v47 = vpop.f32.mrb[15].mxu0  ;;  %v5100_v6 = vmul.f32 %v6590_v17, %v6590_v17 }
 0x22f   : > { %5029 = vst [vmem:[%s9055_s30 + $0x60] sm:$0xff] %v6591_v37  ;;  %v5060_v12 = vadd.f32 %v6591_v37, %v5059_v48  ;;  %v5098_v51 = vmul.f32 %v6591_v37, %v6591_v37  ;;  %v5128_v32 = vadd.f32 %v5127_v21, %v5097_v40  ;;  %v6593_v5 = vadd.f32 %v4909_v47, %v9052_v11 }
 0x230   : > { %5032 = vst [vmem:[%s9055_s30 + $0x78] sm:$0xff] %v6592_v36  ;;  %v5101_v33 = vmul.f32 %v6592_v36, %v6592_v36 }
 0x231   : > { %v5129_v61 = vadd.f32 %v5128_v32, %v5098_v51  ;;  %5030 = vst [vmem:[%s9055_s30 + $0x68] sm:$0xff] %v6593_v5  ;;  %v5061_v62 = vadd.f32 %v6593_v5, %v5060_v12  ;;  %v5099_v41 = vmul.f32 %v6593_v5, %v6593_v5 }
 0x233   : > { %v5062_v45 = vadd.f32 %v6590_v17, %v5061_v62  ;;  %v5130_v9 = vadd.f32 %v5129_v61, %v5099_v41  ;;  %v6548_v26 = vpop.f32.mrb[16].mxu0 }
 0x234   : > { %v6356_v18 = vpop.f32.mrb[16].mxu1  ;;  %v4922_v34 = vpop.f32.mrb[17].mxu0 }
 0x235   : > { %v5131_v14 = vadd.f32 %v5130_v9, %v5100_v6  ;;  %v6594_v10 = vadd.f32 %v6548_v26, %v6356_v18  ;;  %v2782_v39 = vpop.f32.mrb[17].mxu1  ;;  %v5063_v11 = vadd.f32 %v6592_v36, %v5062_v45  ;;  %v6549_v50 = vpop.f32.mrb[18].mxu0 }
 0x236   : > { %v6595_v23 = vadd.f32 %v4922_v34, %v2782_v39  ;;  %v6357_v3 = vpop.f32.mrb[18].mxu1  ;;  %v4925_v58 = vpop.f32.mrb[19].mxu0 }
 0x237   : > { %5035 = vst [vmem:[%s9055_s30 + $0x90] sm:$0xff] %v6594_v10  ;;  %v5132_v22 = vadd.f32 %v5131_v14, %v5101_v33  ;;  %v6596_v59 = vadd.f32 %v6549_v50, %v6357_v3  ;;  %v2785_v30 = vpop.f32.mrb[19].mxu1  ;;  %v5104_v31 = vmul.f32 %v6594_v10, %v6594_v10 }
 0x238   : > { %5033 = vst [vmem:[%s9055_s30 + $0x80] sm:$0xff] %v6595_v23  ;;  %v5064_v19 = vadd.f32 %v6595_v23, %v5063_v11  ;;  %v5102_v52 = vmul.f32 %v6595_v23, %v6595_v23  ;;  %v6597_v15 = vadd.f32 %v4925_v58, %v2785_v30 }
 0x239   : > { %5036 = vst [vmem:[%s9055_s30 + $0x98] sm:$0xff] %v6596_v59  ;;  %v5105_v53 = vmul.f32 %v6596_v59, %v6596_v59 }
 0x23a   : > { %v5133_v43 = vadd.f32 %v5132_v22, %v5102_v52  ;;  %5034 = vst [vmem:[%s9055_s30 + $0x88] sm:$0xff] %v6597_v15  ;;  %v5065_v38 = vadd.f32 %v6597_v15, %v5064_v19  ;;  %v5103_v56 = vmul.f32 %v6597_v15, %v6597_v15 }
 0x23b   : > { %v6552_v1 = vpop.f32.mrb[20].mxu0 }
 0x23c   : > { %v5066_v63 = vadd.f32 %v6594_v10, %v5065_v38  ;;  %v5134_v20 = vadd.f32 %v5133_v43, %v5103_v56  ;;  %v6360_v29 = vpop.f32.mrb[20].mxu1  ;;  %v4938_v44 = vpop.f32.mrb[21].mxu0 }
 0x23d   : > { %v6598_v35 = vadd.f32 %v6552_v1, %v6360_v29  ;;  %v2798_v4 = vpop.f32.mrb[21].mxu1  ;;  %v6553_v57 = vpop.f32.mrb[22].mxu0 }
 0x23e   : > { %v5135_v7 = vadd.f32 %v5134_v20, %v5104_v31  ;;  %v6599_v25 = vadd.f32 %v4938_v44, %v2798_v4  ;;  %v5067_v16 = vadd.f32 %v6596_v59, %v5066_v63  ;;  %v6361_v54 = vpop.f32.mrb[22].mxu1  ;;  %v4941_v13 = vpop.f32.mrb[23].mxu0 }
 0x23f   : > { %5039 = vst [vmem:[%s9055_s30 + $0xb0] sm:$0xff] %v6598_v35  ;;  %v6600_v60 = vadd.f32 %v6553_v57, %v6361_v54  ;;  %v2801_v0 = vpop.f32.mrb[23].mxu1  ;;  %v5108_v24 = vmul.f32 %v6598_v35, %v6598_v35 }
 0x240   : > { %5037 = vst [vmem:[%s9055_s30 + $0xa0] sm:$0xff] %v6599_v25  ;;  %v5068_v27 = vadd.f32 %v6599_v25, %v5067_v16  ;;  %v5106_v46 = vmul.f32 %v6599_v25, %v6599_v25  ;;  %v5136_v2 = vadd.f32 %v5135_v7, %v5105_v53  ;;  %v6601_v42 = vadd.f32 %v4941_v13, %v2801_v0 }
 0x241   : > { %5040 = vst [vmem:[%s9055_s30 + $0xb8] sm:$0xff] %v6600_v60  ;;  %v5109_v12 = vmul.f32 %v6600_v60, %v6600_v60 }
 0x242   : > { %v5137_v55 = vadd.f32 %v5136_v2, %v5106_v46  ;;  %5038 = vst [vmem:[%s9055_s30 + $0xa8] sm:$0xff] %v6601_v42  ;;  %v5069_v49 = vadd.f32 %v6601_v42, %v5068_v27  ;;  %v5107_v28 = vmul.f32 %v6601_v42, %v6601_v42 }
 0x243   : > { %v6556_v17 = vpop.f32.mrb[24].mxu0 }
 0x244   : > { %v5070_v40 = vadd.f32 %v6598_v35, %v5069_v49  ;;  %v5138_v21 = vadd.f32 %v5137_v55, %v5107_v28  ;;  %v6364_v37 = vpop.f32.mrb[24].mxu1  ;;  %v4954_v48 = vpop.f32.mrb[25].mxu0 }
 0x245   : > { %v6602_v8 = vadd.f32 %v6556_v17, %v6364_v37  ;;  %v2814_v36 = vpop.f32.mrb[25].mxu1  ;;  %v6557_v47 = vpop.f32.mrb[26].mxu0 }
 0x246   : > { %v5139_v51 = vadd.f32 %v5138_v21, %v5108_v24  ;;  %v6603_v32 = vadd.f32 %v4954_v48, %v2814_v36  ;;  %v5071_v5 = vadd.f32 %v6600_v60, %v5070_v40  ;;  %v6365_v61 = vpop.f32.mrb[26].mxu1  ;;  %v4957_v62 = vpop.f32.mrb[27].mxu0 }
 0x247   : > { %5043 = vst [vmem:[%s9055_s30 + $0xd0] sm:$0xff] %v6602_v8  ;;  %v6604_v41 = vadd.f32 %v6557_v47, %v6365_v61  ;;  %v2817_v6 = vpop.f32.mrb[27].mxu1  ;;  %v5112_v39 = vmul.f32 %v6602_v8, %v6602_v8 }
 0x248   : > { %5041 = vst [vmem:[%s9055_s30 + $0xc0] sm:$0xff] %v6603_v32  ;;  %v5072_v45 = vadd.f32 %v6603_v32, %v5071_v5  ;;  %v5110_v9 = vmul.f32 %v6603_v32, %v6603_v32  ;;  %v5140_v26 = vadd.f32 %v5139_v51, %v5109_v12  ;;  %v6605_v18 = vadd.f32 %v4957_v62, %v2817_v6 }
 0x249   : > { %5044 = vst [vmem:[%s9055_s30 + $0xd8] sm:$0xff] %v6604_v41  ;;  %v5113_v30 = vmul.f32 %v6604_v41, %v6604_v41 }
 0x24a   : > { %v5141_v34 = vadd.f32 %v5140_v26, %v5110_v9  ;;  %5042 = vst [vmem:[%s9055_s30 + $0xc8] sm:$0xff] %v6605_v18  ;;  %v5073_v33 = vadd.f32 %v6605_v18, %v5072_v45  ;;  %v5111_v14 = vmul.f32 %v6605_v18, %v6605_v18 }
 0x24b   : > { %v6560_v10 = vpop.f32.mrb[28].mxu0 }
 0x24c   : > { %v5074_v11 = vadd.f32 %v6602_v8, %v5073_v33  ;;  %v5142_v50 = vadd.f32 %v5141_v34, %v5111_v14  ;;  %v6368_v23 = vpop.f32.mrb[28].mxu1  ;;  %v4970_v3 = vpop.f32.mrb[29].mxu0 }
 0x24d   : > { %v6606_v58 = vadd.f32 %v6560_v10, %v6368_v23  ;;  %v2830_v22 = vpop.f32.mrb[29].mxu1  ;;  %v6561_v59 = vpop.f32.mrb[30].mxu0 }
 0x24e   : > { %v5143_v19 = vadd.f32 %v5142_v50, %v5112_v39  ;;  %v6607_v52 = vadd.f32 %v4970_v3, %v2830_v22  ;;  %v5075_v15 = vadd.f32 %v6604_v41, %v5074_v11  ;;  %v6369_v43 = vpop.f32.mrb[30].mxu1  ;;  %v4973_v38 = vpop.f32.mrb[31].mxu0 }
 0x24f   : > { %5047 = vst [vmem:[%s9055_s30 + $0xf0] sm:$0xff] %v6606_v58  ;;  %v6608_v56 = vadd.f32 %v6561_v59, %v6369_v43  ;;  %v2833_v1 = vpop.f32.mrb[31].mxu1 }
 0x250   : > { %5045 = vst [vmem:[%s9055_s30 + $0xe0] sm:$0xff] %v6607_v52  ;;  %v5076_v31 = vadd.f32 %v6607_v52, %v5075_v15  ;;  %v5114_v63 = vmul.f32 %v6607_v52, %v6607_v52  ;;  %v5144_v20 = vadd.f32 %v5143_v19, %v5113_v30  ;;  %v6609_v29 = vadd.f32 %v4973_v38, %v2833_v1 }
 0x251   : > { %5048 = vst [vmem:[%s9055_s30 + $0xf8] sm:$0xff] %v6608_v56 }
 0x252   : > { %v5145_v44 = vadd.f32 %v5144_v20, %v5114_v63  ;;  %5046 = vst [vmem:[%s9055_s30 + $0xe8] sm:$0xff] %v6609_v29  ;;  %v5077_v35 = vadd.f32 %v6609_v29, %v5076_v31  ;;  %v5115_v4 = vmul.f32 %v6609_v29, %v6609_v29 }
 0x253   : > { %7100 = shalt.err (!%p7097_p5)
}
 0x254   : > { %s7101_s23 = scalar_lea.hbm %s9096_s9, 4096  ;;  %s7105_s28 = scalar_lea.hbm %s9182_s2, 8192 }
 0x255   : > { %p7102_p6 = scmp.ne.s32.totalorder %s9096_s9, %s7101_s23  ;;  %p7106_p10 = scmp.lt.u32.totalorder %s9096_s9, %s9182_s2 }
 0x256   : > { %p7107_p11 = scmp.lt.u32.totalorder %s7105_s28, %s7101_s23  ;;  %p7109_p13 = scmp.lt.u32.totalorder %s7101_s23, %s9096_s9 }
 0x257   : > { %p7103_p7 = pnand %p7102_p6, %p7263_p4 }
 0x258   : > { %p7108_p12 = por %p7107_p11, %p7106_p10 }
 0x259   : > { %p7104_p9 = pneg %p7103_p7 }
 0x25a   : > { %p7110_p0 = por %p7109_p13, %p7108_p12 }
 0x25c   : > { %p7111_p1 = pnand %p7110_p0, %p7104_p9 }
 0x25e   : > { %7114 = shalt.err (!%p7111_p1)
}
 0x25f   : > { %s7200_s4 = smov 128   ;;  %s7201_s7 = smov 8   ;;  %v5116_v57 = vmul.f32 %v6606_v58, %v6606_v58  ;;  %v5078_v53 = vadd.f32 %v6606_v58, %v5077_v35  ;;  %v5146_v7 = vadd.f32 %v5145_v44, %v5115_v4  ;;  %v5117_v25 = vmul.f32 %v6608_v56, %v6608_v56 }
 0x260   : > { %6835 = dma.vmem_to_hbm [thread:$0]  (%p7263_p4), %s9098_s5, 4096, %s9096_s9, %s5163_s10, %s7200_s4, %s7200_s4, %s7201_s7   ;;  %v5155_v46 = vlaneseq }
 0x261   : > { %v5079_v16 = vadd.f32 %v6608_v56, %v5078_v53  ;;  %v5147_v54 = vadd.f32 %v5146_v7, %v5116_v57  ;;  %s5320_s8 = sshll.u32 %s9048_s6, 3  ;;  %s5910_s5 = sshll.u32 %s7189_s15, 7 }
 0x262   : > { %v5156_v28 = vshrl.u32 %v5155_v46, 7  ;;  %s190_s9 = scalar_lea.vmem [#allocation4], %s5320_s8  ;;  %s9132_s19 = scalar_lea.hbm %s9183_s3, %s5910_s5 }
 0x263   : > { %v5080_v13 = vrot.slane %v5079_v16, 4  ;;  %v5148_v60 = vadd.f32 %v5147_v54, %v5117_v25  ;;  %s5201_s10 = sshll.u32 %s190_s9, 4  ;;  %s5168_s21 = scalar_lea.sflag [#allocation5], %s9048_s6  ;;  %s9134_s10 = int_to_ptr.vmem [resolvable:$true] %s5201_s10 }
 0x264   : > { %vm5158_vm6 = vcmp.eq.s32.totalorder %v5156_v28, 1  ;;  %vm5157_vm7 = vcmp.eq.s32.totalorder %v5156_v28, 0  ;;  %s7115_s15 = scalar_lea.vmem %s9134_s10, 128  ;;  %s7202_s23 = smov [#allocation4]  }
 0x265   : > { %v5081_v0 = vadd.f32 %v5080_v13, %v5079_v16  ;;  %v5149_v27 = vrot.slane %v5148_v60, 4  ;;  %p7116_p2 = scmp.ne.s32.totalorder %s9134_s10, %s7115_s15  ;;  %s7119_s26 = sshll.u32 %s7202_s23, 4  ;;  %s7120_s26 = int_to_ptr.vmem [resolvable:$false] %s7119_s26 }
 0x266   : > { %s7121_s27 = scalar_lea.vmem %s7120_s26, 256  ;;  %p7122_p6 = scmp.lt.s32.totalorder %s9134_s10, %s7120_s26 }
 0x267   : > { %v5082_v2 = vrot.slane %v5081_v0, 2  ;;  %v5150_v42 = vadd.f32 %v5149_v27, %v5148_v60  ;;  %p7117_p3 = pnand %p7116_p2, %p7263_p4  ;;  %p7123_p7 = scmp.lt.s32.totalorder %s7121_s27, %s7115_s15 }
 0x269   : > { %v5083_v55 = vadd.f32 %v5082_v2, %v5081_v0  ;;  %v5151_v49 = vrot.slane %v5150_v42, 2  ;;  %p7118_p5 = pneg %p7117_p3  ;;  %p7124_p9 = por %p7123_p7, %p7122_p6 }
 0x26b   : > { %v5152_v17 = vadd.f32 %v5151_v49, %v5150_v42  ;;  %v5084_v24 = vrot.slane %v5083_v55, 1  ;;  %p7125_p10 = pnand %p7124_p9, %p7118_p5 }
 0x26d   : > { %v5153_v40 = vrot.slane %v5152_v17, 1  ;;  %v5085_v37 = vadd.f32 %v5084_v24, %v5083_v55 }
 0x26f   : > { %v5154_v21 = vadd.f32 %v5153_v40, %v5152_v17 }
 0x271   : > { %v5159_v48 = vsel %vm5158_vm6, %v5154_v21, 0.0 }
 0x272   : > { %v5160_v8 = vsel %vm5157_vm7, %v5085_v37, %v5159_v48 }
 0x273   : > { %5161 = vst [vmem:[%s190_s9] sm:$0xff] %v5160_v8 }
 0x274   : > { %7128 = shalt.err (!%p7125_p10)
}
 0x275   : > { %s7129_s6 = scalar_lea.hbm %s9132_s19, 128  ;;  %s7133_s30 = scalar_lea.hbm %s9183_s3, 256 }
 0x276   : > { %p7130_p11 = scmp.ne.s32.totalorder %s9132_s19, %s7129_s6  ;;  %p7134_p0 = scmp.lt.u32.totalorder %s9132_s19, %s9183_s3 }
 0x277   : > { %p7135_p1 = scmp.lt.u32.totalorder %s7133_s30, %s7129_s6  ;;  %p7137_p3 = scmp.lt.u32.totalorder %s7129_s6, %s9132_s19 }
 0x278   : > { %p7131_p12 = pnand %p7130_p11, %p7263_p4 }
 0x279   : > { %p7136_p2 = por %p7135_p1, %p7134_p0 }
 0x27a   : > { %p7132_p13 = pneg %p7131_p12 }
 0x27b   : > { %p7138_p5 = por %p7137_p3, %p7136_p2 }
 0x27d   : > { %p7139_p6 = pnand %p7138_p5, %p7132_p13 }
 0x27f   : > { %7142 = shalt.err (!%p7139_p6)
}
 0x280   : > { %6836 = dma.vmem_to_hbm [thread:$0]  (%p7263_p4), %s9134_s10, 128, %s9132_s19, %s5168_s21  }
 0x281 PF: > { %p6846_p7 = scmp.ge.s32.totalorder %s7197_s17, 2  ;;  %s5213_s8 = sand.u32 1, %s7177_s12  }
 0x282   : > { %s5214_s5 = scalar_lea.sflag [#allocation3], %s5213_s8 }
 0x283   : > { %p6840_p9 = pnand %p6846_p7, %p7270_p8 }
 0x285   : > { %7168 = dma.done.wait (!%p6840_p9), %s5214_s5, 4096  }
 0x286   : > { %7170 = vsyncadd (!%p6840_p9), %s5214_s5, 4294963200  ;;  %s5223_s9 = scalar_lea.sflag [#allocation5], %s5213_s8 }
 0x287   : > { %7172 = dma.done.wait (!%p6840_p9), %s5223_s9, 128  }
 0x288   : > { %7174 = vsyncadd (!%p6840_p9), %s5223_s9, 4294967168  ;;  %s20_s17 = sadd.s32 1, %s7197_s17   ;;  %s9252_s12 = smov %s7181_s13 }
 0x289   : > { %p17_p10 = scmp.ge.s32.totalorder %s20_s17, 4   ;;  %s9253_s13 = smov %s7185_s14 }
 0x28a   : > { %s9254_s14 = smov %s7276_s25  ;;  %s9255_s15 = smov %s7193_s16 }
 0x28b   : > { %s9256_s16 = smov %s9258_s20  ;;  %19 = sbr.rel (!%p17_p10) target bundleno = 6 (0x6), region = 91 }
 0x292   :  { %5228 = vsyncpa [#allocation3], 1 }
 0x293   :  { %5230 = vsyncpa [#allocation3 + $0x1], 1 }
 0x294   :  { %5231 = vsyncpa [#allocation5], 1 }
 0x295   :  { %5233 = vsyncpa [#allocation5 + $0x1], 1 }

</bundles_post_ra>
